<compile_context>
chip_gen: v6e
topology: v6e:2x2x1
jax: 0.10.0
libtpu: 0.0.40
codegen_flags: <defaults>
</compile_context>

<pallas_src>
import functools

import jax
import jax.numpy as jnp
from jax import lax
from jax.experimental import pallas as pl
from jax.experimental.pallas import tpu as pltpu


# ----------------------------- Pallas kernels ------------------------------

def _matmul_bnstat_kernel(a_ref, b_ref, y_ref, sum_ref, sq_ref, s_acc, q_acc):
    """y = A @ B (bf16 in, f32 acc) + per-column sum / sumsq for BatchNorm."""
    i = pl.program_id(0)

    @pl.when(i == 0)
    def _():
        s_acc[...] = jnp.zeros_like(s_acc)
        q_acc[...] = jnp.zeros_like(q_acc)

    y = jnp.dot(a_ref[...], b_ref[...], preferred_element_type=jnp.float32)
    y_ref[...] = y
    s_acc[...] += jnp.sum(y, axis=0, keepdims=True)
    q_acc[...] += jnp.sum(y * y, axis=0, keepdims=True)

    @pl.when(i == pl.num_programs(0) - 1)
    def _():
        sum_ref[...] = s_acc[...]
        sq_ref[...] = q_acc[...]


def _bn_act_kernel(y_ref, s_ref, b_ref, o_ref, *, act, slope):
    """o = act(y * scale + shift), per-column scale/shift (BN apply)."""
    y = y_ref[...] * s_ref[...] + b_ref[...]
    if act == "relu":
        y = jnp.maximum(y, 0.0)
    elif act == "leaky_relu":
        y = jnp.where(y >= 0.0, y, slope * y)
    o_ref[...] = y.astype(o_ref.dtype)


def _bn_res_act_kernel(y_ref, s_ref, b_ref, r_ref, rs_ref, rb_ref, o_ref,
                       *, act, slope):
    """o = act(y*scale + shift + r*scale_r + shift_r)  (BN + residual + act)."""
    y = y_ref[...] * s_ref[...] + b_ref[...]
    y = y + r_ref[...] * rs_ref[...] + rb_ref[...]
    if act == "relu":
        y = jnp.maximum(y, 0.0)
    elif act == "leaky_relu":
        y = jnp.where(y >= 0.0, y, slope * y)
    o_ref[...] = y.astype(o_ref.dtype)


# ----------------------------- kernel wrappers ------------------------------

def _rup(x, m):
    return ((x + m - 1) // m) * m


def _rows_tile(m):
    """Pad row count to a TPU-friendly value; return (padded_rows, row_tile)."""
    if m <= 512:
        mp = _rup(m, 8)
        return mp, mp          # single whole-extent tile
    mp = _rup(m, 256)
    return mp, 256


def _pad_rows(a, rows):
    return jnp.pad(a, ((0, rows - a.shape[0]), (0, 0)))


def pallas_matmul_bnstats(a, b):
    """a: (M, K) f32, b: (K, C) f32.

    Returns (y_padded (Mp, C) f32, col_sum (1, C), col_sumsq (1, C)).
    Zero-padded rows contribute 0 to the column statistics.
    """
    m, k = a.shape
    _, c = b.shape
    mp, tm = _rows_tile(m)
    a_p = _pad_rows(a, mp).astype(jnp.bfloat16)
    b_p = b.astype(jnp.bfloat16)

    y, s, q = pl.pallas_call(
        _matmul_bnstat_kernel,
        out_shape=[jax.ShapeDtypeStruct((mp, c), jnp.float32),
                   jax.ShapeDtypeStruct((1, c), jnp.float32),
                   jax.ShapeDtypeStruct((1, c), jnp.float32)],
        grid_spec=pltpu.PrefetchScalarGridSpec(
            num_scalar_prefetch=0,
            grid=(mp // tm,),
            in_specs=[
                pl.BlockSpec((tm, k), lambda i: (i, 0)),   # full K extent
                pl.BlockSpec((k, c), lambda i: (0, 0)),    # weight resident
            ],
            out_specs=[
                pl.BlockSpec((tm, c), lambda i: (i, 0)),
                pl.BlockSpec((1, c), lambda i: (0, 0)),
                pl.BlockSpec((1, c), lambda i: (0, 0)),
            ],
            scratch_shapes=[pltpu.VMEM((1, c), jnp.float32),
                            pltpu.VMEM((1, c), jnp.float32)],
        ),
        compiler_params=pltpu.CompilerParams(
            dimension_semantics=("arbitrary",)),   # stats carried across row tiles
    )(a_p, b_p)
    return y, s, q


def pallas_bn_act(y_padded, scale, shift, act, slope=0.02):
    """y_padded: (Mp, C) f32; scale/shift: (C,)."""
    mp, c = y_padded.shape
    _, tm = _rows_tile(mp)
    return pl.pallas_call(
        functools.partial(_bn_act_kernel, act=act, slope=slope),
        out_shape=jax.ShapeDtypeStruct((mp, c), jnp.float32),
        grid_spec=pltpu.PrefetchScalarGridSpec(
            num_scalar_prefetch=0,
            grid=(mp // tm,),
            in_specs=[
                pl.BlockSpec((tm, c), lambda i: (i, 0)),
                pl.BlockSpec((1, c), lambda i: (0, 0)),
                pl.BlockSpec((1, c), lambda i: (0, 0)),
            ],
            out_specs=pl.BlockSpec((tm, c), lambda i: (i, 0)),
        ),
        compiler_params=pltpu.CompilerParams(
            dimension_semantics=("parallel",)),
    )(y_padded, scale.reshape(1, c), shift.reshape(1, c))


def pallas_bn_res_act(y_padded, scale, shift, r, scale_r, shift_r, act,
                      slope=0.02):
    """Fused BN-apply + residual (with its own affine) + activation."""
    mp, c = y_padded.shape
    _, tm = _rows_tile(mp)
    r_p = _pad_rows(r.astype(jnp.float32), mp)
    return pl.pallas_call(
        functools.partial(_bn_res_act_kernel, act=act, slope=slope),
        out_shape=jax.ShapeDtypeStruct((mp, c), jnp.float32),
        grid_spec=pltpu.PrefetchScalarGridSpec(
            num_scalar_prefetch=0,
            grid=(mp // tm,),
            in_specs=[
                pl.BlockSpec((tm, c), lambda i: (i, 0)),
                pl.BlockSpec((1, c), lambda i: (0, 0)),
                pl.BlockSpec((1, c), lambda i: (0, 0)),
                pl.BlockSpec((tm, c), lambda i: (i, 0)),
                pl.BlockSpec((1, c), lambda i: (0, 0)),
                pl.BlockSpec((1, c), lambda i: (0, 0)),
            ],
            out_specs=pl.BlockSpec((tm, c), lambda i: (i, 0)),
        ),
        compiler_params=pltpu.CompilerParams(
            dimension_semantics=("parallel",)),
    )(y_padded, scale.reshape(1, c), shift.reshape(1, c),
      r_p, scale_r.reshape(1, c), shift_r.reshape(1, c))


# --------------------------- conv lowering (glue) ---------------------------

def _im2col(x_nhwc, k, pad, stride):
    """Conv(k, stride, pad) as patches @ weight-matrix (K-order = kh, kw, cin)."""
    n, h, w, cin = x_nhwc.shape
    ho = (h + 2 * pad - k) // stride + 1
    wo = (w + 2 * pad - k) // stride + 1
    xp = jnp.pad(x_nhwc, ((0, 0), (pad, pad), (pad, pad), (0, 0)))
    cols = []
    for a in range(k):
        for b in range(k):
            cols.append(xp[:, a:a + stride * (ho - 1) + 1:stride,
                           b:b + stride * (wo - 1) + 1:stride, :])
    patches = jnp.concatenate(cols, axis=-1)          # (N, Ho, Wo, k*k*Cin)
    return patches.reshape(n * ho * wo, k * k * cin), (n, ho, wo)


def _oihw_to_mat(w_oihw):
    """PyTorch Conv2d weight (O, I, kH, kW) -> (kH*kW*I, O) matching im2col."""
    o, i, kh, kw = w_oihw.shape
    return jnp.transpose(w_oihw, (2, 3, 1, 0)).reshape(kh * kw * i, o)


def _bn_scale_shift(col_sum, col_sq, m, gamma, beta, eps=1e-5):
    """Training-mode batch-norm affine from fused column statistics."""
    mean = col_sum[0] / m
    var = jnp.maximum(col_sq[0] / m - mean * mean, 0.0)   # guard f32 cancellation
    inv = lax.rsqrt(var + eps)
    scale = gamma * inv
    shift = beta - mean * scale
    return scale, shift


# ------------------------------- BasicBlock ---------------------------------

def init_params(key, in_planes, planes, stride):
    ks = jax.random.split(key, 3)

    def nrm(k, shape, fan_in):
        return (jax.random.normal(k, shape, jnp.float32) / jnp.sqrt(fan_in))

    params = {
        "conv1_w": nrm(ks[0], (planes, in_planes, 3, 3), 9 * in_planes),
        "bn1_gamma": jnp.ones((planes,), jnp.float32),
        "bn1_beta": jnp.zeros((planes,), jnp.float32),
        "conv2_w": nrm(ks[1], (planes, planes, 3, 3), 9 * planes),
        "bn2_gamma": jnp.ones((planes,), jnp.float32),
        "bn2_beta": jnp.zeros((planes,), jnp.float32),
    }
    if stride != 1 or in_planes != planes:
        params["sc_w"] = nrm(ks[2], (planes, in_planes, 1, 1), in_planes)
        params["sc_gamma"] = jnp.ones((planes,), jnp.float32)
        params["sc_beta"] = jnp.zeros((planes,), jnp.float32)
    return params


def basic_block_forward(params, x_nchw, *, stride=1, nonlin="relu"):
    """Forward pass of BasicBlock (NCHW in, NCHW out)."""
    x = jnp.transpose(x_nchw, (0, 2, 3, 1)).astype(jnp.float32)   # NHWC
    n, h, w, cin = x.shape
    planes = params["conv1_w"].shape[0]

    # --- conv1 (3x3, stride, pad=1) + bn1 + act  (stats fused in matmul) ---
    p1, (n, ho, wo) = _im2col(x, 3, 1, stride)
    m = n * ho * wo
    y1, s1, q1 = pallas_matmul_bnstats(p1, _oihw_to_mat(params["conv1_w"]))
    scale1, shift1 = _bn_scale_shift(s1, q1, m, params["bn1_gamma"],
                                     params["bn1_beta"])
    h1 = pallas_bn_act(y1, scale1, shift1, act=nonlin)[:m]

    # --- conv2 (3x3, stride 1, pad=1) + bn2 (activation deferred to fusion) ---
    p2, _ = _im2col(h1.reshape(n, ho, wo, planes), 3, 1, 1)
    y2, s2, q2 = pallas_matmul_bnstats(p2, _oihw_to_mat(params["conv2_w"]))
    scale2, shift2 = _bn_scale_shift(s2, q2, m, params["bn2_gamma"],
                                     params["bn2_beta"])

    # --- shortcut ---
    if stride != 1 or cin != planes:
        xs = x[:, ::stride, ::stride, :].reshape(m, cin)          # 1x1 conv = matmul
        yr, sr, qr = pallas_matmul_bnstats(xs, _oihw_to_mat(params["sc_w"]))
        scale_r, shift_r = _bn_scale_shift(sr, qr, m, params["sc_gamma"],
                                           params["sc_beta"])
    else:
        yr = x.reshape(m, cin)                                    # identity
        scale_r = jnp.ones((planes,), jnp.float32)
        shift_r = jnp.zeros((planes,), jnp.float32)

    # --- fused: bn2-apply + (bn_s-applied) residual add + activation ---
    out = pallas_bn_res_act(y2, scale2, shift2, yr, scale_r, shift_r,
                            act=nonlin)[:m]
    out = out.reshape(n, ho, wo, planes)
    return jnp.transpose(out, (0, 3, 1, 2))


# ---------------------------------- main -------------------------------------

if __name__ == "__main__":
    key = jax.random.PRNGKey(0)
    kp1, kp2, kx = jax.random.split(key, 3)

    batch, in_planes, size = 2, 32, 16
    x = jax.random.normal(kx, (batch, in_planes, size, size), jnp.float32)

    # Config A: identity shortcut (stride=1, in_planes == planes), relu.
    planes_a = 32
    params_a = init_params(kp1, in_planes, planes_a, stride=1)
    fwd_a = jax.jit(functools.partial(basic_block_forward, stride=1,
                                      nonlin="relu"))
    out_a = jax.block_until_ready(fwd_a(params_a, x))
    assert out_a.shape == (batch, planes_a, size, size), out_a.shape
    assert bool(jnp.all(jnp.isfinite(out_a)))
    assert bool(jnp.all(out_a >= 0.0))            # ReLU output range

    # Config B: projection shortcut (stride=2, channel change), leaky_relu.
    planes_b = 64
    params_b = init_params(kp2, in_planes, planes_b, stride=2)
    fwd_b = jax.jit(functools.partial(basic_block_forward, stride=2,
                                      nonlin="leaky_relu"))
    out_b = jax.block_until_ready(fwd_b(params_b, x))
    assert out_b.shape == (batch, planes_b, size // 2, size // 2), out_b.shape
    assert bool(jnp.all(jnp.isfinite(out_b)))

    print("KERNEL_OK")
</pallas_src>

<mosaic_0001>
module attributes {stable_mosaic.version = 11 : i64} {
  func.func @_bn_res_act_kernel(%arg0: i32, %arg1: memref<512x32xf32, #tpu.memory_space<vmem>>, %arg2: memref<1x32xf32, #tpu.memory_space<vmem>>, %arg3: memref<1x32xf32, #tpu.memory_space<vmem>>, %arg4: memref<512x32xf32, #tpu.memory_space<vmem>>, %arg5: memref<1x32xf32, #tpu.memory_space<vmem>>, %arg6: memref<1x32xf32, #tpu.memory_space<vmem>>, %arg7: memref<512x32xf32, #tpu.memory_space<vmem>>) attributes {dimension_semantics = [#tpu.dimension_semantics<parallel>], iteration_bounds = array<i64: 1>, scalar_prefetch = 0 : i64, scratch_operands = 0 : i64, tpu.core_type = #tpu.core_type<tc>, window_params = [{transform_indices = @transform_0, window_bounds = array<i64: 512, 32>}, {pipeline_mode = #tpu.pipeline_mode<synchronous>, transform_indices = @transform_1, window_bounds = array<i64: 1, 32>}, {pipeline_mode = #tpu.pipeline_mode<synchronous>, transform_indices = @transform_2, window_bounds = array<i64: 1, 32>}, {transform_indices = @transform_3, window_bounds = array<i64: 512, 32>}, {pipeline_mode = #tpu.pipeline_mode<synchronous>, transform_indices = @transform_4, window_bounds = array<i64: 1, 32>}, {pipeline_mode = #tpu.pipeline_mode<synchronous>, transform_indices = @transform_5, window_bounds = array<i64: 1, 32>}, {transform_indices = @transform_6, window_bounds = array<i64: 512, 32>}]} {
    %c0 = arith.constant 0 : index
    %c0_0 = arith.constant 0 : index
    %0 = vector.load %arg1[%c0, %c0_0] : memref<512x32xf32, #tpu.memory_space<vmem>>, vector<512x32xf32>
    %c0_1 = arith.constant 0 : index
    %c0_2 = arith.constant 0 : index
    %1 = vector.load %arg2[%c0_1, %c0_2] : memref<1x32xf32, #tpu.memory_space<vmem>>, vector<1x32xf32>
    %2 = vector.broadcast %1 : vector<1x32xf32> to vector<512x32xf32>
    %3 = arith.mulf %0, %2 : vector<512x32xf32>
    %c0_3 = arith.constant 0 : index
    %c0_4 = arith.constant 0 : index
    %4 = vector.load %arg3[%c0_3, %c0_4] : memref<1x32xf32, #tpu.memory_space<vmem>>, vector<1x32xf32>
    %5 = vector.broadcast %4 : vector<1x32xf32> to vector<512x32xf32>
    %6 = arith.addf %3, %5 : vector<512x32xf32>
    %c0_5 = arith.constant 0 : index
    %c0_6 = arith.constant 0 : index
    %7 = vector.load %arg4[%c0_5, %c0_6] : memref<512x32xf32, #tpu.memory_space<vmem>>, vector<512x32xf32>
    %c0_7 = arith.constant 0 : index
    %c0_8 = arith.constant 0 : index
    %8 = vector.load %arg5[%c0_7, %c0_8] : memref<1x32xf32, #tpu.memory_space<vmem>>, vector<1x32xf32>
    %9 = vector.broadcast %8 : vector<1x32xf32> to vector<512x32xf32>
    %10 = arith.mulf %7, %9 : vector<512x32xf32>
    %11 = arith.addf %6, %10 : vector<512x32xf32>
    %c0_9 = arith.constant 0 : index
    %c0_10 = arith.constant 0 : index
    %12 = vector.load %arg6[%c0_9, %c0_10] : memref<1x32xf32, #tpu.memory_space<vmem>>, vector<1x32xf32>
    %13 = vector.broadcast %12 : vector<1x32xf32> to vector<512x32xf32>
    %14 = arith.addf %11, %13 : vector<512x32xf32>
    %cst = arith.constant 0.000000e+00 : f32
    %15 = vector.broadcast %cst : f32 to vector<512x32xf32>
    %16 = arith.maximumf %14, %15 : vector<512x32xf32>
    %c0_11 = arith.constant 0 : index
    %c0_12 = arith.constant 0 : index
    %17 = vector.load %arg7[%c0_11, %c0_12] : memref<512x32xf32, #tpu.memory_space<vmem>>, vector<512x32xf32>
    tpu.vector_store %arg7[%c0_11, %c0_12], %16 {strides = array<i32>} : memref<512x32xf32, #tpu.memory_space<vmem>>, vector<512x32xf32>,
    return
  }
  func.func @transform_0(%arg0: i32) -> (i32, i32) {
    %c0_i32 = arith.constant 0 : i32
    %c0_i32_0 = arith.constant 0 : i32
    return %arg0, %c0_i32 : i32, i32
  }
  func.func @transform_1(%arg0: i32) -> (i32, i32) {
    %c0_i32 = arith.constant 0 : i32
    %c0_i32_0 = arith.constant 0 : i32
    %c0_i32_1 = arith.constant 0 : i32
    return %c0_i32, %c0_i32_0 : i32, i32
  }
  func.func @transform_2(%arg0: i32) -> (i32, i32) {
    %c0_i32 = arith.constant 0 : i32
    %c0_i32_0 = arith.constant 0 : i32
    %c0_i32_1 = arith.constant 0 : i32
    return %c0_i32, %c0_i32_0 : i32, i32
  }
  func.func @transform_3(%arg0: i32) -> (i32, i32) {
    %c0_i32 = arith.constant 0 : i32
    %c0_i32_0 = arith.constant 0 : i32
    return %arg0, %c0_i32 : i32, i32
  }
  func.func @transform_4(%arg0: i32) -> (i32, i32) {
    %c0_i32 = arith.constant 0 : i32
    %c0_i32_0 = arith.constant 0 : i32
    %c0_i32_1 = arith.constant 0 : i32
    return %c0_i32, %c0_i32_0 : i32, i32
  }
  func.func @transform_5(%arg0: i32) -> (i32, i32) {
    %c0_i32 = arith.constant 0 : i32
    %c0_i32_0 = arith.constant 0 : i32
    %c0_i32_1 = arith.constant 0 : i32
    return %c0_i32, %c0_i32_0 : i32, i32
  }
  func.func @transform_6(%arg0: i32) -> (i32, i32) {
    %c0_i32 = arith.constant 0 : i32
    %c0_i32_0 = arith.constant 0 : i32
    return %arg0, %c0_i32 : i32, i32
  }
}

module attributes {stable_mosaic.version = 11 : i64} {
  func.func @_matmul_bnstat_kernel(%arg0: i32, %arg1: memref<512x288xbf16, #tpu.memory_space<vmem>>, %arg2: memref<288x32xbf16, #tpu.memory_space<vmem>>, %arg3: memref<512x32xf32, #tpu.memory_space<vmem>>, %arg4: memref<1x32xf32, #tpu.memory_space<vmem>>, %arg5: memref<1x32xf32, #tpu.memory_space<vmem>>, %arg6: memref<1x32xf32, #tpu.memory_space<vmem>>, %arg7: memref<1x32xf32, #tpu.memory_space<vmem>>) attributes {dimension_semantics = [#tpu.dimension_semantics<arbitrary>], iteration_bounds = array<i64: 1>, scalar_prefetch = 0 : i64, scratch_operands = 2 : i64, tpu.core_type = #tpu.core_type<tc>, window_params = [{transform_indices = @transform_0, window_bounds = array<i64: 512, 288>}, {pipeline_mode = #tpu.pipeline_mode<synchronous>, transform_indices = @transform_1, window_bounds = array<i64: 288, 32>}, {transform_indices = @transform_2, window_bounds = array<i64: 512, 32>}, {pipeline_mode = #tpu.pipeline_mode<synchronous>, transform_indices = @transform_3, window_bounds = array<i64: 1, 32>}, {pipeline_mode = #tpu.pipeline_mode<synchronous>, transform_indices = @transform_4, window_bounds = array<i64: 1, 32>}]} {
    %c0_i32 = arith.constant 0 : i32
    %0 = arith.cmpi eq, %arg0, %c0_i32 : i32
    %1 = arith.extui %0 : i1 to i32
    %c0_i32_0 = arith.constant 0 : i32
    %2 = arith.cmpi ne, %1, %c0_i32_0 : i32
    scf.if %2 {
      %cst_18 = arith.constant 0.000000e+00 : f32
      %21 = vector.broadcast %cst_18 : f32 to vector<1x32xf32>
      %c0_19 = arith.constant 0 : index
      %c0_20 = arith.constant 0 : index
      %22 = vector.load %arg6[%c0_19, %c0_20] : memref<1x32xf32, #tpu.memory_space<vmem>>, vector<1x32xf32>
      tpu.vector_store %arg6[%c0_19, %c0_20], %21 {strides = array<i32>} : memref<1x32xf32, #tpu.memory_space<vmem>>, vector<1x32xf32>,
      %cst_21 = arith.constant 0.000000e+00 : f32
      %23 = vector.broadcast %cst_21 : f32 to vector<1x32xf32>
      %c0_22 = arith.constant 0 : index
      %c0_23 = arith.constant 0 : index
      %24 = vector.load %arg7[%c0_22, %c0_23] : memref<1x32xf32, #tpu.memory_space<vmem>>, vector<1x32xf32>
      tpu.vector_store %arg7[%c0_22, %c0_23], %23 {strides = array<i32>} : memref<1x32xf32, #tpu.memory_space<vmem>>, vector<1x32xf32>,
    } else {
    }
    %c0 = arith.constant 0 : index
    %c0_1 = arith.constant 0 : index
    %3 = vector.load %arg1[%c0, %c0_1] : memref<512x288xbf16, #tpu.memory_space<vmem>>, vector<512x288xbf16>
    %c0_2 = arith.constant 0 : index
    %c0_3 = arith.constant 0 : index
    %4 = vector.load %arg2[%c0_2, %c0_3] : memref<288x32xbf16, #tpu.memory_space<vmem>>, vector<288x32xbf16>
    %cst = arith.constant dense<0.000000e+00> : vector<512x32xf32>
    %5 = tpu.matmul %3, %4, %cst {dimension_numbers = #tpu.dot_dimension_numbers<[1], [0], [0], [1], [0, 0, 1, 1], [], []>} : vector<512x288xbf16>, vector<288x32xbf16>, vector<512x32xf32> -> vector<512x32xf32>
    %c0_4 = arith.constant 0 : index
    %c0_5 = arith.constant 0 : index
    %6 = vector.load %arg3[%c0_4, %c0_5] : memref<512x32xf32, #tpu.memory_space<vmem>>, vector<512x32xf32>
    tpu.vector_store %arg3[%c0_4, %c0_5], %5 {strides = array<i32>} : memref<512x32xf32, #tpu.memory_space<vmem>>, vector<512x32xf32>,
    %c0_6 = arith.constant 0 : index
    %c0_7 = arith.constant 0 : index
    %7 = vector.load %arg6[%c0_6, %c0_7] : memref<1x32xf32, #tpu.memory_space<vmem>>, vector<1x32xf32>
    %cst_8 = arith.constant dense<0.000000e+00> : vector<32xf32>
    %8 = vector.multi_reduction <add>, %5, %cst_8 [0] : vector<512x32xf32> to vector<32xf32>
    %9 = vector.shape_cast %8 : vector<32xf32> to vector<1x32xf32>
    %10 = arith.addf %7, %9 : vector<1x32xf32>
    %c0_9 = arith.constant 0 : index
    %c0_10 = arith.constant 0 : index
    %11 = vector.load %arg6[%c0_9, %c0_10] : memref<1x32xf32, #tpu.memory_space<vmem>>, vector<1x32xf32>
    tpu.vector_store %arg6[%c0_9, %c0_10], %10 {strides = array<i32>} : memref<1x32xf32, #tpu.memory_space<vmem>>, vector<1x32xf32>,
    %c0_11 = arith.constant 0 : index
    %c0_12 = arith.constant 0 : index
    %12 = vector.load %arg7[%c0_11, %c0_12] : memref<1x32xf32, #tpu.memory_space<vmem>>, vector<1x32xf32>
    %13 = arith.mulf %5, %5 : vector<512x32xf32>
    %cst_13 = arith.constant dense<0.000000e+00> : vector<32xf32>
    %14 = vector.multi_reduction <add>, %13, %cst_13 [0] : vector<512x32xf32> to vector<32xf32>
    %15 = vector.shape_cast %14 : vector<32xf32> to vector<1x32xf32>
    %16 = arith.addf %12, %15 : vector<1x32xf32>
    %c0_14 = arith.constant 0 : index
    %c0_15 = arith.constant 0 : index
    %17 = vector.load %arg7[%c0_14, %c0_15] : memref<1x32xf32, #tpu.memory_space<vmem>>, vector<1x32xf32>
    tpu.vector_store %arg7[%c0_14, %c0_15], %16 {strides = array<i32>} : memref<1x32xf32, #tpu.memory_space<vmem>>, vector<1x32xf32>,
    %c0_i32_16 = arith.constant 0 : i32
    %18 = arith.cmpi eq, %arg0, %c0_i32_16 : i32
    %19 = arith.extui %18 : i1 to i32
    %c0_i32_17 = arith.constant 0 : i32
    %20 = arith.cmpi ne, %19, %c0_i32_17 : i32
    scf.if %20 {
      %c0_18 = arith.constant 0 : index
      %c0_19 = arith.constant 0 : index
      %21 = vector.load %arg6[%c0_18, %c0_19] : memref<1x32xf32, #tpu.memory_space<vmem>>, vector<1x32xf32>
      %c0_20 = arith.constant 0 : index
      %c0_21 = arith.constant 0 : index
      %22 = vector.load %arg4[%c0_20, %c0_21] : memref<1x32xf32, #tpu.memory_space<vmem>>, vector<1x32xf32>
      tpu.vector_store %arg4[%c0_20, %c0_21], %21 {strides = array<i32>} : memref<1x32xf32, #tpu.memory_space<vmem>>, vector<1x32xf32>,
      %c0_22 = arith.constant 0 : index
      %c0_23 = arith.constant 0 : index
      %23 = vector.load %arg7[%c0_22, %c0_23] : memref<1x32xf32, #tpu.memory_space<vmem>>, vector<1x32xf32>
      %c0_24 = arith.constant 0 : index
      %c0_25 = arith.constant 0 : index
      %24 = vector.load %arg5[%c0_24, %c0_25] : memref<1x32xf32, #tpu.memory_space<vmem>>, vector<1x32xf32>
      tpu.vector_store %arg5[%c0_24, %c0_25], %23 {strides = array<i32>} : memref<1x32xf32, #tpu.memory_space<vmem>>, vector<1x32xf32>,
    } else {
    }
    return
  }
  func.func @transform_0(%arg0: i32) -> (i32, i32) {
    %c0_i32 = arith.constant 0 : i32
    %c0_i32_0 = arith.constant 0 : i32
    return %arg0, %c0_i32 : i32, i32
  }
  func.func @transform_1(%arg0: i32) -> (i32, i32) {
    %c0_i32 = arith.constant 0 : i32
    %c0_i32_0 = arith.constant 0 : i32
    %c0_i32_1 = arith.constant 0 : i32
    return %c0_i32, %c0_i32_0 : i32, i32
  }
  func.func @transform_2(%arg0: i32) -> (i32, i32) {
    %c0_i32 = arith.constant 0 : i32
    %c0_i32_0 = arith.constant 0 : i32
    return %arg0, %c0_i32 : i32, i32
  }
  func.func @transform_3(%arg0: i32) -> (i32, i32) {
    %c0_i32 = arith.constant 0 : i32
    %c0_i32_0 = arith.constant 0 : i32
    %c0_i32_1 = arith.constant 0 : i32
    return %c0_i32, %c0_i32_0 : i32, i32
  }
  func.func @transform_4(%arg0: i32) -> (i32, i32) {
    %c0_i32 = arith.constant 0 : i32
    %c0_i32_0 = arith.constant 0 : i32
    %c0_i32_1 = arith.constant 0 : i32
    return %c0_i32, %c0_i32_0 : i32, i32
  }
}

module attributes {stable_mosaic.version = 11 : i64} {
  func.func @_bn_act_kernel(%arg0: i32, %arg1: memref<512x32xf32, #tpu.memory_space<vmem>>, %arg2: memref<1x32xf32, #tpu.memory_space<vmem>>, %arg3: memref<1x32xf32, #tpu.memory_space<vmem>>, %arg4: memref<512x32xf32, #tpu.memory_space<vmem>>) attributes {dimension_semantics = [#tpu.dimension_semantics<parallel>], iteration_bounds = array<i64: 1>, scalar_prefetch = 0 : i64, scratch_operands = 0 : i64, tpu.core_type = #tpu.core_type<tc>, window_params = [{transform_indices = @transform_0, window_bounds = array<i64: 512, 32>}, {pipeline_mode = #tpu.pipeline_mode<synchronous>, transform_indices = @transform_1, window_bounds = array<i64: 1, 32>}, {pipeline_mode = #tpu.pipeline_mode<synchronous>, transform_indices = @transform_2, window_bounds = array<i64: 1, 32>}, {transform_indices = @transform_3, window_bounds = array<i64: 512, 32>}]} {
    %c0 = arith.constant 0 : index
    %c0_0 = arith.constant 0 : index
    %0 = vector.load %arg1[%c0, %c0_0] : memref<512x32xf32, #tpu.memory_space<vmem>>, vector<512x32xf32>
    %c0_1 = arith.constant 0 : index
    %c0_2 = arith.constant 0 : index
    %1 = vector.load %arg2[%c0_1, %c0_2] : memref<1x32xf32, #tpu.memory_space<vmem>>, vector<1x32xf32>
    %2 = vector.broadcast %1 : vector<1x32xf32> to vector<512x32xf32>
    %3 = arith.mulf %0, %2 : vector<512x32xf32>
    %c0_3 = arith.constant 0 : index
    %c0_4 = arith.constant 0 : index
    %4 = vector.load %arg3[%c0_3, %c0_4] : memref<1x32xf32, #tpu.memory_space<vmem>>, vector<1x32xf32>
    %5 = vector.broadcast %4 : vector<1x32xf32> to vector<512x32xf32>
    %6 = arith.addf %3, %5 : vector<512x32xf32>
    %cst = arith.constant 0.000000e+00 : f32
    %7 = vector.broadcast %cst : f32 to vector<512x32xf32>
    %8 = arith.maximumf %6, %7 : vector<512x32xf32>
    %c0_5 = arith.constant 0 : index
    %c0_6 = arith.constant 0 : index
    %9 = vector.load %arg4[%c0_5, %c0_6] : memref<512x32xf32, #tpu.memory_space<vmem>>, vector<512x32xf32>
    tpu.vector_store %arg4[%c0_5, %c0_6], %8 {strides = array<i32>} : memref<512x32xf32, #tpu.memory_space<vmem>>, vector<512x32xf32>,
    return
  }
  func.func @transform_0(%arg0: i32) -> (i32, i32) {
    %c0_i32 = arith.constant 0 : i32
    %c0_i32_0 = arith.constant 0 : i32
    return %arg0, %c0_i32 : i32, i32
  }
  func.func @transform_1(%arg0: i32) -> (i32, i32) {
    %c0_i32 = arith.constant 0 : i32
    %c0_i32_0 = arith.constant 0 : i32
    %c0_i32_1 = arith.constant 0 : i32
    return %c0_i32, %c0_i32_0 : i32, i32
  }
  func.func @transform_2(%arg0: i32) -> (i32, i32) {
    %c0_i32 = arith.constant 0 : i32
    %c0_i32_0 = arith.constant 0 : i32
    %c0_i32_1 = arith.constant 0 : i32
    return %c0_i32, %c0_i32_0 : i32, i32
  }
  func.func @transform_3(%arg0: i32) -> (i32, i32) {
    %c0_i32 = arith.constant 0 : i32
    %c0_i32_0 = arith.constant 0 : i32
    return %arg0, %c0_i32 : i32, i32
  }
}

</mosaic_0001>

<bundles_post_ra>
// kernel: basic_block_forward.5
= control target key start
LH: loop header
LB: loop body
LE: loop exit
PB: predicated region body
PF: predicated region fallthrough
CT: control target
= control target key end

     0   :  { %vm284_vm0 = vcmask 261120   ;;  %s961_s0 = inlined_call_operand.vmem [shape: f32[512,32], index: 0, kind: input, shape index: {}]   ;;  %s962_s1 = inlined_call_operand.vmem [shape: f32[1,32], index: 1, kind: input, shape index: {}]   ;;  %s963_s2 = inlined_call_operand.vmem [shape: f32[1,32], index: 2, kind: input, shape index: {}]   ;;  %s964_s3 = inlined_call_operand.vmem [shape: f32[512,32], index: 3, kind: output, shape index: {}]  }
   0x1   :  { %v14_v0 = vld [vmem:[%s961_s0] sm:$0xff]  ;;  %v15_v4 = vld [vmem:[%s961_s0 + $0x8] sm:$0xff]  ;;  %v16_v5 = vld [vmem:[%s961_s0 + $0x10] sm:$0xff] }
   0x2   :  { %v381_v1 = vld [vmem:[%s962_s1] ss:$0 sm:$0xff]  ;;  %v17_v6 = vld [vmem:[%s961_s0 + $0x18] sm:$0xff]  ;;  %v19_v11 = vld [vmem:[%s961_s0 + $0x28] sm:$0xff] }
   0x3   :  { %v386_v2 = vld [vmem:[%s963_s2] ss:$0 sm:$0xff]  ;;  %v85_v3 = vmul.f32 %v381_v1, %v14_v0  ;;  %v86_v7 = vmul.f32 %v381_v1, %v15_v4  ;;  %v87_v8 = vmul.f32 %v381_v1, %v16_v5  ;;  %v88_v9 = vmul.f32 %v381_v1, %v17_v6  ;;  %v20_v12 = vld [vmem:[%s961_s0 + $0x30] sm:$0xff]  ;;  %v21_v17 = vld [vmem:[%s961_s0 + $0x38] sm:$0xff] }
   0x4   :  { %v18_v10 = vld [vmem:[%s961_s0 + $0x20] sm:$0xff]  ;;  %v90_v15 = vmul.f32 %v381_v1, %v19_v11  ;;  %v91_v16 = vmul.f32 %v381_v1, %v20_v12  ;;  %v92_v21 = vmul.f32 %v381_v1, %v21_v17  ;;  %v23_v27 = vld [vmem:[%s961_s0 + $0x48] sm:$0xff]  ;;  %v24_v28 = vld [vmem:[%s961_s0 + $0x50] sm:$0xff] }
   0x5   :  { %v156_v13 = vadd.f32 %v386_v2, %v85_v3  ;;  %v89_v14 = vmul.f32 %v381_v1, %v18_v10  ;;  %v157_v18 = vadd.f32 %v386_v2, %v86_v7  ;;  %v158_v19 = vadd.f32 %v386_v2, %v87_v8  ;;  %v22_v22 = vld [vmem:[%s961_s0 + $0x40] sm:$0xff]  ;;  %v25_v29 = vld [vmem:[%s961_s0 + $0x58] sm:$0xff]  ;;  %v27_v35 = vld [vmem:[%s961_s0 + $0x68] sm:$0xff] }
   0x6   :  { %v159_v20 = vadd.f32 %v386_v2, %v88_v9  ;;  %v161_v25 = vadd.f32 %v386_v2, %v90_v15  ;;  %v162_v26 = vadd.f32 %v386_v2, %v91_v16  ;;  %v163_v33 = vadd.f32 %v386_v2, %v92_v21  ;;  %v26_v34 = vld [vmem:[%s961_s0 + $0x60] sm:$0xff]  ;;  %v28_v36 = vld [vmem:[%s961_s0 + $0x70] sm:$0xff]  ;;  %v29_v41 = vld [vmem:[%s961_s0 + $0x78] sm:$0xff] }
   0x7   :  { %v220_v23 = vmax.f32 %v156_v13, 0.0  ;;  %v160_v24 = vadd.f32 %v386_v2, %v89_v14  ;;  %v221_v30 = vmax.f32 %v157_v18, 0.0  ;;  %v222_v31 = vmax.f32 %v158_v19, 0.0  ;;  %v30_v54 = vld [vmem:[%s961_s0 + $0x80] sm:$0xff]  ;;  %v31_v59 = vld [vmem:[%s961_s0 + $0x88] sm:$0xff]  ;;  %v32_v60 = vld [vmem:[%s961_s0 + $0x90] sm:$0xff] }
   0x8   :  { %v223_v32 = vmax.f32 %v159_v20, 0.0  ;;  %v225_v38 = vmax.f32 %v161_v25, 0.0  ;;  %v226_v39 = vmax.f32 %v162_v26, 0.0  ;;  %v93_v40 = vmul.f32 %v381_v1, %v22_v22  ;;  %v33_v61 = vld [vmem:[%s961_s0 + $0x98] sm:$0xff]  ;;  %v34_v4 = vld [vmem:[%s961_s0 + $0xa0] sm:$0xff]  ;;  %v35_v5 = vld [vmem:[%s961_s0 + $0xa8] sm:$0xff] }
   0x9   :  { %285 = vst.msk [vmem:[%s964_s3] sm:$0xff] %vm284_vm0, %v220_v23  ;;  %v224_v37 = vmax.f32 %v160_v24, 0.0  ;;  %286 = vst.msk [vmem:[%s964_s3 + $0x8] sm:$0xff] %vm284_vm0, %v221_v30  ;;  %v227_v42 = vmax.f32 %v163_v33, 0.0  ;;  %v94_v43 = vmul.f32 %v381_v1, %v23_v27  ;;  %v95_v44 = vmul.f32 %v381_v1, %v24_v28  ;;  %v36_v6 = vld [vmem:[%s961_s0 + $0xb0] sm:$0xff]  ;;  %v37_v11 = vld [vmem:[%s961_s0 + $0xb8] sm:$0xff] }
   0xa   :  { %287 = vst.msk [vmem:[%s964_s3 + $0x10] sm:$0xff] %vm284_vm0, %v222_v31  ;;  %288 = vst.msk [vmem:[%s964_s3 + $0x18] sm:$0xff] %vm284_vm0, %v223_v32  ;;  %v96_v45 = vmul.f32 %v381_v1, %v25_v29  ;;  %v164_v46 = vadd.f32 %v386_v2, %v93_v40  ;;  %v97_v47 = vmul.f32 %v381_v1, %v26_v34  ;;  %v38_v24 = vld [vmem:[%s961_s0 + $0xc0] sm:$0xff]  ;;  %v39_v29 = vld [vmem:[%s961_s0 + $0xc8] sm:$0xff] }
   0xb   :  { %289 = vst.msk [vmem:[%s964_s3 + $0x20] sm:$0xff] %vm284_vm0, %v224_v37  ;;  %290 = vst.msk [vmem:[%s964_s3 + $0x28] sm:$0xff] %vm284_vm0, %v225_v38  ;;  %v98_v48 = vmul.f32 %v381_v1, %v27_v35  ;;  %v99_v49 = vmul.f32 %v381_v1, %v28_v36  ;;  %v165_v50 = vadd.f32 %v386_v2, %v94_v43  ;;  %v40_v30 = vld [vmem:[%s961_s0 + $0xd0] sm:$0xff]  ;;  %v41_v31 = vld [vmem:[%s961_s0 + $0xd8] sm:$0xff] }
   0xc   :  { %291 = vst.msk [vmem:[%s964_s3 + $0x30] sm:$0xff] %vm284_vm0, %v226_v39  ;;  %292 = vst.msk [vmem:[%s964_s3 + $0x38] sm:$0xff] %vm284_vm0, %v227_v42  ;;  %v166_v51 = vadd.f32 %v386_v2, %v95_v44  ;;  %v167_v52 = vadd.f32 %v386_v2, %v96_v45  ;;  %v100_v53 = vmul.f32 %v381_v1, %v29_v41  ;;  %v228_v55 = vmax.f32 %v164_v46, 0.0  ;;  %v42_v36 = vld [vmem:[%s961_s0 + $0xe0] sm:$0xff]  ;;  %v43_v37 = vld [vmem:[%s961_s0 + $0xe8] sm:$0xff] }
   0xd   :  { %v168_v56 = vadd.f32 %v386_v2, %v97_v47  ;;  %v169_v57 = vadd.f32 %v386_v2, %v98_v48  ;;  %v170_v58 = vadd.f32 %v386_v2, %v99_v49  ;;  %v229_v62 = vmax.f32 %v165_v50, 0.0  ;;  %v44_v38 = vld [vmem:[%s961_s0 + $0xf0] sm:$0xff]  ;;  %v45_v43 = vld [vmem:[%s961_s0 + $0xf8] sm:$0xff] }
   0xe   :  { %v230_v63 = vmax.f32 %v166_v51, 0.0  ;;  %v231_v0 = vmax.f32 %v167_v52, 0.0  ;;  %v171_v3 = vadd.f32 %v386_v2, %v100_v53  ;;  %293 = vst.msk [vmem:[%s964_s3 + $0x40] sm:$0xff] %vm284_vm0, %v228_v55  ;;  %v101_v10 = vmul.f32 %v381_v1, %v30_v54 }
   0xf   :  { %v232_v7 = vmax.f32 %v168_v56, 0.0  ;;  %v233_v8 = vmax.f32 %v169_v57, 0.0  ;;  %v234_v9 = vmax.f32 %v170_v58, 0.0  ;;  %294 = vst.msk [vmem:[%s964_s3 + $0x48] sm:$0xff] %vm284_vm0, %v229_v62  ;;  %v102_v13 = vmul.f32 %v381_v1, %v31_v59  ;;  %v46_v56 = vld [vmem:[%s961_s0 + $0x100] sm:$0xff]  ;;  %v48_v62 = vld [vmem:[%s961_s0 + $0x110] sm:$0xff] }
  0x10   :  { %295 = vst.msk [vmem:[%s964_s3 + $0x50] sm:$0xff] %vm284_vm0, %v230_v63  ;;  %296 = vst.msk [vmem:[%s964_s3 + $0x58] sm:$0xff] %vm284_vm0, %v231_v0  ;;  %v235_v12 = vmax.f32 %v171_v3, 0.0  ;;  %v103_v14 = vmul.f32 %v381_v1, %v32_v60  ;;  %v104_v15 = vmul.f32 %v381_v1, %v33_v61  ;;  %v172_v16 = vadd.f32 %v386_v2, %v101_v10  ;;  %v47_v61 = vld [vmem:[%s961_s0 + $0x108] sm:$0xff]  ;;  %v49_v63 = vld [vmem:[%s961_s0 + $0x118] sm:$0xff] }
  0x11   :  { %297 = vst.msk [vmem:[%s964_s3 + $0x60] sm:$0xff] %vm284_vm0, %v232_v7  ;;  %298 = vst.msk [vmem:[%s964_s3 + $0x68] sm:$0xff] %vm284_vm0, %v233_v8  ;;  %v105_v17 = vmul.f32 %v381_v1, %v34_v4  ;;  %v106_v18 = vmul.f32 %v381_v1, %v35_v5  ;;  %v107_v19 = vmul.f32 %v381_v1, %v36_v6  ;;  %v50_v6 = vld [vmem:[%s961_s0 + $0x120] sm:$0xff]  ;;  %v51_v7 = vld [vmem:[%s961_s0 + $0x128] sm:$0xff] }
  0x12   :  { %299 = vst.msk [vmem:[%s964_s3 + $0x70] sm:$0xff] %vm284_vm0, %v234_v9  ;;  %300 = vst.msk [vmem:[%s964_s3 + $0x78] sm:$0xff] %vm284_vm0, %v235_v12  ;;  %v173_v20 = vadd.f32 %v386_v2, %v102_v13  ;;  %v174_v21 = vadd.f32 %v386_v2, %v103_v14  ;;  %v175_v22 = vadd.f32 %v386_v2, %v104_v15  ;;  %v236_v25 = vmax.f32 %v172_v16, 0.0  ;;  %v52_v8 = vld [vmem:[%s961_s0 + $0x130] sm:$0xff]  ;;  %v53_v13 = vld [vmem:[%s961_s0 + $0x138] sm:$0xff] }
  0x13   :  { %v108_v23 = vmul.f32 %v381_v1, %v37_v11  ;;  %v176_v26 = vadd.f32 %v386_v2, %v105_v17  ;;  %v177_v27 = vadd.f32 %v386_v2, %v106_v18  ;;  %v178_v28 = vadd.f32 %v386_v2, %v107_v19 }
  0x14   :  { %v237_v32 = vmax.f32 %v173_v20, 0.0  ;;  %v238_v33 = vmax.f32 %v174_v21, 0.0  ;;  %v239_v34 = vmax.f32 %v175_v22, 0.0  ;;  %301 = vst.msk [vmem:[%s964_s3 + $0x80] sm:$0xff] %vm284_vm0, %v236_v25  ;;  %v109_v42 = vmul.f32 %v381_v1, %v38_v24 }
  0x15   :  { %v179_v35 = vadd.f32 %v386_v2, %v108_v23  ;;  %v240_v39 = vmax.f32 %v176_v26, 0.0  ;;  %v241_v40 = vmax.f32 %v177_v27, 0.0  ;;  %v242_v41 = vmax.f32 %v178_v28, 0.0  ;;  %v54_v26 = vld [vmem:[%s961_s0 + $0x140] sm:$0xff] }
  0x16   :  { %302 = vst.msk [vmem:[%s964_s3 + $0x88] sm:$0xff] %vm284_vm0, %v237_v32  ;;  %303 = vst.msk [vmem:[%s964_s3 + $0x90] sm:$0xff] %vm284_vm0, %v238_v33  ;;  %v110_v45 = vmul.f32 %v381_v1, %v39_v29  ;;  %v111_v46 = vmul.f32 %v381_v1, %v40_v30  ;;  %v112_v47 = vmul.f32 %v381_v1, %v41_v31  ;;  %v55_v31 = vld [vmem:[%s961_s0 + $0x148] sm:$0xff]  ;;  %v56_v32 = vld [vmem:[%s961_s0 + $0x150] sm:$0xff] }
  0x17   :  { %304 = vst.msk [vmem:[%s964_s3 + $0x98] sm:$0xff] %vm284_vm0, %v239_v34  ;;  %v243_v44 = vmax.f32 %v179_v35, 0.0  ;;  %305 = vst.msk [vmem:[%s964_s3 + $0xa0] sm:$0xff] %vm284_vm0, %v240_v39  ;;  %v180_v48 = vadd.f32 %v386_v2, %v109_v42  ;;  %v113_v49 = vmul.f32 %v381_v1, %v42_v36  ;;  %v114_v50 = vmul.f32 %v381_v1, %v43_v37  ;;  %v57_v33 = vld [vmem:[%s961_s0 + $0x158] sm:$0xff]  ;;  %v59_v39 = vld [vmem:[%s961_s0 + $0x168] sm:$0xff] }
  0x18   :  { %306 = vst.msk [vmem:[%s964_s3 + $0xa8] sm:$0xff] %vm284_vm0, %v241_v40  ;;  %307 = vst.msk [vmem:[%s964_s3 + $0xb0] sm:$0xff] %vm284_vm0, %v242_v41  ;;  %v115_v51 = vmul.f32 %v381_v1, %v44_v38  ;;  %v181_v52 = vadd.f32 %v386_v2, %v110_v45  ;;  %v182_v53 = vadd.f32 %v386_v2, %v111_v46  ;;  %v58_v38 = vld [vmem:[%s961_s0 + $0x160] sm:$0xff]  ;;  %v60_v40 = vld [vmem:[%s961_s0 + $0x170] sm:$0xff] }
  0x19   :  { %308 = vst.msk [vmem:[%s964_s3 + $0xb8] sm:$0xff] %vm284_vm0, %v243_v44  ;;  %v183_v54 = vadd.f32 %v386_v2, %v112_v47  ;;  %v116_v55 = vmul.f32 %v381_v1, %v45_v43  ;;  %v244_v57 = vmax.f32 %v180_v48, 0.0  ;;  %v184_v58 = vadd.f32 %v386_v2, %v113_v49  ;;  %v61_v45 = vld [vmem:[%s961_s0 + $0x178] sm:$0xff] }
  0x1a   :  { %v185_v59 = vadd.f32 %v386_v2, %v114_v50  ;;  %v186_v60 = vadd.f32 %v386_v2, %v115_v51  ;;  %v245_v0 = vmax.f32 %v181_v52, 0.0  ;;  %v246_v3 = vmax.f32 %v182_v53, 0.0 }
  0x1b   :  { %v247_v4 = vmax.f32 %v183_v54, 0.0  ;;  %v187_v5 = vadd.f32 %v386_v2, %v116_v55  ;;  %309 = vst.msk [vmem:[%s964_s3 + $0xc0] sm:$0xff] %vm284_vm0, %v244_v57  ;;  %v248_v9 = vmax.f32 %v184_v58, 0.0  ;;  %v117_v12 = vmul.f32 %v381_v1, %v46_v56  ;;  %v62_v58 = vld [vmem:[%s961_s0 + $0x180] sm:$0xff] }
  0x1c   :  { %v249_v10 = vmax.f32 %v185_v59, 0.0  ;;  %v250_v11 = vmax.f32 %v186_v60, 0.0  ;;  %310 = vst.msk [vmem:[%s964_s3 + $0xc8] sm:$0xff] %vm284_vm0, %v245_v0  ;;  %311 = vst.msk [vmem:[%s964_s3 + $0xd0] sm:$0xff] %vm284_vm0, %v246_v3  ;;  %v118_v15 = vmul.f32 %v381_v1, %v47_v61  ;;  %v119_v16 = vmul.f32 %v381_v1, %v48_v62  ;;  %v64_v0 = vld [vmem:[%s961_s0 + $0x190] sm:$0xff]  ;;  %v65_v3 = vld [vmem:[%s961_s0 + $0x198] sm:$0xff] }
  0x1d   :  { %312 = vst.msk [vmem:[%s964_s3 + $0xd8] sm:$0xff] %vm284_vm0, %v247_v4  ;;  %v251_v14 = vmax.f32 %v187_v5, 0.0  ;;  %v120_v17 = vmul.f32 %v381_v1, %v49_v63  ;;  %313 = vst.msk [vmem:[%s964_s3 + $0xe0] sm:$0xff] %vm284_vm0, %v248_v9  ;;  %v188_v18 = vadd.f32 %v386_v2, %v117_v12  ;;  %v121_v19 = vmul.f32 %v381_v1, %v50_v6  ;;  %v63_v63 = vld [vmem:[%s961_s0 + $0x188] sm:$0xff] }
  0x1e   :  { %314 = vst.msk [vmem:[%s964_s3 + $0xe8] sm:$0xff] %vm284_vm0, %v249_v10  ;;  %315 = vst.msk [vmem:[%s964_s3 + $0xf0] sm:$0xff] %vm284_vm0, %v250_v11  ;;  %v122_v20 = vmul.f32 %v381_v1, %v51_v7  ;;  %v123_v21 = vmul.f32 %v381_v1, %v52_v8  ;;  %v189_v22 = vadd.f32 %v386_v2, %v118_v15  ;;  %v66_v8 = vld [vmem:[%s961_s0 + $0x1a0] sm:$0xff]  ;;  %v67_v9 = vld [vmem:[%s961_s0 + $0x1a8] sm:$0xff] }
  0x1f   :  { %316 = vst.msk [vmem:[%s964_s3 + $0xf8] sm:$0xff] %vm284_vm0, %v251_v14  ;;  %v190_v23 = vadd.f32 %v386_v2, %v119_v16  ;;  %v191_v24 = vadd.f32 %v386_v2, %v120_v17  ;;  %v124_v25 = vmul.f32 %v381_v1, %v53_v13  ;;  %v252_v27 = vmax.f32 %v188_v18, 0.0  ;;  %v68_v10 = vld [vmem:[%s961_s0 + $0x1b0] sm:$0xff]  ;;  %v69_v15 = vld [vmem:[%s961_s0 + $0x1b8] sm:$0xff] }
  0x20   :  { %v192_v28 = vadd.f32 %v386_v2, %v121_v19  ;;  %v193_v29 = vadd.f32 %v386_v2, %v122_v20  ;;  %v194_v30 = vadd.f32 %v386_v2, %v123_v21  ;;  %v253_v34 = vmax.f32 %v189_v22, 0.0 }
  0x21   :  { %v254_v35 = vmax.f32 %v190_v23, 0.0  ;;  %v255_v36 = vmax.f32 %v191_v24, 0.0  ;;  %v195_v37 = vadd.f32 %v386_v2, %v124_v25  ;;  %317 = vst.msk [vmem:[%s964_s3 + $0x100] sm:$0xff] %vm284_vm0, %v252_v27  ;;  %v125_v44 = vmul.f32 %v381_v1, %v54_v26 }
  0x22   :  { %v256_v41 = vmax.f32 %v192_v28, 0.0  ;;  %v257_v42 = vmax.f32 %v193_v29, 0.0  ;;  %v258_v43 = vmax.f32 %v194_v30, 0.0  ;;  %318 = vst.msk [vmem:[%s964_s3 + $0x108] sm:$0xff] %vm284_vm0, %v253_v34  ;;  %v126_v47 = vmul.f32 %v381_v1, %v55_v31  ;;  %v70_v28 = vld [vmem:[%s961_s0 + $0x1c0] sm:$0xff]  ;;  %v72_v34 = vld [vmem:[%s961_s0 + $0x1d0] sm:$0xff] }
  0x23   :  { %319 = vst.msk [vmem:[%s964_s3 + $0x110] sm:$0xff] %vm284_vm0, %v254_v35  ;;  %320 = vst.msk [vmem:[%s964_s3 + $0x118] sm:$0xff] %vm284_vm0, %v255_v36  ;;  %v259_v46 = vmax.f32 %v195_v37, 0.0  ;;  %v127_v48 = vmul.f32 %v381_v1, %v56_v32  ;;  %v128_v49 = vmul.f32 %v381_v1, %v57_v33  ;;  %v196_v50 = vadd.f32 %v386_v2, %v125_v44  ;;  %v71_v33 = vld [vmem:[%s961_s0 + $0x1c8] sm:$0xff]  ;;  %v73_v35 = vld [vmem:[%s961_s0 + $0x1d8] sm:$0xff] }
  0x24   :  { %321 = vst.msk [vmem:[%s964_s3 + $0x120] sm:$0xff] %vm284_vm0, %v256_v41  ;;  %322 = vst.msk [vmem:[%s964_s3 + $0x128] sm:$0xff] %vm284_vm0, %v257_v42  ;;  %v129_v51 = vmul.f32 %v381_v1, %v58_v38  ;;  %v130_v52 = vmul.f32 %v381_v1, %v59_v39  ;;  %v131_v53 = vmul.f32 %v381_v1, %v60_v40  ;;  %v74_v40 = vld [vmem:[%s961_s0 + $0x1e0] sm:$0xff]  ;;  %v75_v41 = vld [vmem:[%s961_s0 + $0x1e8] sm:$0xff] }
  0x25   :  { %323 = vst.msk [vmem:[%s964_s3 + $0x130] sm:$0xff] %vm284_vm0, %v258_v43  ;;  %324 = vst.msk [vmem:[%s964_s3 + $0x138] sm:$0xff] %vm284_vm0, %v259_v46  ;;  %v197_v54 = vadd.f32 %v386_v2, %v126_v47  ;;  %v198_v55 = vadd.f32 %v386_v2, %v127_v48  ;;  %v199_v56 = vadd.f32 %v386_v2, %v128_v49  ;;  %v260_v59 = vmax.f32 %v196_v50, 0.0  ;;  %v76_v42 = vld [vmem:[%s961_s0 + $0x1f0] sm:$0xff]  ;;  %v77_v47 = vld [vmem:[%s961_s0 + $0x1f8] sm:$0xff] }
  0x26   :  { %v132_v57 = vmul.f32 %v381_v1, %v61_v45  ;;  %v200_v60 = vadd.f32 %v386_v2, %v129_v51  ;;  %v201_v61 = vadd.f32 %v386_v2, %v130_v52  ;;  %v202_v62 = vadd.f32 %v386_v2, %v131_v53 }
  0x27   :  { %v261_v4 = vmax.f32 %v197_v54, 0.0  ;;  %v262_v5 = vmax.f32 %v198_v55, 0.0  ;;  %v263_v6 = vmax.f32 %v199_v56, 0.0  ;;  %325 = vst.msk [vmem:[%s964_s3 + $0x140] sm:$0xff] %vm284_vm0, %v260_v59  ;;  %v133_v14 = vmul.f32 %v381_v1, %v62_v58 }
  0x28   :  { %v203_v7 = vadd.f32 %v386_v2, %v132_v57  ;;  %v264_v11 = vmax.f32 %v200_v60, 0.0  ;;  %v265_v12 = vmax.f32 %v201_v61, 0.0  ;;  %v266_v13 = vmax.f32 %v202_v62, 0.0 }
  0x29   :  { %326 = vst.msk [vmem:[%s964_s3 + $0x148] sm:$0xff] %vm284_vm0, %v261_v4  ;;  %327 = vst.msk [vmem:[%s964_s3 + $0x150] sm:$0xff] %vm284_vm0, %v262_v5  ;;  %v134_v17 = vmul.f32 %v381_v1, %v63_v63  ;;  %v135_v18 = vmul.f32 %v381_v1, %v64_v0  ;;  %v136_v19 = vmul.f32 %v381_v1, %v65_v3 }
  0x2a   :  { %328 = vst.msk [vmem:[%s964_s3 + $0x158] sm:$0xff] %vm284_vm0, %v263_v6  ;;  %v267_v16 = vmax.f32 %v203_v7, 0.0  ;;  %329 = vst.msk [vmem:[%s964_s3 + $0x160] sm:$0xff] %vm284_vm0, %v264_v11  ;;  %v204_v20 = vadd.f32 %v386_v2, %v133_v14  ;;  %v137_v21 = vmul.f32 %v381_v1, %v66_v8  ;;  %v138_v22 = vmul.f32 %v381_v1, %v67_v9 }
  0x2b   :  { %330 = vst.msk [vmem:[%s964_s3 + $0x168] sm:$0xff] %vm284_vm0, %v265_v12  ;;  %331 = vst.msk [vmem:[%s964_s3 + $0x170] sm:$0xff] %vm284_vm0, %v266_v13  ;;  %v139_v23 = vmul.f32 %v381_v1, %v68_v10  ;;  %v205_v24 = vadd.f32 %v386_v2, %v134_v17  ;;  %v206_v25 = vadd.f32 %v386_v2, %v135_v18 }
  0x2c   :  { %332 = vst.msk [vmem:[%s964_s3 + $0x178] sm:$0xff] %vm284_vm0, %v267_v16  ;;  %v207_v26 = vadd.f32 %v386_v2, %v136_v19  ;;  %v140_v27 = vmul.f32 %v381_v1, %v69_v15  ;;  %v268_v29 = vmax.f32 %v204_v20, 0.0  ;;  %v208_v30 = vadd.f32 %v386_v2, %v137_v21 }
  0x2d   :  { %v209_v31 = vadd.f32 %v386_v2, %v138_v22  ;;  %v210_v32 = vadd.f32 %v386_v2, %v139_v23  ;;  %v269_v36 = vmax.f32 %v205_v24, 0.0  ;;  %v270_v37 = vmax.f32 %v206_v25, 0.0 }
  0x2e   :  { %v271_v38 = vmax.f32 %v207_v26, 0.0  ;;  %v211_v39 = vadd.f32 %v386_v2, %v140_v27  ;;  %333 = vst.msk [vmem:[%s964_s3 + $0x180] sm:$0xff] %vm284_vm0, %v268_v29  ;;  %v272_v43 = vmax.f32 %v208_v30, 0.0  ;;  %v141_v46 = vmul.f32 %v381_v1, %v70_v28 }
  0x2f   :  { %v273_v44 = vmax.f32 %v209_v31, 0.0  ;;  %v274_v45 = vmax.f32 %v210_v32, 0.0  ;;  %334 = vst.msk [vmem:[%s964_s3 + $0x188] sm:$0xff] %vm284_vm0, %v269_v36  ;;  %335 = vst.msk [vmem:[%s964_s3 + $0x190] sm:$0xff] %vm284_vm0, %v270_v37  ;;  %v142_v49 = vmul.f32 %v381_v1, %v71_v33  ;;  %v143_v50 = vmul.f32 %v381_v1, %v72_v34 }
  0x30   :  { %336 = vst.msk [vmem:[%s964_s3 + $0x198] sm:$0xff] %vm284_vm0, %v271_v38  ;;  %v275_v48 = vmax.f32 %v211_v39, 0.0  ;;  %v144_v51 = vmul.f32 %v381_v1, %v73_v35  ;;  %337 = vst.msk [vmem:[%s964_s3 + $0x1a0] sm:$0xff] %vm284_vm0, %v272_v43  ;;  %v212_v52 = vadd.f32 %v386_v2, %v141_v46  ;;  %v145_v53 = vmul.f32 %v381_v1, %v74_v40 }
  0x31   :  { %338 = vst.msk [vmem:[%s964_s3 + $0x1a8] sm:$0xff] %vm284_vm0, %v273_v44  ;;  %339 = vst.msk [vmem:[%s964_s3 + $0x1b0] sm:$0xff] %vm284_vm0, %v274_v45  ;;  %v146_v54 = vmul.f32 %v381_v1, %v75_v41  ;;  %v147_v55 = vmul.f32 %v381_v1, %v76_v42  ;;  %v213_v56 = vadd.f32 %v386_v2, %v142_v49 }
  0x32   :  { %340 = vst.msk [vmem:[%s964_s3 + $0x1b8] sm:$0xff] %vm284_vm0, %v275_v48  ;;  %v214_v57 = vadd.f32 %v386_v2, %v143_v50  ;;  %v215_v58 = vadd.f32 %v386_v2, %v144_v51  ;;  %v148_v59 = vmul.f32 %v381_v1, %v77_v47  ;;  %v276_v60 = vmax.f32 %v212_v52, 0.0 }
  0x33   :  { %v216_v61 = vadd.f32 %v386_v2, %v145_v53  ;;  %v217_v62 = vadd.f32 %v386_v2, %v146_v54  ;;  %v218_v63 = vadd.f32 %v386_v2, %v147_v55  ;;  %v277_v0 = vmax.f32 %v213_v56, 0.0 }
  0x34   :  { %v278_v3 = vmax.f32 %v214_v57, 0.0  ;;  %v279_v4 = vmax.f32 %v215_v58, 0.0  ;;  %v219_v5 = vadd.f32 %v386_v2, %v148_v59  ;;  %341 = vst.msk [vmem:[%s964_s3 + $0x1c0] sm:$0xff] %vm284_vm0, %v276_v60 }
  0x35   :  { %v280_v6 = vmax.f32 %v216_v61, 0.0  ;;  %v281_v7 = vmax.f32 %v217_v62, 0.0  ;;  %v282_v1 = vmax.f32 %v218_v63, 0.0  ;;  %342 = vst.msk [vmem:[%s964_s3 + $0x1c8] sm:$0xff] %vm284_vm0, %v277_v0 }
  0x36   :  { %343 = vst.msk [vmem:[%s964_s3 + $0x1d0] sm:$0xff] %vm284_vm0, %v278_v3  ;;  %344 = vst.msk [vmem:[%s964_s3 + $0x1d8] sm:$0xff] %vm284_vm0, %v279_v4  ;;  %v283_v2 = vmax.f32 %v219_v5, 0.0 }
  0x37   :  { %345 = vst.msk [vmem:[%s964_s3 + $0x1e0] sm:$0xff] %vm284_vm0, %v280_v6  ;;  %346 = vst.msk [vmem:[%s964_s3 + $0x1e8] sm:$0xff] %vm284_vm0, %v281_v7 }
  0x38   :  { %347 = vst.msk [vmem:[%s964_s3 + $0x1f0] sm:$0xff] %vm284_vm0, %v282_v1  ;;  %348 = vst.msk [vmem:[%s964_s3 + $0x1f8] sm:$0xff] %vm284_vm0, %v283_v2 }

// kernel: basic_block_forward.7
= control target key start
LH: loop header
LB: loop body
LE: loop exit
PB: predicated region body
PF: predicated region fallthrough
CT: control target
= control target key end

     0   :  { %vm564_vm0 = vcmask 261120   ;;  %s1427_s0 = inlined_call_operand.vmem [shape: f32[512,32], index: 0, kind: input, shape index: {}]   ;;  %s1428_s1 = inlined_call_operand.vmem [shape: f32[1,32], index: 1, kind: input, shape index: {}]   ;;  %s1429_s2 = inlined_call_operand.vmem [shape: f32[1,32], index: 2, kind: input, shape index: {}]   ;;  %s1430_s3 = inlined_call_operand.vmem [shape: f32[512,32], index: 3, kind: input, shape index: {}]   ;;  %s1431_s4 = inlined_call_operand.vmem [shape: f32[1,32], index: 4, kind: input, shape index: {}]   ;;  %s1432_s5 = inlined_call_operand.vmem [shape: f32[1,32], index: 5, kind: input, shape index: {}]   ;;  %s1433_s6 = inlined_call_operand.hbm [shape: f32[512,32], index: 6, kind: output, shape index: {}]  }
   0x1   :  { %v24_v0 = vld [vmem:[%s1427_s0] sm:$0xff]  ;;  %v25_v8 = vld [vmem:[%s1427_s0 + $0x8] sm:$0xff]  ;;  %v26_v10 = vld [vmem:[%s1427_s0 + $0x10] sm:$0xff] }
   0x2   :  { %v722_v1 = vld [vmem:[%s1428_s1] ss:$0 sm:$0xff]  ;;  %v231_v9 = vld [vmem:[%s1430_s3 + $0x8] sm:$0xff]  ;;  %v232_v15 = vld [vmem:[%s1430_s3 + $0x10] sm:$0xff] }
   0x3   :  { %v727_v2 = vld [vmem:[%s1429_s2] ss:$0 sm:$0xff]  ;;  %v95_v3 = vmul.f32 %v722_v1, %v24_v0  ;;  %v96_v12 = vmul.f32 %v722_v1, %v25_v8  ;;  %v97_v14 = vmul.f32 %v722_v1, %v26_v10  ;;  %v27_v16 = vld [vmem:[%s1427_s0 + $0x18] sm:$0xff]  ;;  %v29_v23 = vld [vmem:[%s1427_s0 + $0x28] sm:$0xff] }
   0x4   :  { %v230_v4 = vld [vmem:[%s1430_s3] sm:$0xff]  ;;  %v233_v17 = vld [vmem:[%s1430_s3 + $0x18] sm:$0xff]  ;;  %v98_v19 = vmul.f32 %v722_v1, %v27_v16  ;;  %v235_v28 = vld [vmem:[%s1430_s3 + $0x28] sm:$0xff]  ;;  %v100_v33 = vmul.f32 %v722_v1, %v29_v23 }
   0x5   :  { %v736_v5 = vld [vmem:[%s1431_s4] ss:$0 sm:$0xff]  ;;  %v166_v11 = vadd.f32 %v727_v2, %v95_v3  ;;  %v167_v25 = vadd.f32 %v727_v2, %v96_v12  ;;  %v168_v26 = vadd.f32 %v727_v2, %v97_v14  ;;  %v30_v29 = vld [vmem:[%s1427_s0 + $0x30] sm:$0xff]  ;;  %v31_v39 = vld [vmem:[%s1427_s0 + $0x38] sm:$0xff] }
   0x6   :  { %v301_v6 = vmul.f32 %v736_v5, %v230_v4  ;;  %v742_v7 = vld [vmem:[%s1432_s5] ss:$0 sm:$0xff]  ;;  %v302_v13 = vmul.f32 %v736_v5, %v231_v9  ;;  %v303_v18 = vmul.f32 %v736_v5, %v232_v15  ;;  %v304_v20 = vmul.f32 %v736_v5, %v233_v17  ;;  %v236_v30 = vld [vmem:[%s1430_s3 + $0x30] sm:$0xff]  ;;  %v237_v44 = vld [vmem:[%s1430_s3 + $0x38] sm:$0xff] }
   0x7   :  { %v28_v21 = vld [vmem:[%s1427_s0 + $0x20] sm:$0xff]  ;;  %v169_v31 = vadd.f32 %v727_v2, %v98_v19  ;;  %v306_v34 = vmul.f32 %v736_v5, %v235_v28  ;;  %v171_v41 = vadd.f32 %v727_v2, %v100_v33  ;;  %v101_v42 = vmul.f32 %v722_v1, %v30_v29  ;;  %v33_v55 = vld [vmem:[%s1427_s0 + $0x48] sm:$0xff]  ;;  %v34_v3 = vld [vmem:[%s1427_s0 + $0x50] sm:$0xff] }
   0x8   :  { %v234_v22 = vld [vmem:[%s1430_s3 + $0x20] sm:$0xff]  ;;  %v365_v24 = vadd.f32 %v301_v6, %v166_v11  ;;  %v99_v27 = vmul.f32 %v722_v1, %v28_v21  ;;  %v366_v36 = vadd.f32 %v302_v13, %v167_v25  ;;  %v367_v37 = vadd.f32 %v303_v18, %v168_v26  ;;  %v239_v60 = vld [vmem:[%s1430_s3 + $0x48] sm:$0xff]  ;;  %v240_v4 = vld [vmem:[%s1430_s3 + $0x50] sm:$0xff] }
   0x9   :  { %v305_v32 = vmul.f32 %v736_v5, %v234_v22  ;;  %v368_v40 = vadd.f32 %v304_v20, %v169_v31  ;;  %v307_v43 = vmul.f32 %v736_v5, %v236_v30  ;;  %v370_v50 = vadd.f32 %v306_v34, %v171_v41  ;;  %v32_v53 = vld [vmem:[%s1427_s0 + $0x40] sm:$0xff]  ;;  %v35_v11 = vld [vmem:[%s1427_s0 + $0x58] sm:$0xff]  ;;  %v37_v23 = vld [vmem:[%s1427_s0 + $0x68] sm:$0xff] }
   0xa   :  { %v436_v35 = vadd.f32 %v742_v7, %v365_v24  ;;  %v170_v38 = vadd.f32 %v727_v2, %v99_v27  ;;  %v437_v46 = vadd.f32 %v742_v7, %v366_v36  ;;  %v438_v47 = vadd.f32 %v742_v7, %v367_v37  ;;  %v238_v54 = vld [vmem:[%s1430_s3 + $0x40] sm:$0xff]  ;;  %v241_v12 = vld [vmem:[%s1430_s3 + $0x58] sm:$0xff]  ;;  %v38_v33 = vld [vmem:[%s1427_s0 + $0x70] sm:$0xff] }
   0xb   :  { %v439_v49 = vadd.f32 %v742_v7, %v368_v40  ;;  %v172_v51 = vadd.f32 %v727_v2, %v101_v42  ;;  %v102_v52 = vmul.f32 %v722_v1, %v31_v39  ;;  %v308_v59 = vmul.f32 %v736_v5, %v237_v44  ;;  %v36_v17 = vld [vmem:[%s1427_s0 + $0x60] sm:$0xff]  ;;  %v244_v42 = vld [vmem:[%s1430_s3 + $0x70] sm:$0xff] }
   0xc   :  { %v500_v45 = vmax.f32 %v436_v35, 0.0  ;;  %v369_v48 = vadd.f32 %v305_v32, %v170_v38  ;;  %v501_v56 = vmax.f32 %v437_v46, 0.0  ;;  %v502_v57 = vmax.f32 %v438_v47, 0.0  ;;  %v242_v22 = vld [vmem:[%s1430_s3 + $0x60] sm:$0xff]  ;;  %v243_v32 = vld [vmem:[%s1430_s3 + $0x68] sm:$0xff]  ;;  %v39_v47 = vld [vmem:[%s1427_s0 + $0x78] sm:$0xff] }
   0xd   :  { %v503_v61 = vmax.f32 %v439_v49, 0.0  ;;  %v441_v62 = vadd.f32 %v742_v7, %v370_v50  ;;  %v371_v63 = vadd.f32 %v307_v43, %v172_v51  ;;  %v173_v0 = vadd.f32 %v727_v2, %v102_v52 }
   0xe   :  { %565 = vst.msk [vmem:[#allocation2] sm:$0xff] %vm564_vm0, %v500_v45  ;;  %v440_v58 = vadd.f32 %v742_v7, %v369_v48  ;;  %566 = vst.msk [vmem:[#allocation2 + $0x8] sm:$0xff] %vm564_vm0, %v501_v56  ;;  %v103_v8 = vmul.f32 %v722_v1, %v32_v53  ;;  %v309_v9 = vmul.f32 %v736_v5, %v238_v54  ;;  %v245_v48 = vld [vmem:[%s1430_s3 + $0x78] sm:$0xff]  ;;  %v40_v53 = vld [vmem:[%s1427_s0 + $0x80] sm:$0xff] }
   0xf   :  { %567 = vst.msk [vmem:[#allocation2 + $0x10] sm:$0xff] %vm564_vm0, %v502_v57  ;;  %v104_v10 = vmul.f32 %v722_v1, %v33_v55  ;;  %568 = vst.msk [vmem:[#allocation2 + $0x18] sm:$0xff] %vm564_vm0, %v503_v61  ;;  %v505_v13 = vmax.f32 %v441_v62, 0.0  ;;  %v442_v14 = vadd.f32 %v742_v7, %v371_v63  ;;  %v372_v15 = vadd.f32 %v308_v59, %v173_v0  ;;  %v41_v59 = vld [vmem:[%s1427_s0 + $0x88] sm:$0xff] }
  0x10   :  { %v504_v6 = vmax.f32 %v440_v58, 0.0  ;;  %v310_v16 = vmul.f32 %v736_v5, %v239_v60  ;;  %v174_v18 = vadd.f32 %v727_v2, %v103_v8  ;;  %v105_v20 = vmul.f32 %v722_v1, %v34_v3  ;;  %v246_v58 = vld [vmem:[%s1430_s3 + $0x80] sm:$0xff]  ;;  %v247_v0 = vld [vmem:[%s1430_s3 + $0x88] sm:$0xff] }
  0x11   :  { %v175_v19 = vadd.f32 %v727_v2, %v104_v10  ;;  %v311_v21 = vmul.f32 %v736_v5, %v240_v4  ;;  %570 = vst.msk [vmem:[#allocation2 + $0x28] sm:$0xff] %vm564_vm0, %v505_v13  ;;  %v506_v24 = vmax.f32 %v442_v14, 0.0  ;;  %v443_v25 = vadd.f32 %v742_v7, %v372_v15  ;;  %v248_v10 = vld [vmem:[%s1430_s3 + $0x90] sm:$0xff]  ;;  %v43_v15 = vld [vmem:[%s1427_s0 + $0x98] sm:$0xff] }
  0x12   :  { %569 = vst.msk [vmem:[#allocation2 + $0x20] sm:$0xff] %vm564_vm0, %v504_v6  ;;  %v106_v26 = vmul.f32 %v722_v1, %v35_v11  ;;  %v312_v27 = vmul.f32 %v736_v5, %v241_v12  ;;  %v373_v28 = vadd.f32 %v309_v9, %v174_v18  ;;  %v176_v30 = vadd.f32 %v727_v2, %v105_v20  ;;  %v42_v9 = vld [vmem:[%s1427_s0 + $0x90] sm:$0xff] }
  0x13   :  { %v374_v29 = vadd.f32 %v310_v16, %v175_v19  ;;  %v107_v31 = vmul.f32 %v722_v1, %v36_v17  ;;  %571 = vst.msk [vmem:[#allocation2 + $0x30] sm:$0xff] %vm564_vm0, %v506_v24  ;;  %v507_v34 = vmax.f32 %v443_v25, 0.0  ;;  %v313_v36 = vmul.f32 %v736_v5, %v242_v22  ;;  %v249_v16 = vld [vmem:[%s1430_s3 + $0x98] sm:$0xff] }
  0x14   :  { %v177_v35 = vadd.f32 %v727_v2, %v106_v26  ;;  %v108_v37 = vmul.f32 %v722_v1, %v37_v23  ;;  %v444_v38 = vadd.f32 %v742_v7, %v373_v28  ;;  %v375_v40 = vadd.f32 %v311_v21, %v176_v30  ;;  %v44_v21 = vld [vmem:[%s1427_s0 + $0xa0] sm:$0xff] }
  0x15   :  { %v445_v39 = vadd.f32 %v742_v7, %v374_v29  ;;  %v178_v41 = vadd.f32 %v727_v2, %v107_v31  ;;  %572 = vst.msk [vmem:[#allocation2 + $0x38] sm:$0xff] %vm564_vm0, %v507_v34  ;;  %v314_v45 = vmul.f32 %v736_v5, %v243_v32  ;;  %v109_v46 = vmul.f32 %v722_v1, %v38_v33  ;;  %v250_v26 = vld [vmem:[%s1430_s3 + $0xa0] sm:$0xff] }
  0x16   :  { %v376_v43 = vadd.f32 %v312_v27, %v177_v35  ;;  %v179_v44 = vadd.f32 %v727_v2, %v108_v37  ;;  %v508_v49 = vmax.f32 %v444_v38, 0.0  ;;  %v446_v51 = vadd.f32 %v742_v7, %v375_v40  ;;  %v45_v27 = vld [vmem:[%s1427_s0 + $0xa8] sm:$0xff] }
  0x17   :  { %v509_v50 = vmax.f32 %v445_v39, 0.0  ;;  %v377_v52 = vadd.f32 %v313_v36, %v178_v41  ;;  %v180_v56 = vadd.f32 %v727_v2, %v109_v46  ;;  %v315_v57 = vmul.f32 %v736_v5, %v244_v42  ;;  %v251_v36 = vld [vmem:[%s1430_s3 + $0xa8] sm:$0xff]  ;;  %v46_v41 = vld [vmem:[%s1427_s0 + $0xb0] sm:$0xff] }
  0x18   :  { %v447_v54 = vadd.f32 %v742_v7, %v376_v43  ;;  %v378_v55 = vadd.f32 %v314_v45, %v179_v44  ;;  %573 = vst.msk [vmem:[#allocation2 + $0x40] sm:$0xff] %vm564_vm0, %v508_v49  ;;  %v510_v60 = vmax.f32 %v446_v51, 0.0  ;;  %v110_v62 = vmul.f32 %v722_v1, %v39_v47  ;;  %v252_v46 = vld [vmem:[%s1430_s3 + $0xb0] sm:$0xff]  ;;  %v47_v47 = vld [vmem:[%s1427_s0 + $0xb8] sm:$0xff] }
  0x19   :  { %574 = vst.msk [vmem:[#allocation2 + $0x48] sm:$0xff] %vm564_vm0, %v509_v50  ;;  %v448_v61 = vadd.f32 %v742_v7, %v377_v52  ;;  %v316_v63 = vmul.f32 %v736_v5, %v245_v48  ;;  %v379_v6 = vadd.f32 %v315_v57, %v180_v56  ;;  %v111_v8 = vmul.f32 %v722_v1, %v40_v53  ;;  %v253_v52 = vld [vmem:[%s1430_s3 + $0xb8] sm:$0xff]  ;;  %v48_v57 = vld [vmem:[%s1427_s0 + $0xc0] sm:$0xff] }
  0x1a   :  { %v511_v3 = vmax.f32 %v447_v54, 0.0  ;;  %v449_v4 = vadd.f32 %v742_v7, %v378_v55  ;;  %575 = vst.msk [vmem:[#allocation2 + $0x50] sm:$0xff] %vm564_vm0, %v510_v60  ;;  %v181_v12 = vadd.f32 %v727_v2, %v110_v62  ;;  %v317_v13 = vmul.f32 %v736_v5, %v246_v58  ;;  %v254_v62 = vld [vmem:[%s1430_s3 + $0xc0] sm:$0xff] }
  0x1b   :  { %v512_v11 = vmax.f32 %v448_v61, 0.0  ;;  %v112_v14 = vmul.f32 %v722_v1, %v41_v59  ;;  %v450_v18 = vadd.f32 %v742_v7, %v379_v6  ;;  %v182_v19 = vadd.f32 %v727_v2, %v111_v8  ;;  %v255_v8 = vld [vmem:[%s1430_s3 + $0xc8] sm:$0xff] }
  0x1c   :  { %576 = vst.msk [vmem:[#allocation2 + $0x58] sm:$0xff] %vm564_vm0, %v511_v3  ;;  %v513_v17 = vmax.f32 %v449_v4, 0.0  ;;  %v318_v20 = vmul.f32 %v736_v5, %v247_v0  ;;  %v380_v22 = vadd.f32 %v316_v63, %v181_v12  ;;  %v113_v24 = vmul.f32 %v722_v1, %v42_v9  ;;  %v49_v63 = vld [vmem:[%s1427_s0 + $0xc8] sm:$0xff] }
  0x1d   :  { %577 = vst.msk [vmem:[#allocation2 + $0x60] sm:$0xff] %vm564_vm0, %v512_v11  ;;  %v183_v23 = vadd.f32 %v727_v2, %v112_v14  ;;  %v319_v25 = vmul.f32 %v736_v5, %v248_v10  ;;  %v514_v28 = vmax.f32 %v450_v18, 0.0  ;;  %v381_v29 = vadd.f32 %v317_v13, %v182_v19  ;;  %v50_v13 = vld [vmem:[%s1427_s0 + $0xd0] sm:$0xff]  ;;  %v51_v19 = vld [vmem:[%s1427_s0 + $0xd8] sm:$0xff] }
  0x1e   :  { %578 = vst.msk [vmem:[#allocation2 + $0x68] sm:$0xff] %vm564_vm0, %v513_v17  ;;  %v114_v30 = vmul.f32 %v722_v1, %v43_v15  ;;  %v320_v31 = vmul.f32 %v736_v5, %v249_v16  ;;  %v451_v32 = vadd.f32 %v742_v7, %v380_v22  ;;  %v184_v34 = vadd.f32 %v727_v2, %v113_v24  ;;  %v256_v14 = vld [vmem:[%s1430_s3 + $0xd0] sm:$0xff] }
  0x1f   :  { %v382_v33 = vadd.f32 %v318_v20, %v183_v23  ;;  %v115_v35 = vmul.f32 %v722_v1, %v44_v21  ;;  %579 = vst.msk [vmem:[#allocation2 + $0x70] sm:$0xff] %vm564_vm0, %v514_v28  ;;  %v452_v37 = vadd.f32 %v742_v7, %v381_v29  ;;  %v321_v39 = vmul.f32 %v736_v5, %v250_v26  ;;  %v257_v20 = vld [vmem:[%s1430_s3 + $0xd8] sm:$0xff] }
  0x20   :  { %v185_v38 = vadd.f32 %v727_v2, %v114_v30  ;;  %v116_v40 = vmul.f32 %v722_v1, %v45_v27  ;;  %v515_v42 = vmax.f32 %v451_v32, 0.0  ;;  %v383_v44 = vadd.f32 %v319_v25, %v184_v34  ;;  %v52_v25 = vld [vmem:[%s1427_s0 + $0xe0] sm:$0xff] }
  0x21   :  { %v453_v43 = vadd.f32 %v742_v7, %v382_v33  ;;  %v186_v45 = vadd.f32 %v727_v2, %v115_v35  ;;  %v516_v48 = vmax.f32 %v452_v37, 0.0  ;;  %v322_v51 = vmul.f32 %v736_v5, %v251_v36  ;;  %v258_v30 = vld [vmem:[%s1430_s3 + $0xe0] sm:$0xff]  ;;  %v53_v35 = vld [vmem:[%s1427_s0 + $0xe8] sm:$0xff] }
  0x22   :  { %v384_v49 = vadd.f32 %v320_v31, %v185_v38  ;;  %v187_v50 = vadd.f32 %v727_v2, %v116_v40  ;;  %580 = vst.msk [vmem:[#allocation2 + $0x78] sm:$0xff] %vm564_vm0, %v515_v42  ;;  %v454_v54 = vadd.f32 %v742_v7, %v383_v44  ;;  %v117_v56 = vmul.f32 %v722_v1, %v46_v41  ;;  %v259_v40 = vld [vmem:[%s1430_s3 + $0xe8] sm:$0xff]  ;;  %v54_v41 = vld [vmem:[%s1427_s0 + $0xf0] sm:$0xff] }
  0x23   :  { %v517_v53 = vmax.f32 %v453_v43, 0.0  ;;  %v385_v55 = vadd.f32 %v321_v39, %v186_v45  ;;  %581 = vst.msk [vmem:[#allocation2 + $0x80] sm:$0xff] %vm564_vm0, %v516_v48  ;;  %v323_v60 = vmul.f32 %v736_v5, %v252_v46  ;;  %v118_v61 = vmul.f32 %v722_v1, %v47_v47 }
  0x24   :  { %v455_v58 = vadd.f32 %v742_v7, %v384_v49  ;;  %v386_v59 = vadd.f32 %v322_v51, %v187_v50  ;;  %v518_v0 = vmax.f32 %v454_v54, 0.0  ;;  %v188_v4 = vadd.f32 %v727_v2, %v117_v56  ;;  %v260_v50 = vld [vmem:[%s1430_s3 + $0xf0] sm:$0xff]  ;;  %v55_v51 = vld [vmem:[%s1427_s0 + $0xf8] sm:$0xff] }
  0x25   :  { %582 = vst.msk [vmem:[#allocation2 + $0x88] sm:$0xff] %vm564_vm0, %v517_v53  ;;  %v456_v3 = vadd.f32 %v742_v7, %v385_v55  ;;  %v324_v6 = vmul.f32 %v736_v5, %v253_v52  ;;  %v189_v11 = vadd.f32 %v727_v2, %v118_v61  ;;  %v119_v12 = vmul.f32 %v722_v1, %v48_v57  ;;  %v261_v56 = vld [vmem:[%s1430_s3 + $0xf8] sm:$0xff] }
  0x26   :  { %v519_v9 = vmax.f32 %v455_v58, 0.0  ;;  %v457_v10 = vadd.f32 %v742_v7, %v386_v59  ;;  %583 = vst.msk [vmem:[#allocation2 + $0x90] sm:$0xff] %vm564_vm0, %v518_v0  ;;  %v387_v16 = vadd.f32 %v323_v60, %v188_v4  ;;  %v325_v17 = vmul.f32 %v736_v5, %v254_v62 }
  0x27   :  { %v520_v15 = vmax.f32 %v456_v3, 0.0  ;;  %v120_v18 = vmul.f32 %v722_v1, %v49_v63  ;;  %v388_v22 = vadd.f32 %v324_v6, %v189_v11  ;;  %v190_v23 = vadd.f32 %v727_v2, %v119_v12 }
  0x28   :  { %584 = vst.msk [vmem:[#allocation2 + $0x98] sm:$0xff] %vm564_vm0, %v519_v9  ;;  %v521_v21 = vmax.f32 %v457_v10, 0.0  ;;  %v326_v24 = vmul.f32 %v736_v5, %v255_v8  ;;  %v458_v26 = vadd.f32 %v742_v7, %v387_v16  ;;  %v121_v28 = vmul.f32 %v722_v1, %v50_v13 }
  0x29   :  { %585 = vst.msk [vmem:[#allocation2 + $0xa0] sm:$0xff] %vm564_vm0, %v520_v15  ;;  %v191_v27 = vadd.f32 %v727_v2, %v120_v18  ;;  %v327_v29 = vmul.f32 %v736_v5, %v256_v14  ;;  %v459_v31 = vadd.f32 %v742_v7, %v388_v22  ;;  %v389_v32 = vadd.f32 %v325_v17, %v190_v23 }
  0x2a   :  { %586 = vst.msk [vmem:[#allocation2 + $0xa8] sm:$0xff] %vm564_vm0, %v521_v21  ;;  %v122_v33 = vmul.f32 %v722_v1, %v51_v19  ;;  %v328_v34 = vmul.f32 %v736_v5, %v257_v20  ;;  %v522_v36 = vmax.f32 %v458_v26, 0.0  ;;  %v192_v38 = vadd.f32 %v727_v2, %v121_v28 }
  0x2b   :  { %v390_v37 = vadd.f32 %v326_v24, %v191_v27  ;;  %v123_v39 = vmul.f32 %v722_v1, %v52_v25  ;;  %v523_v42 = vmax.f32 %v459_v31, 0.0  ;;  %v460_v43 = vadd.f32 %v742_v7, %v389_v32 }
  0x2c   :  { %v193_v44 = vadd.f32 %v727_v2, %v122_v33  ;;  %v329_v45 = vmul.f32 %v736_v5, %v258_v30  ;;  %587 = vst.msk [vmem:[#allocation2 + $0xb0] sm:$0xff] %vm564_vm0, %v522_v36  ;;  %v391_v47 = vadd.f32 %v327_v29, %v192_v38  ;;  %v124_v49 = vmul.f32 %v722_v1, %v53_v35 }
  0x2d   :  { %v461_v46 = vadd.f32 %v742_v7, %v390_v37  ;;  %v194_v48 = vadd.f32 %v727_v2, %v123_v39  ;;  %588 = vst.msk [vmem:[#allocation2 + $0xb8] sm:$0xff] %vm564_vm0, %v523_v42  ;;  %v524_v52 = vmax.f32 %v460_v43, 0.0  ;;  %v330_v54 = vmul.f32 %v736_v5, %v259_v40 }
  0x2e   :  { %v392_v53 = vadd.f32 %v328_v34, %v193_v44  ;;  %v125_v55 = vmul.f32 %v722_v1, %v54_v41 }
  0x2f   :  { %11 = vsyncpa [#allocation3], 0  ;;  %v525_v57 = vmax.f32 %v461_v46, 0.0  ;;  %v462_v58 = vadd.f32 %v742_v7, %v391_v47  ;;  %v393_v59 = vadd.f32 %v329_v45, %v194_v48  ;;  %v195_v60 = vadd.f32 %v727_v2, %v124_v49  ;;  %v56_v61 = vld [vmem:[%s1427_s0 + $0x100] sm:$0xff]  ;;  %589 = vst.msk [vmem:[#allocation2 + $0xc0] sm:$0xff] %vm564_vm0, %v524_v52  ;;  %v57_v6 = vld [vmem:[%s1427_s0 + $0x108] sm:$0xff] }
  0x30   :  { %v463_v62 = vadd.f32 %v742_v7, %v392_v53  ;;  %v196_v63 = vadd.f32 %v727_v2, %v125_v55  ;;  %v331_v0 = vmul.f32 %v736_v5, %v260_v50  ;;  %v126_v3 = vmul.f32 %v722_v1, %v55_v51  ;;  %v262_v4 = vld [vmem:[%s1430_s3 + $0x100] sm:$0xff]  ;;  %v263_v12 = vld [vmem:[%s1430_s3 + $0x108] sm:$0xff]  ;;  %v58_v17 = vld [vmem:[%s1427_s0 + $0x110] sm:$0xff] }
  0x31   :  { %590 = vst.msk [vmem:[#allocation2 + $0xc8] sm:$0xff] %vm564_vm0, %v525_v57  ;;  %v526_v8 = vmax.f32 %v462_v58, 0.0  ;;  %v464_v9 = vadd.f32 %v742_v7, %v393_v59  ;;  %v394_v10 = vadd.f32 %v330_v54, %v195_v60  ;;  %v332_v11 = vmul.f32 %v736_v5, %v261_v56  ;;  %v264_v18 = vld [vmem:[%s1430_s3 + $0x110] sm:$0xff]  ;;  %v59_v23 = vld [vmem:[%s1427_s0 + $0x118] sm:$0xff]  ;;  %v60_v29 = vld [vmem:[%s1427_s0 + $0x120] sm:$0xff] }
  0x32   :  { %v527_v13 = vmax.f32 %v463_v62, 0.0  ;;  %v395_v14 = vadd.f32 %v331_v0, %v196_v63  ;;  %v197_v15 = vadd.f32 %v727_v2, %v126_v3  ;;  %v127_v16 = vmul.f32 %v722_v1, %v56_v61  ;;  %v265_v28 = vld [vmem:[%s1430_s3 + $0x118] sm:$0xff]  ;;  %v266_v34 = vld [vmem:[%s1430_s3 + $0x120] sm:$0xff]  ;;  %v61_v39 = vld [vmem:[%s1427_s0 + $0x128] sm:$0xff] }
  0x33   :  { %591 = vst.msk [vmem:[#allocation2 + $0xd0] sm:$0xff] %vm564_vm0, %v526_v8  ;;  %v528_v19 = vmax.f32 %v464_v9, 0.0  ;;  %v465_v20 = vadd.f32 %v742_v7, %v394_v10  ;;  %v333_v21 = vmul.f32 %v736_v5, %v262_v4  ;;  %v128_v22 = vmul.f32 %v722_v1, %v57_v6  ;;  %v267_v44 = vld [vmem:[%s1430_s3 + $0x128] sm:$0xff]  ;;  %v62_v45 = vld [vmem:[%s1427_s0 + $0x130] sm:$0xff]  ;;  %v63_v55 = vld [vmem:[%s1427_s0 + $0x138] sm:$0xff] }
  0x34   :  { %592 = vst.msk [vmem:[#allocation2 + $0xd8] sm:$0xff] %vm564_vm0, %v527_v13  ;;  %v466_v24 = vadd.f32 %v742_v7, %v395_v14  ;;  %v396_v25 = vadd.f32 %v332_v11, %v197_v15  ;;  %v198_v26 = vadd.f32 %v727_v2, %v127_v16  ;;  %v334_v27 = vmul.f32 %v736_v5, %v263_v12  ;;  %v268_v54 = vld [vmem:[%s1430_s3 + $0x130] sm:$0xff]  ;;  %v269_v60 = vld [vmem:[%s1430_s3 + $0x138] sm:$0xff]  ;;  %v64_v3 = vld [vmem:[%s1427_s0 + $0x140] sm:$0xff] }
  0x35   :  { %593 = vst.msk [vmem:[#allocation2 + $0xe0] sm:$0xff] %vm564_vm0, %v528_v19  ;;  %v529_v30 = vmax.f32 %v465_v20, 0.0  ;;  %v199_v31 = vadd.f32 %v727_v2, %v128_v22  ;;  %v129_v32 = vmul.f32 %v722_v1, %v58_v17  ;;  %v335_v33 = vmul.f32 %v736_v5, %v264_v18  ;;  %v270_v10 = vld [vmem:[%s1430_s3 + $0x140] sm:$0xff]  ;;  %v65_v11 = vld [vmem:[%s1427_s0 + $0x148] sm:$0xff]  ;;  %v272_v22 = vld [vmem:[%s1430_s3 + $0x150] sm:$0xff] }
  0x36   :  { %v530_v35 = vmax.f32 %v466_v24, 0.0  ;;  %v467_v36 = vadd.f32 %v742_v7, %v396_v25  ;;  %v397_v37 = vadd.f32 %v333_v21, %v198_v26  ;;  %v130_v38 = vmul.f32 %v722_v1, %v59_v23  ;;  %v271_v16 = vld [vmem:[%s1430_s3 + $0x148] sm:$0xff]  ;;  %v66_v21 = vld [vmem:[%s1427_s0 + $0x150] sm:$0xff] }
  0x37   :  { %594 = vst.msk [vmem:[#allocation2 + $0xe8] sm:$0xff] %vm564_vm0, %v529_v30  ;;  %v398_v40 = vadd.f32 %v334_v27, %v199_v31  ;;  %v200_v41 = vadd.f32 %v727_v2, %v129_v32  ;;  %v336_v42 = vmul.f32 %v736_v5, %v265_v28  ;;  %v131_v43 = vmul.f32 %v722_v1, %v60_v29  ;;  %v67_v27 = vld [vmem:[%s1427_s0 + $0x158] sm:$0xff] }
  0x38   :  { %595 = vst.msk [vmem:[#allocation2 + $0xf0] sm:$0xff] %vm564_vm0, %v530_v35  ;;  %v531_v46 = vmax.f32 %v467_v36, 0.0  ;;  %v468_v47 = vadd.f32 %v742_v7, %v397_v37  ;;  %v201_v48 = vadd.f32 %v727_v2, %v130_v38  ;;  %v337_v49 = vmul.f32 %v736_v5, %v266_v34  ;;  %v273_v32 = vld [vmem:[%s1430_s3 + $0x158] sm:$0xff]  ;;  %v274_v38 = vld [vmem:[%s1430_s3 + $0x160] sm:$0xff] }
  0x39   :  { %v469_v50 = vadd.f32 %v742_v7, %v398_v40  ;;  %v399_v51 = vadd.f32 %v335_v33, %v200_v41  ;;  %v202_v52 = vadd.f32 %v727_v2, %v131_v43  ;;  %v132_v53 = vmul.f32 %v722_v1, %v61_v39  ;;  %v68_v33 = vld [vmem:[%s1427_s0 + $0x160] sm:$0xff]  ;;  %v69_v43 = vld [vmem:[%s1427_s0 + $0x168] sm:$0xff] }
  0x3a   :  { %596 = vst.msk [vmem:[#allocation2 + $0xf8] sm:$0xff] %vm564_vm0, %v531_v46  ;;  %v532_v56 = vmax.f32 %v468_v47, 0.0  ;;  %v400_v57 = vadd.f32 %v336_v42, %v201_v48  ;;  %v338_v58 = vmul.f32 %v736_v5, %v267_v44  ;;  %v133_v59 = vmul.f32 %v722_v1, %v62_v45  ;;  %v275_v48 = vld [vmem:[%s1430_s3 + $0x168] sm:$0xff] }
  0x3b   :  { %v533_v61 = vmax.f32 %v469_v50, 0.0  ;;  %v470_v62 = vadd.f32 %v742_v7, %v399_v51  ;;  %v401_v63 = vadd.f32 %v337_v49, %v202_v52  ;;  %v203_v0 = vadd.f32 %v727_v2, %v132_v53  ;;  %v70_v49 = vld [vmem:[%s1427_s0 + $0x170] sm:$0xff] }
  0x3c   :  { %597 = vst.msk [vmem:[#allocation2 + $0x100] sm:$0xff] %vm564_vm0, %v532_v56  ;;  %v471_v4 = vadd.f32 %v742_v7, %v400_v57  ;;  %v204_v6 = vadd.f32 %v727_v2, %v133_v59  ;;  %v339_v8 = vmul.f32 %v736_v5, %v268_v54  ;;  %v134_v9 = vmul.f32 %v722_v1, %v63_v55  ;;  %v71_v59 = vld [vmem:[%s1427_s0 + $0x178] sm:$0xff] }
  0x3d   :  { %598 = vst.msk [vmem:[#allocation2 + $0x108] sm:$0xff] %vm564_vm0, %v533_v61  ;;  %v534_v12 = vmax.f32 %v470_v62, 0.0  ;;  %v472_v13 = vadd.f32 %v742_v7, %v401_v63  ;;  %v402_v14 = vadd.f32 %v338_v58, %v203_v0  ;;  %v340_v15 = vmul.f32 %v736_v5, %v269_v60  ;;  %v276_v58 = vld [vmem:[%s1430_s3 + $0x170] sm:$0xff]  ;;  %v277_v0 = vld [vmem:[%s1430_s3 + $0x178] sm:$0xff] }
  0x3e   :  { %v535_v17 = vmax.f32 %v471_v4, 0.0  ;;  %v403_v18 = vadd.f32 %v339_v8, %v204_v6  ;;  %v205_v19 = vadd.f32 %v727_v2, %v134_v9  ;;  %v135_v20 = vmul.f32 %v722_v1, %v64_v3  ;;  %v72_v9 = vld [vmem:[%s1427_s0 + $0x180] sm:$0xff] }
  0x3f   :  { %599 = vst.msk [vmem:[#allocation2 + $0x110] sm:$0xff] %vm564_vm0, %v534_v12  ;;  %v536_v23 = vmax.f32 %v472_v13, 0.0  ;;  %v473_v24 = vadd.f32 %v742_v7, %v402_v14  ;;  %v341_v25 = vmul.f32 %v736_v5, %v270_v10  ;;  %v136_v26 = vmul.f32 %v722_v1, %v65_v11  ;;  %v278_v14 = vld [vmem:[%s1430_s3 + $0x180] sm:$0xff] }
  0x40   :  { %600 = vst.msk [vmem:[#allocation2 + $0x118] sm:$0xff] %vm564_vm0, %v535_v17  ;;  %v474_v28 = vadd.f32 %v742_v7, %v403_v18  ;;  %v404_v29 = vadd.f32 %v340_v15, %v205_v19  ;;  %v206_v30 = vadd.f32 %v727_v2, %v135_v20  ;;  %v342_v31 = vmul.f32 %v736_v5, %v271_v16  ;;  %v73_v15 = vld [vmem:[%s1427_s0 + $0x188] sm:$0xff] }
  0x41   :  { %601 = vst.msk [vmem:[#allocation2 + $0x120] sm:$0xff] %vm564_vm0, %v536_v23  ;;  %v537_v34 = vmax.f32 %v473_v24, 0.0  ;;  %v207_v35 = vadd.f32 %v727_v2, %v136_v26  ;;  %v137_v36 = vmul.f32 %v722_v1, %v66_v21  ;;  %v343_v37 = vmul.f32 %v736_v5, %v272_v22  ;;  %v279_v20 = vld [vmem:[%s1430_s3 + $0x188] sm:$0xff]  ;;  %v280_v26 = vld [vmem:[%s1430_s3 + $0x190] sm:$0xff] }
  0x42   :  { %v538_v39 = vmax.f32 %v474_v28, 0.0  ;;  %v475_v40 = vadd.f32 %v742_v7, %v404_v29  ;;  %v405_v41 = vadd.f32 %v341_v25, %v206_v30  ;;  %v138_v42 = vmul.f32 %v722_v1, %v67_v27  ;;  %v74_v25 = vld [vmem:[%s1427_s0 + $0x190] sm:$0xff] }
  0x43   :  { %602 = vst.msk [vmem:[#allocation2 + $0x128] sm:$0xff] %vm564_vm0, %v537_v34  ;;  %v406_v44 = vadd.f32 %v342_v31, %v207_v35  ;;  %v208_v45 = vadd.f32 %v727_v2, %v137_v36  ;;  %v344_v46 = vmul.f32 %v736_v5, %v273_v32  ;;  %v139_v47 = vmul.f32 %v722_v1, %v68_v33  ;;  %v75_v31 = vld [vmem:[%s1427_s0 + $0x198] sm:$0xff] }
  0x44   :  { %603 = vst.msk [vmem:[#allocation2 + $0x130] sm:$0xff] %vm564_vm0, %v538_v39  ;;  %v539_v50 = vmax.f32 %v475_v40, 0.0  ;;  %v476_v51 = vadd.f32 %v742_v7, %v405_v41  ;;  %v209_v52 = vadd.f32 %v727_v2, %v138_v42  ;;  %v345_v53 = vmul.f32 %v736_v5, %v274_v38  ;;  %v281_v36 = vld [vmem:[%s1430_s3 + $0x198] sm:$0xff]  ;;  %v282_v42 = vld [vmem:[%s1430_s3 + $0x1a0] sm:$0xff] }
  0x45   :  { %v477_v54 = vadd.f32 %v742_v7, %v406_v44  ;;  %v407_v55 = vadd.f32 %v343_v37, %v208_v45  ;;  %v210_v56 = vadd.f32 %v727_v2, %v139_v47  ;;  %v140_v57 = vmul.f32 %v722_v1, %v69_v43  ;;  %v76_v37 = vld [vmem:[%s1427_s0 + $0x1a0] sm:$0xff]  ;;  %v77_v47 = vld [vmem:[%s1427_s0 + $0x1a8] sm:$0xff] }
  0x46   :  { %604 = vst.msk [vmem:[#allocation2 + $0x138] sm:$0xff] %vm564_vm0, %v539_v50  ;;  %v540_v60 = vmax.f32 %v476_v51, 0.0  ;;  %v408_v61 = vadd.f32 %v344_v46, %v209_v52  ;;  %v346_v62 = vmul.f32 %v736_v5, %v275_v48  ;;  %v141_v63 = vmul.f32 %v722_v1, %v70_v49  ;;  %v283_v52 = vld [vmem:[%s1430_s3 + $0x1a8] sm:$0xff] }
  0x47   :  { %v541_v3 = vmax.f32 %v477_v54, 0.0  ;;  %v478_v4 = vadd.f32 %v742_v7, %v407_v55  ;;  %v409_v6 = vadd.f32 %v345_v53, %v210_v56  ;;  %v211_v8 = vadd.f32 %v727_v2, %v140_v57  ;;  %v78_v53 = vld [vmem:[%s1427_s0 + $0x1b0] sm:$0xff] }
  0x48   :  { %605 = vst.msk [vmem:[#allocation2 + $0x140] sm:$0xff] %vm564_vm0, %v540_v60  ;;  %v479_v10 = vadd.f32 %v742_v7, %v408_v61  ;;  %v212_v11 = vadd.f32 %v727_v2, %v141_v63  ;;  %v347_v12 = vmul.f32 %v736_v5, %v276_v58  ;;  %v142_v13 = vmul.f32 %v722_v1, %v71_v59  ;;  %v79_v63 = vld [vmem:[%s1427_s0 + $0x1b8] sm:$0xff] }
  0x49   :  { %606 = vst.msk [vmem:[#allocation2 + $0x148] sm:$0xff] %vm564_vm0, %v541_v3  ;;  %v542_v16 = vmax.f32 %v478_v4, 0.0  ;;  %v480_v17 = vadd.f32 %v742_v7, %v409_v6  ;;  %v410_v18 = vadd.f32 %v346_v62, %v211_v8  ;;  %v348_v19 = vmul.f32 %v736_v5, %v277_v0  ;;  %v284_v62 = vld [vmem:[%s1430_s3 + $0x1b0] sm:$0xff]  ;;  %v285_v8 = vld [vmem:[%s1430_s3 + $0x1b8] sm:$0xff] }
  0x4a   :  { %v543_v21 = vmax.f32 %v479_v10, 0.0  ;;  %v411_v22 = vadd.f32 %v347_v12, %v212_v11  ;;  %v213_v23 = vadd.f32 %v727_v2, %v142_v13  ;;  %v143_v24 = vmul.f32 %v722_v1, %v72_v9  ;;  %v80_v13 = vld [vmem:[%s1427_s0 + $0x1c0] sm:$0xff] }
  0x4b   :  { %607 = vst.msk [vmem:[#allocation2 + $0x150] sm:$0xff] %vm564_vm0, %v542_v16  ;;  %v544_v27 = vmax.f32 %v480_v17, 0.0  ;;  %v481_v28 = vadd.f32 %v742_v7, %v410_v18  ;;  %v349_v29 = vmul.f32 %v736_v5, %v278_v14  ;;  %v144_v30 = vmul.f32 %v722_v1, %v73_v15  ;;  %v286_v18 = vld [vmem:[%s1430_s3 + $0x1c0] sm:$0xff] }
  0x4c   :  { %608 = vst.msk [vmem:[#allocation2 + $0x158] sm:$0xff] %vm564_vm0, %v543_v21  ;;  %v482_v32 = vadd.f32 %v742_v7, %v411_v22  ;;  %v412_v33 = vadd.f32 %v348_v19, %v213_v23  ;;  %v214_v34 = vadd.f32 %v727_v2, %v143_v24  ;;  %v350_v35 = vmul.f32 %v736_v5, %v279_v20  ;;  %v81_v19 = vld [vmem:[%s1427_s0 + $0x1c8] sm:$0xff] }
  0x4d   :  { %609 = vst.msk [vmem:[#allocation2 + $0x160] sm:$0xff] %vm564_vm0, %v544_v27  ;;  %v545_v38 = vmax.f32 %v481_v28, 0.0  ;;  %v215_v39 = vadd.f32 %v727_v2, %v144_v30  ;;  %v145_v40 = vmul.f32 %v722_v1, %v74_v25  ;;  %v351_v41 = vmul.f32 %v736_v5, %v280_v26  ;;  %v287_v24 = vld [vmem:[%s1430_s3 + $0x1c8] sm:$0xff]  ;;  %v288_v30 = vld [vmem:[%s1430_s3 + $0x1d0] sm:$0xff] }
  0x4e   :  { %v546_v43 = vmax.f32 %v482_v32, 0.0  ;;  %v483_v44 = vadd.f32 %v742_v7, %v412_v33  ;;  %v413_v45 = vadd.f32 %v349_v29, %v214_v34  ;;  %v146_v46 = vmul.f32 %v722_v1, %v75_v31  ;;  %v82_v29 = vld [vmem:[%s1427_s0 + $0x1d0] sm:$0xff] }
  0x4f   :  { %610 = vst.msk [vmem:[#allocation2 + $0x168] sm:$0xff] %vm564_vm0, %v545_v38  ;;  %v414_v48 = vadd.f32 %v350_v35, %v215_v39  ;;  %v216_v49 = vadd.f32 %v727_v2, %v145_v40  ;;  %v352_v50 = vmul.f32 %v736_v5, %v281_v36  ;;  %v147_v51 = vmul.f32 %v722_v1, %v76_v37  ;;  %v83_v35 = vld [vmem:[%s1427_s0 + $0x1d8] sm:$0xff] }
  0x50   :  { %611 = vst.msk [vmem:[#allocation2 + $0x170] sm:$0xff] %vm564_vm0, %v546_v43  ;;  %v547_v54 = vmax.f32 %v483_v44, 0.0  ;;  %v484_v55 = vadd.f32 %v742_v7, %v413_v45  ;;  %v217_v56 = vadd.f32 %v727_v2, %v146_v46  ;;  %v353_v57 = vmul.f32 %v736_v5, %v282_v42  ;;  %v289_v40 = vld [vmem:[%s1430_s3 + $0x1d8] sm:$0xff]  ;;  %v654_v43 = vld [vmem:[%s1431_s4] ss:$0 sm:$0xff] }
  0x51   :  { %v485_v58 = vadd.f32 %v742_v7, %v414_v48  ;;  %v415_v59 = vadd.f32 %v351_v41, %v216_v49  ;;  %v218_v60 = vadd.f32 %v727_v2, %v147_v51  ;;  %v148_v61 = vmul.f32 %v722_v1, %v77_v47  ;;  %v290_v45 = vld [vmem:[%s1430_s3 + $0x1e0] sm:$0xff]  ;;  %v85_v51 = vld [vmem:[%s1427_s0 + $0x1e8] sm:$0xff] }
  0x52   :  { %612 = vst.msk [vmem:[#allocation2 + $0x178] sm:$0xff] %vm564_vm0, %v547_v54  ;;  %v548_v0 = vmax.f32 %v484_v55, 0.0  ;;  %v416_v3 = vadd.f32 %v352_v50, %v217_v56  ;;  %v354_v4 = vmul.f32 %v736_v5, %v283_v52  ;;  %v149_v6 = vmul.f32 %v722_v1, %v78_v53  ;;  %v655_v47 = vld [vmem:[%s1432_s5] ss:$0 sm:$0xff]  ;;  %v291_v56 = vld [vmem:[%s1430_s3 + $0x1e8] sm:$0xff] }
  0x53   :  { %v549_v9 = vmax.f32 %v485_v58, 0.0  ;;  %v486_v10 = vadd.f32 %v742_v7, %v415_v59  ;;  %v417_v11 = vadd.f32 %v353_v57, %v218_v60  ;;  %v219_v12 = vadd.f32 %v727_v2, %v148_v61  ;;  %v86_v57 = vld [vmem:[%s1427_s0 + $0x1f0] sm:$0xff] }
  0x54   :  { %613 = vst.msk [vmem:[#allocation2 + $0x180] sm:$0xff] %vm564_vm0, %v548_v0  ;;  %v487_v14 = vadd.f32 %v742_v7, %v416_v3  ;;  %v220_v15 = vadd.f32 %v727_v2, %v149_v6  ;;  %v355_v16 = vmul.f32 %v736_v5, %v284_v62  ;;  %v150_v17 = vmul.f32 %v722_v1, %v79_v63  ;;  %v87_v6 = vld [vmem:[%s1427_s0 + $0x1f8] sm:$0xff] }
  0x55   :  { %614 = vst.msk [vmem:[#allocation2 + $0x188] sm:$0xff] %vm564_vm0, %v549_v9  ;;  %v550_v20 = vmax.f32 %v486_v10, 0.0  ;;  %v488_v21 = vadd.f32 %v742_v7, %v417_v11  ;;  %v418_v22 = vadd.f32 %v354_v4, %v219_v12  ;;  %v356_v23 = vmul.f32 %v736_v5, %v285_v8  ;;  %v292_v4 = vld [vmem:[%s1430_s3 + $0x1f0] sm:$0xff]  ;;  %v293_v12 = vld [vmem:[%s1430_s3 + $0x1f8] sm:$0xff] }
  0x56   :  { %v551_v25 = vmax.f32 %v487_v14, 0.0  ;;  %v419_v26 = vadd.f32 %v355_v16, %v220_v15  ;;  %v221_v27 = vadd.f32 %v727_v2, %v150_v17  ;;  %v151_v28 = vmul.f32 %v722_v1, %v80_v13 }
  0x57   :  { %615 = vst.msk [vmem:[#allocation2 + $0x190] sm:$0xff] %vm564_vm0, %v550_v20  ;;  %v552_v31 = vmax.f32 %v488_v21, 0.0  ;;  %v489_v32 = vadd.f32 %v742_v7, %v418_v22  ;;  %v357_v33 = vmul.f32 %v736_v5, %v286_v18  ;;  %v152_v34 = vmul.f32 %v722_v1, %v81_v19  ;;  %v84_v1 = vld [vmem:[%s1427_s0 + $0x1e0] sm:$0xff]  ;;  %s678_s0 = smov [#allocation2]  }
  0x58   :  { %616 = vst.msk [vmem:[#allocation2 + $0x198] sm:$0xff] %vm564_vm0, %v551_v25  ;;  %v490_v36 = vadd.f32 %v742_v7, %v419_v26  ;;  %v420_v37 = vadd.f32 %v356_v23, %v221_v27  ;;  %v222_v38 = vadd.f32 %v727_v2, %v151_v28  ;;  %v358_v39 = vmul.f32 %v736_v5, %v287_v24  ;;  %v652_v7 = vld [vmem:[%s1429_s2] ss:$0 sm:$0xff]  ;;  %s634_s3 = sshll.u32 %s678_s0, 4  ;;  %s635_s3 = int_to_ptr.vmem [resolvable:$true] %s634_s3 }
  0x59   :  { %617 = vst.msk [vmem:[#allocation2 + $0x1a0] sm:$0xff] %vm564_vm0, %v552_v31  ;;  %v553_v41 = vmax.f32 %v489_v32, 0.0  ;;  %v223_v42 = vadd.f32 %v652_v7, %v152_v34  ;;  %v653_v2 = vld [vmem:[%s1428_s1] ss:$0 sm:$0xff]  ;;  %v359_v44 = vmul.f32 %v654_v43, %v288_v30  ;;  %v360_v54 = vmul.f32 %v654_v43, %v289_v40  ;;  %s656_s25 = scalar_lea.vmem %s635_s3, 8192  ;;  %p661_p1 = scmp.lt.s32.totalorder %s635_s3, %s635_s3 }
  0x5a   :  { %v153_v5 = vmul.f32 %v653_v2, %v82_v29  ;;  %v554_v46 = vmax.f32 %v490_v36, 0.0  ;;  %v491_v48 = vadd.f32 %v655_v47, %v420_v37  ;;  %v421_v49 = vadd.f32 %v357_v33, %v222_v38  ;;  %p657_p0 = scmp.ne.s32.totalorder %s635_s3, %s656_s25  ;;  %p662_p2 = scmp.lt.s32.totalorder %s656_s25, %s656_s25 }
  0x5b   :  { %v154_v50 = vmul.f32 %v653_v2, %v83_v35  ;;  %618 = vst.msk [vmem:[#allocation2 + $0x1a8] sm:$0xff] %vm564_vm0, %v553_v41  ;;  %v422_v52 = vadd.f32 %v358_v39, %v223_v42  ;;  %v155_v55 = vmul.f32 %v653_v2, %v84_v1  ;;  %v361_v61 = vmul.f32 %v654_v43, %v290_v45 }
  0x5c   :  { %v224_v53 = vadd.f32 %v652_v7, %v153_v5  ;;  %619 = vst.msk [vmem:[#allocation2 + $0x1b0] sm:$0xff] %vm564_vm0, %v554_v46  ;;  %v555_v58 = vmax.f32 %v491_v48, 0.0  ;;  %v492_v59 = vadd.f32 %v655_v47, %v421_v49  ;;  %v156_v3 = vmul.f32 %v653_v2, %v85_v51  ;;  %p663_p3 = por %p662_p2, %p661_p1 }
  0x5d   :  { %v225_v60 = vadd.f32 %v652_v7, %v154_v50  ;;  %v493_v62 = vadd.f32 %v655_v47, %v422_v52  ;;  %v226_v0 = vadd.f32 %v652_v7, %v155_v55  ;;  %v362_v10 = vmul.f32 %v654_v43, %v291_v56 }
  0x5e   :  { %v423_v63 = vadd.f32 %v359_v44, %v224_v53  ;;  %620 = vst.msk [vmem:[#allocation2 + $0x1b8] sm:$0xff] %vm564_vm0, %v555_v58  ;;  %v556_v8 = vmax.f32 %v492_v59, 0.0  ;;  %v157_v11 = vmul.f32 %v653_v2, %v86_v57  ;;  %v227_v16 = vadd.f32 %v652_v7, %v156_v3  ;;  %p664_p4 = pnand %p663_p3, %p657_p0 }
  0x5f   :  { %v424_v9 = vadd.f32 %v360_v54, %v225_v60  ;;  %v557_v13 = vmax.f32 %v493_v62, 0.0  ;;  %v425_v15 = vadd.f32 %v361_v61, %v226_v0  ;;  %v363_v19 = vmul.f32 %v654_v43, %v292_v4 }
  0x60   :  { %v494_v14 = vadd.f32 %v655_v47, %v423_v63  ;;  %621 = vst.msk [vmem:[#allocation2 + $0x1c0] sm:$0xff] %vm564_vm0, %v556_v8  ;;  %v228_v18 = vadd.f32 %v652_v7, %v157_v11  ;;  %v158_v20 = vmul.f32 %v653_v2, %v87_v6  ;;  %v426_v23 = vadd.f32 %v362_v10, %v227_v16 }
  0x61   :  { %v495_v17 = vadd.f32 %v655_v47, %v424_v9  ;;  %622 = vst.msk [vmem:[#allocation2 + $0x1c8] sm:$0xff] %vm564_vm0, %v557_v13  ;;  %v496_v22 = vadd.f32 %v655_v47, %v425_v15  ;;  %v364_v24 = vmul.f32 %v654_v43, %v293_v12 }
  0x62   :  { %v558_v21 = vmax.f32 %v494_v14, 0.0  ;;  %v427_v26 = vadd.f32 %v363_v19, %v228_v18  ;;  %v229_v27 = vadd.f32 %v652_v7, %v158_v20  ;;  %v497_v29 = vadd.f32 %v655_v47, %v426_v23 }
  0x63   :  { %v559_v25 = vmax.f32 %v495_v17, 0.0  ;;  %v560_v28 = vmax.f32 %v496_v22, 0.0 }
  0x64   :  { %623 = vst.msk [vmem:[#allocation2 + $0x1d0] sm:$0xff] %vm564_vm0, %v558_v21  ;;  %v498_v30 = vadd.f32 %v655_v47, %v427_v26  ;;  %v428_v31 = vadd.f32 %v364_v24, %v229_v27  ;;  %v561_v32 = vmax.f32 %v497_v29, 0.0 }
  0x65   :  { %624 = vst.msk [vmem:[#allocation2 + $0x1d8] sm:$0xff] %vm564_vm0, %v559_v25  ;;  %625 = vst.msk [vmem:[#allocation2 + $0x1e0] sm:$0xff] %vm564_vm0, %v560_v28 }
  0x66   :  { %v562_v33 = vmax.f32 %v498_v30, 0.0  ;;  %v499_v34 = vadd.f32 %v655_v47, %v428_v31  ;;  %626 = vst.msk [vmem:[#allocation2 + $0x1e8] sm:$0xff] %vm564_vm0, %v561_v32 }
  0x68   :  { %627 = vst.msk [vmem:[#allocation2 + $0x1f0] sm:$0xff] %vm564_vm0, %v562_v33  ;;  %v563_v35 = vmax.f32 %v499_v34, 0.0 }
  0x6a   :  { %628 = vst.msk [vmem:[#allocation2 + $0x1f8] sm:$0xff] %vm564_vm0, %v563_v35 }
  0x6b   :  { %667 = shalt.err (!%p664_p4)
}
  0x6c   :  { %s679_s26 = smov 128   ;;  %s680_s27 = smov 8  }
  0x6d   :  { %640 = dma.vmem_to_hbm [thread:$0]  %s635_s3, 8192, %s1433_s6, [#allocation3], %s679_s26, %s679_s26, %s680_s27  }
  0x6e   :  { %676 = dma.done.wait [#allocation3], 8192  }
  0x6f   :  { %677 = vsyncadd [#allocation3], 4294959104 }
  0x70   :  { %644 = vsyncpa [#allocation3], 1 }

// kernel: basic_block_forward.4
= control target key start
LH: loop header
LB: loop body
LE: loop exit
PB: predicated region body
PF: predicated region fallthrough
CT: control target
= control target key end

     0   :  { %v2297_v0 = vmov 0   ;;  %vm774_vm0 = vcmask 261120   ;;  %vm19_vm1 = vcmask 253952   ;;  %s3429_s1 = inlined_call_operand.vmem [shape: bf16[288,32], index: 1, kind: input, shape index: {}]   ;;  %s3430_s0 = inlined_call_operand.vmem [shape: bf16[512,288], index: 0, kind: input, shape index: {}]   ;;  %s3431_s2 = inlined_call_operand.vmem [shape: f32[512,32], index: 2, kind: output, shape index: {0}]   ;;  %s3432_s3 = inlined_call_operand.vmem [shape: f32[1,32], index: 3, kind: output, shape index: {1}]   ;;  %s3433_s4 = inlined_call_operand.vmem [shape: f32[1,32], index: 4, kind: output, shape index: {2}]  }
   0x1   :  { %871 = vmatprep.subr.bf16.mxu0 %v2297_v0  ;;  %2117 = vmatprep.subr.bf16.mxu1 %v2297_v0  ;;  %v2151_v1 = vld [vmem:[%s3429_s1 + $0x38] sm:$0xff]   ;;  %v2152_v2 = vld [vmem:[%s3429_s1 + $0x30] sm:$0xff]   ;;  %v2153_v3 = vld [vmem:[%s3429_s1 + $0x28] sm:$0xff]  }
   0x2   :  { %872 = vmatpush1.bf16.msra.mxu0 %v2151_v1  ;;  %2133 = vmatpush1.bf16.msra.mxu1 %v2151_v1  ;;  %v2154_v4 = vld [vmem:[%s3429_s1 + $0x20] sm:$0xff]   ;;  %v2155_v5 = vld [vmem:[%s3429_s1 + $0x18] sm:$0xff]   ;;  %v2156_v7 = vld [vmem:[%s3429_s1 + $0x10] sm:$0xff]  }
   0x3   :  { %873 = vmatprep.subr.bf16.mxu0 %v2297_v0  ;;  %2118 = vmatprep.subr.bf16.mxu1 %v2297_v0  ;;  %v2169_v6 = vld [vmem:[%s3430_s0 + $0x4] ss:$12 sps:$4 sm:$0xff]   ;;  %v2157_v9 = vld [vmem:[%s3429_s1 + $0x8] sm:$0xff]   ;;  %v2159_v11 = vld [vmem:[%s3429_s1 + $0x78] sm:$0xff]  }
   0x4   :  { %v2172_v8 = vld [vmem:[%s3430_s0 + $0x244] ss:$12 sps:$4 sm:$0xff]   ;;  %903 = vmatprep.mubr.bf16.mxu0 %v2169_v6  ;;  %v2161_v13 = vld [vmem:[%s3429_s1 + $0x68] sm:$0xff]   ;;  %v2163_v15 = vld [vmem:[%s3429_s1 + $0x58] sm:$0xff]  }
   0x5   :  { %1095 = vmatprep.mubr.bf16.mxu1 %v2172_v8  ;;  %v2158_v10 = vld [vmem:[%s3429_s1] sm:$0xff]   ;;  %v2160_v12 = vld [vmem:[%s3429_s1 + $0x70] sm:$0xff]   ;;  %v2165_v17 = vld [vmem:[%s3429_s1 + $0x48] sm:$0xff]  }
   0x6   :  { %874 = vmatpush1.bf16.msra.mxu0 %v2152_v2  ;;  %2134 = vmatpush1.bf16.msra.mxu1 %v2152_v2  ;;  %v2162_v14 = vld [vmem:[%s3429_s1 + $0x60] sm:$0xff]   ;;  %v2164_v16 = vld [vmem:[%s3429_s1 + $0x50] sm:$0xff]   ;;  %v2191_v19 = vld [vmem:[%s3429_s1 + $0x88] sm:$0xff]  }
   0x7   :  { %875 = vmatprep.subr.bf16.mxu0 %v2297_v0  ;;  %2119 = vmatprep.subr.bf16.mxu1 %v2297_v0  ;;  %v2166_v18 = vld [vmem:[%s3429_s1 + $0x40] sm:$0xff]   ;;  %v2173_v22 = vld [vmem:[%s3430_s0 + $0x1c] ss:$12 sps:$4 sm:$0xff]   ;;  %v2185_v31 = vld [vmem:[%s3430_s0 + $0x4c] ss:$12 sps:$4 sm:$0xff]  }
   0x8   :  { %v2167_v20 = vld [vmem:[%s3430_s0] ss:$12 sps:$4 sm:$0xff]   ;;  %v2175_v23 = vld [vmem:[%s3430_s0 + $0x25c] ss:$12 sps:$4 sm:$0xff]   ;;  %v2177_v25 = vld [vmem:[%s3430_s0 + $0x18] ss:$12 sps:$4 sm:$0xff]  }
   0x9   :  { %v2170_v21 = vld [vmem:[%s3430_s0 + $0x240] ss:$12 sps:$4 sm:$0xff]   ;;  %v2178_v26 = vld [vmem:[%s3430_s0 + $0x258] ss:$12 sps:$4 sm:$0xff]   ;;  %v2183_v29 = vld [vmem:[%s3430_s0 + $0x30] ss:$12 sps:$4 sm:$0xff]  }
   0xa   :  { %876 = vmatpush1.bf16.msra.mxu0 %v2153_v3  ;;  %2135 = vmatpush1.bf16.msra.mxu1 %v2153_v3  ;;  %v2216_v24 = vld [vmem:[%s3429_s1 + $0x80] sm:$0xff]   ;;  %v2184_v30 = vld [vmem:[%s3430_s0 + $0x270] ss:$12 sps:$4 sm:$0xff]   ;;  %v2187_v32 = vld [vmem:[%s3430_s0 + $0x28c] ss:$12 sps:$4 sm:$0xff]  }
   0xb   :  { %877 = vmatprep.subr.bf16.mxu0 %v2297_v0  ;;  %2120 = vmatprep.subr.bf16.mxu1 %v2297_v0  ;;  %v2179_v27 = vld [vmem:[%s3430_s0 + $0x34] ss:$12 sps:$4 sm:$0xff]   ;;  %v2192_v35 = vld [vmem:[%s3430_s0 + $0x64] ss:$12 sps:$4 sm:$0xff]   ;;  %v2198_v39 = vld [vmem:[%s3430_s0 + $0x7c] ss:$12 sps:$4 sm:$0xff]  }
   0xc   :  { %v2181_v28 = vld [vmem:[%s3430_s0 + $0x274] ss:$12 sps:$4 sm:$0xff]   ;;  %v2194_v36 = vld [vmem:[%s3430_s0 + $0x2a4] ss:$12 sps:$4 sm:$0xff]   ;;  %v2200_v40 = vld [vmem:[%s3430_s0 + $0x2bc] ss:$12 sps:$4 sm:$0xff]  }
   0xd   :  { %v2189_v33 = vld [vmem:[%s3430_s0 + $0x48] ss:$12 sps:$4 sm:$0xff]   ;;  %v2196_v37 = vld [vmem:[%s3430_s0 + $0x60] ss:$12 sps:$4 sm:$0xff]   ;;  %v2202_v41 = vld [vmem:[%s3430_s0 + $0x78] ss:$12 sps:$4 sm:$0xff]  }
   0xe   :  { %878 = vmatpush1.bf16.msra.mxu0 %v2154_v4  ;;  %2136 = vmatpush1.bf16.msra.mxu1 %v2154_v4  ;;  %v2190_v34 = vld [vmem:[%s3430_s0 + $0x288] ss:$12 sps:$4 sm:$0xff]   ;;  %v2197_v38 = vld [vmem:[%s3430_s0 + $0x2a0] ss:$12 sps:$4 sm:$0xff]   ;;  %v2203_v42 = vld [vmem:[%s3430_s0 + $0x2b8] ss:$12 sps:$4 sm:$0xff]  }
   0xf   :  { %879 = vmatprep.subr.bf16.mxu0 %v2297_v0  ;;  %2121 = vmatprep.subr.bf16.mxu1 %v2297_v0  ;;  %v2204_v43 = vld [vmem:[%s3430_s0 + $0x94] ss:$12 sps:$4 sm:$0xff]   ;;  %v2208_v45 = vld [vmem:[%s3430_s0 + $0x90] ss:$12 sps:$4 sm:$0xff]   ;;  %v2210_v47 = vld [vmem:[%s3430_s0 + $0xac] ss:$12 sps:$4 sm:$0xff]  }
  0x10   :  { %v2206_v44 = vld [vmem:[%s3430_s0 + $0x2d4] ss:$12 sps:$4 sm:$0xff]   ;;  %v2209_v46 = vld [vmem:[%s3430_s0 + $0x2d0] ss:$12 sps:$4 sm:$0xff]   ;;  %v2212_v48 = vld [vmem:[%s3430_s0 + $0x2ec] ss:$12 sps:$4 sm:$0xff]  }
  0x11   :  { %v2214_v49 = vld [vmem:[%s3430_s0 + $0xa8] ss:$12 sps:$4 sm:$0xff]   ;;  %v2217_v51 = vld [vmem:[%s3430_s0 + $0xc4] ss:$12 sps:$4 sm:$0xff]   ;;  %v2220_v53 = vld [vmem:[%s3430_s0 + $0xc0] ss:$12 sps:$4 sm:$0xff]  }
  0x12   :  { %880 = vmatpush1.bf16.msra.mxu0 %v2155_v5  ;;  %2137 = vmatpush1.bf16.msra.mxu1 %v2155_v5  ;;  %v2215_v50 = vld [vmem:[%s3430_s0 + $0x2e8] ss:$12 sps:$4 sm:$0xff]   ;;  %v2221_v54 = vld [vmem:[%s3430_s0 + $0x20] ss:$12 sps:$4 sm:$0xff]   ;;  %v2224_v56 = vld [vmem:[%s3430_s0 + $0x38] ss:$12 sps:$4 sm:$0xff]  }
  0x13   :  { %881 = vmatprep.subr.bf16.mxu0 %v2297_v0  ;;  %2122 = vmatprep.subr.bf16.mxu1 %v2297_v0  ;;  %v2219_v52 = vld [vmem:[%s3430_s0 + $0x8] ss:$12 sps:$4 sm:$0xff]   ;;  %v2225_v57 = vld [vmem:[%s3430_s0 + $0xd8] ss:$12 sps:$4 sm:$0xff]   ;;  %v2226_v58 = vld [vmem:[%s3430_s0 + $0x50] ss:$12 sps:$4 sm:$0xff]  }
  0x14   :  { %v2222_v55 = vld [vmem:[%s3430_s0 + $0xdc] ss:$12 sps:$4 sm:$0xff]   ;;  %v2227_v59 = vld [vmem:[%s3430_s0 + $0xf4] ss:$12 sps:$4 sm:$0xff]   ;;  %v2232_v63 = vld [vmem:[%s3430_s0 + $0x10c] ss:$12 sps:$4 sm:$0xff]  }
  0x15   :  { %v2229_v60 = vld [vmem:[%s3430_s0 + $0x68] ss:$12 sps:$4 sm:$0xff]   ;;  %v2230_v61 = vld [vmem:[%s3430_s0 + $0xf0] ss:$12 sps:$4 sm:$0xff]   ;;  %v2231_v62 = vld [vmem:[%s3430_s0 + $0x80] ss:$12 sps:$4 sm:$0xff]  }
  0x16   :  { %882 = vmatpush1.bf16.msra.mxu0 %v2156_v7  ;;  %2138 = vmatpush1.bf16.msra.mxu1 %v2156_v7  ;;  %v2235_v1 = vld [vmem:[%s3430_s0 + $0x108] ss:$12 sps:$4 sm:$0xff]   ;;  %v2236_v2 = vld [vmem:[%s3430_s0 + $0xb0] ss:$12 sps:$4 sm:$0xff]   ;;  %v2240_v5 = vld [vmem:[%s3430_s0 + $0x120] ss:$12 sps:$4 sm:$0xff]  }
  0x17   :  { %883 = vmatprep.subr.bf16.mxu0 %v2297_v0  ;;  %2123 = vmatprep.subr.bf16.mxu1 %v2297_v0  ;;  %v2237_v3 = vld [vmem:[%s3430_s0 + $0x124] ss:$12 sps:$4 sm:$0xff]   ;;  %v2239_v4 = vld [vmem:[%s3430_s0 + $0xc8] ss:$12 sps:$4 sm:$0xff]   ;;  %v2241_v6 = vld [vmem:[%s3430_s0 + $0xe0] ss:$12 sps:$4 sm:$0xff]  }
  0x18   :  { %v2242_v7 = vld [vmem:[%s3430_s0 + $0x13c] ss:$12 sps:$4 sm:$0xff]   ;;  %v2244_v8 = vld [vmem:[%s3430_s0 + $0xf8] ss:$12 sps:$4 sm:$0xff]  }
  0x1a   :  { %884 = vmatpush1.bf16.msra.mxu0 %v2157_v9  ;;  %2139 = vmatpush1.bf16.msra.mxu1 %v2157_v9  ;;  %v2245_v9 = vld [vmem:[%s3430_s0 + $0x138] ss:$12 sps:$4 sm:$0xff]  }
  0x1b   :  { %885 = vmatprep.subr.bf16.mxu0 %v2297_v0  ;;  %2124 = vmatprep.subr.bf16.mxu1 %v2297_v0 }
  0x1e   :  { %886 = vmatpush1.bf16.msra.mxu0 %v2158_v10  ;;  %2140 = vmatpush1.bf16.msra.mxu1 %v2158_v10  ;;  %v2246_v10 = vld [vmem:[%s3430_s0 + $0x110] ss:$12 sps:$4 sm:$0xff]  }
  0x1f   :  { %887 = vmatprep.subr.bf16.mxu0 %v2297_v0  ;;  %2125 = vmatprep.subr.bf16.mxu1 %v2297_v0 }
  0x22   :  { %888 = vmatpush2.bf16.msra.mxu0 %v2159_v11  ;;  %2141 = vmatpush2.bf16.msra.mxu1 %v2159_v11  ;;  %v2247_v11 = vld [vmem:[%s3430_s0 + $0x154] ss:$12 sps:$4 sm:$0xff]  }
  0x23   :  { %889 = vmatprep.subr.bf16.mxu0 %v2297_v0  ;;  %2126 = vmatprep.subr.bf16.mxu1 %v2297_v0 }
  0x26   :  { %890 = vmatpush2.bf16.msra.mxu0 %v2160_v12  ;;  %2142 = vmatpush2.bf16.msra.mxu1 %v2160_v12  ;;  %v2249_v12 = vld [vmem:[%s3430_s0 + $0x128] ss:$12 sps:$4 sm:$0xff]  }
  0x27   :  { %891 = vmatprep.subr.bf16.mxu0 %v2297_v0  ;;  %2127 = vmatprep.subr.bf16.mxu1 %v2297_v0 }
  0x2a   :  { %892 = vmatpush2.bf16.msra.mxu0 %v2161_v13  ;;  %2143 = vmatpush2.bf16.msra.mxu1 %v2161_v13  ;;  %v2250_v13 = vld [vmem:[%s3430_s0 + $0x150] ss:$12 sps:$4 sm:$0xff]  }
  0x2b   :  { %893 = vmatprep.subr.bf16.mxu0 %v2297_v0  ;;  %2128 = vmatprep.subr.bf16.mxu1 %v2297_v0 }
  0x2e   :  { %894 = vmatpush2.bf16.msra.mxu0 %v2162_v14  ;;  %2144 = vmatpush2.bf16.msra.mxu1 %v2162_v14  ;;  %v2251_v14 = vld [vmem:[%s3430_s0 + $0x140] ss:$12 sps:$4 sm:$0xff]  }
  0x2f   :  { %895 = vmatprep.subr.bf16.mxu0 %v2297_v0  ;;  %2129 = vmatprep.subr.bf16.mxu1 %v2297_v0 }
  0x32   :  { %896 = vmatpush2.bf16.msra.mxu0 %v2163_v15  ;;  %2145 = vmatpush2.bf16.msra.mxu1 %v2163_v15  ;;  %v2252_v15 = vld [vmem:[%s3430_s0 + $0x16c] ss:$12 sps:$4 sm:$0xff]  }
  0x33   :  { %897 = vmatprep.subr.bf16.mxu0 %v2297_v0  ;;  %2130 = vmatprep.subr.bf16.mxu1 %v2297_v0 }
  0x36   :  { %898 = vmatpush2.bf16.msra.mxu0 %v2164_v16  ;;  %2146 = vmatpush2.bf16.msra.mxu1 %v2164_v16  ;;  %v2254_v16 = vld [vmem:[%s3430_s0 + $0x158] ss:$12 sps:$4 sm:$0xff]  }
  0x37   :  { %899 = vmatprep.subr.bf16.mxu0 %v2297_v0  ;;  %2131 = vmatprep.subr.bf16.mxu1 %v2297_v0 }
  0x3a   :  { %900 = vmatpush2.bf16.msra.mxu0 %v2165_v17  ;;  %2147 = vmatpush2.bf16.msra.mxu1 %v2165_v17  ;;  %v2255_v17 = vld [vmem:[%s3430_s0 + $0x168] ss:$12 sps:$4 sm:$0xff]  }
  0x3b   :  { %901 = vmatprep.subr.bf16.mxu0 %v2297_v0  ;;  %2132 = vmatprep.subr.bf16.mxu1 %v2297_v0  ;;  %v2234_v0 = vld [vmem:[%s3430_s0 + $0x98] ss:$12 sps:$4 sm:$0xff]  }
  0x3e   :  { %902 = vmatpush2.bf16.msra.mxu0 %v2166_v18  ;;  %2148 = vmatpush2.bf16.msra.mxu1 %v2166_v18  ;;  %v2256_v18 = vld [vmem:[%s3430_s0 + $0x170] ss:$12 sps:$4 sm:$0xff]  }
  0x3f   :  { %2049 = vmatprep.subr.bf16.mxu1 %v2191_v19 }
  0x41   :  { %904 = vmatmul.mubr.bf16.vlgmr.msra.gmra.mxu0 %v2167_v20  ;;  %1096 = vmatmul.mubr.bf16.vlgmr.msra.gmra.mxu1 %v2170_v21  ;;  %v2259_v20 = vld [vmem:[%s3430_s0 + $0x188] ss:$12 sps:$4 sm:$0xff]   ;;  %v2260_v21 = vld [vmem:[%s3430_s0 + $0x180] ss:$12 sps:$4 sm:$0xff]  }
  0x42   :  { %911 = vmatprep.mubr.bf16.mxu0 %v2173_v22  ;;  %1103 = vmatprep.mubr.bf16.mxu1 %v2175_v23  ;;  %v2261_v22 = vld [vmem:[%s3430_s0 + $0x1a0] ss:$12 sps:$4 sm:$0xff]   ;;  %v2262_v23 = vld [vmem:[%s3430_s0 + $0x19c] ss:$12 sps:$4 sm:$0xff]  }
  0x43   :  { %2050 = vmatpush3.bf16.msra.mxu1 %v2191_v19  ;;  %v2257_v19 = vld [vmem:[%s3430_s0 + $0x184] ss:$12 sps:$4 sm:$0xff]  }
  0x44   :  { %2051 = vmatprep.subr.bf16.mxu1 %v2216_v24 }
  0x47   :  { %2052 = vmatpush3.bf16.msra.mxu1 %v2216_v24  ;;  %v2264_v24 = vld [vmem:[%s3430_s0 + $0x1b8] ss:$12 sps:$4 sm:$0xff]  }
  0x49   :  { %912 = vmatmul.mubr.bf16.gmra.mxu0 %v2177_v25  ;;  %1104 = vmatmul.mubr.bf16.gmra.mxu1 %v2178_v26  ;;  %v2265_v25 = vld [vmem:[%s3430_s0 + $0x198] ss:$12 sps:$4 sm:$0xff]   ;;  %v2266_v26 = vld [vmem:[%s3430_s0 + $0x1d0] ss:$12 sps:$4 sm:$0xff]  }
  0x4a   :  { %919 = vmatprep.mubr.bf16.mxu0 %v2179_v27  ;;  %1111 = vmatprep.mubr.bf16.mxu1 %v2181_v28  ;;  %v2267_v27 = vld [vmem:[%s3430_s0 + $0x1b4] ss:$12 sps:$4 sm:$0xff]  }
  0x4b   :  { %v2269_v28 = vld [vmem:[%s3430_s0 + $0x1e8] ss:$12 sps:$4 sm:$0xff]  }
  0x51   :  { %920 = vmatmul.mubr.bf16.gmra.mxu0 %v2183_v29  ;;  %1112 = vmatmul.mubr.bf16.gmra.mxu1 %v2184_v30  ;;  %v2270_v29 = vld [vmem:[%s3430_s0 + $0x1b0] ss:$12 sps:$4 sm:$0xff]   ;;  %v2271_v30 = vld [vmem:[%s3430_s0 + $0x200] ss:$12 sps:$4 sm:$0xff]  }
  0x52   :  { %927 = vmatprep.mubr.bf16.mxu0 %v2185_v31  ;;  %1119 = vmatprep.mubr.bf16.mxu1 %v2187_v32  ;;  %v2272_v31 = vld [vmem:[%s3430_s0 + $0x1cc] ss:$12 sps:$4 sm:$0xff]  }
  0x53   :  { %v2274_v32 = vld [vmem:[%s3430_s0 + $0x218] ss:$12 sps:$4 sm:$0xff]  }
  0x59   :  { %928 = vmatmul.mubr.bf16.gmra.mxu0 %v2189_v33  ;;  %1120 = vmatmul.mubr.bf16.gmra.mxu1 %v2190_v34  ;;  %v2275_v33 = vld [vmem:[%s3430_s0 + $0x1c8] ss:$12 sps:$4 sm:$0xff]   ;;  %v2276_v34 = vld [vmem:[%s3430_s0 + $0x230] ss:$12 sps:$4 sm:$0xff]  }
  0x5a   :  { %935 = vmatprep.mubr.bf16.mxu0 %v2192_v35  ;;  %1127 = vmatprep.mubr.bf16.mxu1 %v2194_v36  ;;  %v2277_v35 = vld [vmem:[%s3430_s0 + $0x1e4] ss:$12 sps:$4 sm:$0xff]   ;;  %v2279_v36 = vld [vmem:[%s3430_s0 + $0x248] ss:$12 sps:$4 sm:$0xff]  }
  0x61   :  { %936 = vmatmul.mubr.bf16.gmra.mxu0 %v2196_v37  ;;  %1128 = vmatmul.mubr.bf16.gmra.mxu1 %v2197_v38  ;;  %v2280_v37 = vld [vmem:[%s3430_s0 + $0x1e0] ss:$12 sps:$4 sm:$0xff]  }
  0x62   :  { %943 = vmatprep.mubr.bf16.mxu0 %v2198_v39  ;;  %1135 = vmatprep.mubr.bf16.mxu1 %v2200_v40  ;;  %v2281_v38 = vld [vmem:[%s3430_s0 + $0x260] ss:$12 sps:$4 sm:$0xff]   ;;  %v2282_v39 = vld [vmem:[%s3430_s0 + $0x1fc] ss:$12 sps:$4 sm:$0xff]   ;;  %v2284_v40 = vld [vmem:[%s3430_s0 + $0x278] ss:$12 sps:$4 sm:$0xff]  }
  0x69   :  { %944 = vmatmul.mubr.bf16.gmra.mxu0 %v2202_v41  ;;  %1136 = vmatmul.mubr.bf16.gmra.mxu1 %v2203_v42  ;;  %v2285_v41 = vld [vmem:[%s3430_s0 + $0x1f8] ss:$12 sps:$4 sm:$0xff]   ;;  %v2286_v42 = vld [vmem:[%s3430_s0 + $0x290] ss:$12 sps:$4 sm:$0xff]  }
  0x6a   :  { %951 = vmatprep.mubr.bf16.mxu0 %v2204_v43  ;;  %1143 = vmatprep.mubr.bf16.mxu1 %v2206_v44  ;;  %v2287_v43 = vld [vmem:[%s3430_s0 + $0x214] ss:$12 sps:$4 sm:$0xff]  }
  0x6b   :  { %v2289_v44 = vld [vmem:[%s3430_s0 + $0x2a8] ss:$12 sps:$4 sm:$0xff]  }
  0x71   :  { %952 = vmatmul.mubr.bf16.gmra.mxu0 %v2208_v45  ;;  %1144 = vmatmul.mubr.bf16.gmra.mxu1 %v2209_v46  ;;  %v2290_v45 = vld [vmem:[%s3430_s0 + $0x210] ss:$12 sps:$4 sm:$0xff]   ;;  %v2291_v46 = vld [vmem:[%s3430_s0 + $0x2c0] ss:$12 sps:$4 sm:$0xff]  }
  0x72   :  { %959 = vmatprep.mubr.bf16.mxu0 %v2210_v47  ;;  %1151 = vmatprep.mubr.bf16.mxu1 %v2212_v48  ;;  %v2292_v47 = vld [vmem:[%s3430_s0 + $0x22c] ss:$12 sps:$4 sm:$0xff]  }
  0x73   :  { %v2294_v48 = vld [vmem:[%s3430_s0 + $0x2d8] ss:$12 sps:$4 sm:$0xff]  }
  0x79   :  { %960 = vmatmul.mubr.bf16.gmra.mxu0 %v2214_v49  ;;  %1152 = vmatmul.mubr.bf16.gmra.mxu1 %v2215_v50  ;;  %v2295_v49 = vld [vmem:[%s3430_s0 + $0x228] ss:$12 sps:$4 sm:$0xff]   ;;  %v2296_v50 = vld [vmem:[%s3430_s0 + $0x2f0] ss:$12 sps:$4 sm:$0xff]  }
  0x7a   :  { %967 = vmatprep.mubr.bf16.mxu0 %v2217_v51  ;;  %2053 = vmatprep.mubr.msk.bf16.mxu1 %vm774_vm0, %v2219_v52 }
  0x81   :  { %968 = vmatmul.mubr.bf16.gmra.mxu0 %v2220_v53  ;;  %2054 = vmatmul.mubr.msk.bf16.vlgmr.msra.gmra.mxu1 %vm774_vm0, %v2221_v54 }
  0x82   :  { %975 = vmatprep.mubr.bf16.mxu0 %v2222_v55  ;;  %2057 = vmatprep.mubr.msk.bf16.mxu1 %vm774_vm0, %v2224_v56 }
  0x89   :  { %976 = vmatmul.mubr.bf16.gmra.mxu0 %v2225_v57  ;;  %2058 = vmatmul.mubr.msk.bf16.gmra.mxu1 %vm774_vm0, %v2226_v58 }
  0x8a   :  { %983 = vmatprep.mubr.bf16.mxu0 %v2227_v59  ;;  %2061 = vmatprep.mubr.msk.bf16.mxu1 %vm774_vm0, %v2229_v60 }
  0x91   :  { %984 = vmatmul.mubr.bf16.gmra.mxu0 %v2230_v61  ;;  %2062 = vmatmul.mubr.msk.bf16.gmra.mxu1 %vm774_vm0, %v2231_v62 }
  0x92   :  { %991 = vmatprep.mubr.bf16.mxu0 %v2232_v63  ;;  %2065 = vmatprep.mubr.msk.bf16.mxu1 %vm774_vm0, %v2234_v0 }
  0x99   :  { %992 = vmatmul.mubr.bf16.gmra.mxu0 %v2235_v1  ;;  %2066 = vmatmul.mubr.msk.bf16.gmra.mxu1 %vm774_vm0, %v2236_v2 }
  0x9a   :  { %999 = vmatprep.mubr.bf16.mxu0 %v2237_v3  ;;  %2069 = vmatprep.mubr.msk.bf16.mxu1 %vm774_vm0, %v2239_v4 }
  0xa1   :  { %1000 = vmatmul.mubr.bf16.gmra.mxu0 %v2240_v5  ;;  %2070 = vmatmul.mubr.msk.bf16.gmra.mxu1 %vm774_vm0, %v2241_v6 }
  0xa2   :  { %1007 = vmatprep.mubr.bf16.mxu0 %v2242_v7  ;;  %2073 = vmatprep.mubr.msk.bf16.mxu1 %vm774_vm0, %v2244_v8 }
  0xa9   :  { %1008 = vmatmul.mubr.bf16.gmra.mxu0 %v2245_v9  ;;  %2074 = vmatmul.mubr.msk.bf16.gmra.mxu1 %vm774_vm0, %v2246_v10 }
  0xaa   :  { %1015 = vmatprep.mubr.bf16.mxu0 %v2247_v11  ;;  %2077 = vmatprep.mubr.msk.bf16.mxu1 %vm774_vm0, %v2249_v12 }
  0xb1   :  { %1016 = vmatmul.mubr.bf16.gmra.mxu0 %v2250_v13  ;;  %2078 = vmatmul.mubr.msk.bf16.gmra.mxu1 %vm774_vm0, %v2251_v14 }
  0xb2   :  { %1023 = vmatprep.mubr.bf16.mxu0 %v2252_v15  ;;  %2081 = vmatprep.mubr.msk.bf16.mxu1 %vm774_vm0, %v2254_v16 }
  0xb9   :  { %1024 = vmatmul.mubr.bf16.gmra.mxu0 %v2255_v17  ;;  %2082 = vmatmul.mubr.msk.bf16.gmra.mxu1 %vm774_vm0, %v2256_v18 }
  0xba   :  { %1031 = vmatprep.mubr.bf16.mxu0 %v2257_v19  ;;  %2085 = vmatprep.mubr.msk.bf16.mxu1 %vm774_vm0, %v2259_v20 }
  0xc1   :  { %1032 = vmatmul.mubr.bf16.gmra.mxu0 %v2260_v21  ;;  %2086 = vmatmul.mubr.msk.bf16.gmra.mxu1 %vm774_vm0, %v2261_v22 }
  0xc2   :  { %1039 = vmatprep.mubr.bf16.mxu0 %v2262_v23  ;;  %2089 = vmatprep.mubr.msk.bf16.mxu1 %vm774_vm0, %v2264_v24 }
  0xc9   :  { %1040 = vmatmul.mubr.bf16.gmra.mxu0 %v2265_v25  ;;  %2090 = vmatmul.mubr.msk.bf16.gmra.mxu1 %vm774_vm0, %v2266_v26 }
  0xca   :  { %1047 = vmatprep.mubr.bf16.mxu0 %v2267_v27  ;;  %2093 = vmatprep.mubr.msk.bf16.mxu1 %vm774_vm0, %v2269_v28 }
  0xd1   :  { %1048 = vmatmul.mubr.bf16.gmra.mxu0 %v2270_v29  ;;  %2094 = vmatmul.mubr.msk.bf16.gmra.mxu1 %vm774_vm0, %v2271_v30 }
  0xd2   :  { %1055 = vmatprep.mubr.bf16.mxu0 %v2272_v31  ;;  %2097 = vmatprep.mubr.msk.bf16.mxu1 %vm774_vm0, %v2274_v32 }
  0xd9   :  { %1056 = vmatmul.mubr.bf16.gmra.mxu0 %v2275_v33  ;;  %2098 = vmatmul.mubr.msk.bf16.gmra.mxu1 %vm774_vm0, %v2276_v34 }
  0xda   :  { %1063 = vmatprep.mubr.bf16.mxu0 %v2277_v35  ;;  %2101 = vmatprep.mubr.msk.bf16.mxu1 %vm774_vm0, %v2279_v36 }
  0xe1   :  { %1064 = vmatmul.mubr.bf16.gmra.mxu0 %v2280_v37  ;;  %2102 = vmatmul.mubr.msk.bf16.gmra.mxu1 %vm774_vm0, %v2281_v38 }
  0xe2   :  { %1071 = vmatprep.mubr.bf16.mxu0 %v2282_v39  ;;  %2105 = vmatprep.mubr.msk.bf16.mxu1 %vm774_vm0, %v2284_v40 }
  0xe9   :  { %1072 = vmatmul.mubr.bf16.gmra.mxu0 %v2285_v41  ;;  %2106 = vmatmul.mubr.msk.bf16.gmra.mxu1 %vm774_vm0, %v2286_v42 }
  0xea   :  { %1079 = vmatprep.mubr.bf16.mxu0 %v2287_v43  ;;  %2109 = vmatprep.mubr.msk.bf16.mxu1 %vm774_vm0, %v2289_v44 }
  0xf1   :  { %1080 = vmatmul.mubr.bf16.gmra.mxu0 %v2290_v45  ;;  %2110 = vmatmul.mubr.msk.bf16.gmra.mxu1 %vm774_vm0, %v2291_v46 }
  0xf2   :  { %1087 = vmatprep.mubr.bf16.mxu0 %v2292_v47  ;;  %2113 = vmatprep.mubr.msk.bf16.mxu1 %vm774_vm0, %v2294_v48 }
  0xf9   :  { %1088 = vmatmul.mubr.bf16.gmra.mxu0 %v2295_v49  ;;  %2114 = vmatmul.mubr.msk.bf16.gmra.mxu1 %vm774_vm0, %v2296_v50 }
 0x101   :  { %v2730_v51 = vpop.f32.mrf.mxu0  ;;  %v2732_v52 = vpop.f32.mrf.mxu1 }
 0x103   :  { %v907_v53 = vpop.f32.mrf.mxu0  ;;  %v1099_v54 = vpop.f32.mrf.mxu1 }
 0x105   :  { %v2734_v55 = vpop.f32.mrf.mxu0  ;;  %v2736_v56 = vpop.f32.mrf.mxu1 }
 0x107   :  { %v910_v57 = vpop.f32.mrf.mxu0  ;;  %v1102_v58 = vpop.f32.mrf.mxu1 }
 0x109   :  { %v913_v59 = vpop.f32.mrf.mxu0  ;;  %v2738_v60 = vpop.f32.mrf.mxu1 }
 0x10b   :  { %v915_v61 = vpop.f32.mrf.mxu0  ;;  %v1107_v62 = vpop.f32.mrf.mxu1 }
 0x10d   :  { %v2740_v63 = vpop.f32.mrf.mxu0  ;;  %v2742_v0 = vpop.f32.mrf.mxu1 }
 0x10f   :  { %v918_v1 = vpop.f32.mrf.mxu0  ;;  %v1110_v2 = vpop.f32.mrf.mxu1 }
 0x111   :  { %v2744_v3 = vpop.f32.mrf.mxu0  ;;  %v2746_v4 = vpop.f32.mrf.mxu1 }
 0x113   :  { %v923_v5 = vpop.f32.mrf.mxu0  ;;  %v1115_v6 = vpop.f32.mrf.mxu1 }
 0x115   :  { %v2748_v7 = vpop.f32.mrf.mxu0  ;;  %v2750_v8 = vpop.f32.mrf.mxu1 }
 0x117   :  { %v926_v9 = vpop.f32.mrf.mxu0  ;;  %v1118_v10 = vpop.f32.mrf.mxu1 }
 0x119   :  { %v2752_v11 = vpop.f32.mrf.mxu0  ;;  %v2754_v12 = vpop.f32.mrf.mxu1 }
 0x11b   :  { %v931_v13 = vpop.f32.mrf.mxu0  ;;  %v1123_v14 = vpop.f32.mrf.mxu1 }
 0x11d   :  { %v2756_v15 = vpop.f32.mrf.mxu0  ;;  %v2758_v16 = vpop.f32.mrf.mxu1 }
 0x11f   :  { %v934_v17 = vpop.f32.mrf.mxu0  ;;  %v1126_v18 = vpop.f32.mrf.mxu1 }
 0x121   :  { %v2760_v19 = vpop.f32.mrf.mxu0  ;;  %v2762_v20 = vpop.f32.mrf.mxu1 }
 0x123   :  { %v939_v21 = vpop.f32.mrf.mxu0  ;;  %v1131_v22 = vpop.f32.mrf.mxu1 }
 0x125   :  { %v2764_v23 = vpop.f32.mrf.mxu0  ;;  %v2766_v24 = vpop.f32.mrf.mxu1 }
 0x127   :  { %v942_v25 = vpop.f32.mrf.mxu0  ;;  %v1134_v26 = vpop.f32.mrf.mxu1 }
 0x129   :  { %v2768_v27 = vpop.f32.mrf.mxu0  ;;  %v2770_v28 = vpop.f32.mrf.mxu1 }
 0x12b   :  { %v947_v29 = vpop.f32.mrf.mxu0  ;;  %v1139_v30 = vpop.f32.mrf.mxu1 }
 0x12d   :  { %v2772_v31 = vpop.f32.mrf.mxu0  ;;  %v2774_v32 = vpop.f32.mrf.mxu1 }
 0x12f   :  { %v950_v33 = vpop.f32.mrf.mxu0  ;;  %v1142_v34 = vpop.f32.mrf.mxu1 }
 0x131   :  { %v2776_v35 = vpop.f32.mrf.mxu0  ;;  %v2778_v36 = vpop.f32.mrf.mxu1 }
 0x133   :  { %v955_v37 = vpop.f32.mrf.mxu0  ;;  %v1147_v38 = vpop.f32.mrf.mxu1 }
 0x135   :  { %v2780_v39 = vpop.f32.mrf.mxu0  ;;  %v2782_v40 = vpop.f32.mrf.mxu1 }
 0x137   :  { %v958_v41 = vpop.f32.mrf.mxu0  ;;  %v1150_v42 = vpop.f32.mrf.mxu1 }
 0x139   :  { %v2784_v43 = vpop.f32.mrf.mxu0  ;;  %v2786_v44 = vpop.f32.mrf.mxu1 }
 0x13b   :  { %v963_v45 = vpop.f32.mrf.mxu0  ;;  %v1155_v46 = vpop.f32.mrf.mxu1 }
 0x13d   :  { %v2788_v47 = vpop.f32.mrf.mxu0  ;;  %v2790_v48 = vpop.f32.mrf.mxu1 }
 0x13f   :  { %v966_v49 = vpop.f32.mrf.mxu0  ;;  %v1158_v50 = vpop.f32.mrf.mxu1 }
 0x141   :  { %v2792_v53 = vpop.f32.mrf.mxu0  ;;  %v2055_v54 = vpop.f32.mrf.mxu1 }
 0x142   :  { %v1203_v57 = vadd.f32 %v2055_v54, %v913_v59 }
 0x143   :  { %v971_v58 = vpop.f32.mrf.mxu0  ;;  %v1194_v61 = vpop.f32.mrf.mxu1 }
 0x144   :  { %1451 = vst.msk [vmem:[%s3431_s2 + $0x10] sm:$0xff] %vm774_vm0, %v1203_v57  ;;  %v1195_v62 = vadd.f32 %v1194_v61, %v2730_v51  ;;  %v1653_v10 = vmul.f32 %v1203_v57, %v1203_v57  ;;  %v1517_v22 = vsel %vm774_vm0, %v1203_v57, 0.0 }
 0x145   :  { %v2799_v1 = vpop.f32.mrf.mxu0  ;;  %v2056_v2 = vpop.f32.mrf.mxu1 }
 0x146   :  { %1449 = vst.msk [vmem:[%s3431_s2] sm:$0xff] %vm774_vm0, %v1195_v62  ;;  %v1206_v5 = vadd.f32 %v2056_v2, %v2740_v63  ;;  %v1651_v9 = vmul.f32 %v1195_v62, %v1195_v62  ;;  %v1514_v17 = vsel %vm774_vm0, %v1195_v62, 0.0  ;;  %v1718_v42 = vsel %vm774_vm0, %v1653_v10, 0.0 }
 0x147   :  { %v974_v59 = vpop.f32.mrf.mxu0  ;;  %v1197_v6 = vpop.f32.mrf.mxu1  ;;  %v2298_v2 = vmov 0.0  }
 0x148   :  { %1452 = vst.msk [vmem:[%s3431_s2 + $0x18] sm:$0xff] %vm774_vm0, %v1206_v5  ;;  %v1198_v51 = vadd.f32 %v1197_v6, %v2734_v55  ;;  %v1715_v29 = vsel %vm774_vm0, %v1651_v9, 0.0  ;;  %v1654_v30 = vmul.f32 %v1206_v5, %v1206_v5  ;;  %v1519_v45 = vsel %vm774_vm0, %v1206_v5, 0.0 }
 0x149   :  { %v2811_v13 = vpop.f32.mrf.mxu0  ;;  %v2059_v14 = vpop.f32.mrf.mxu1  ;;  %20 = vst.msk [vmem:[#allocation2] sm:$0x1] %vm19_vm1, %v2298_v2  ;;  %21 = vst.msk [vmem:[#allocation3] sm:$0x1] %vm19_vm1, %v2298_v2 }
 0x14a   :  { %1450 = vst.msk [vmem:[%s3431_s2 + $0x8] sm:$0xff] %vm774_vm0, %v1198_v51  ;;  %v1515_v63 = vsel %vm774_vm0, %v1198_v51, 0.0  ;;  %v1652_v18 = vmul.f32 %v1198_v51, %v1198_v51  ;;  %v1219_v21 = vadd.f32 %v2059_v14, %v2752_v11  ;;  %v1720_v58 = vsel %vm774_vm0, %v1654_v30, 0.0 }
 0x14b   :  { %v1516_v25 = vadd.f32 %v1515_v63, %v1514_v17  ;;  %v979_v55 = vpop.f32.mrf.mxu0  ;;  %v1210_v26 = vpop.f32.mrf.mxu1 }
 0x14c   :  { %v1716_v33 = vsel %vm774_vm0, %v1652_v18, 0.0  ;;  %1455 = vst.msk [vmem:[%s3431_s2 + $0x30] sm:$0xff] %vm774_vm0, %v1219_v21  ;;  %v1211_v34 = vadd.f32 %v1210_v26, %v2744_v3 }
 0x14d   :  { %v1518_v37 = vadd.f32 %v1517_v22, %v1516_v25  ;;  %v1717_v38 = vadd.f32 %v1716_v33, %v1715_v29  ;;  %v2828_v11 = vpop.f32.mrf.mxu0  ;;  %v2060_v41 = vpop.f32.mrf.mxu1  ;;  %v1525_v25 = vsel %vm774_vm0, %v1219_v21, 0.0 }
 0x14e   :  { %1453 = vst.msk [vmem:[%s3431_s2 + $0x20] sm:$0xff] %vm774_vm0, %v1211_v34  ;;  %v1655_v46 = vmul.f32 %v1211_v34, %v1211_v34  ;;  %v1222_v49 = vadd.f32 %v2060_v41, %v2756_v15  ;;  %v1521_v61 = vsel %vm774_vm0, %v1211_v34, 0.0  ;;  %v1657_v15 = vmul.f32 %v1219_v21, %v1219_v21 }
 0x14f   :  { %v1719_v50 = vadd.f32 %v1718_v42, %v1717_v38  ;;  %v1520_v54 = vadd.f32 %v1519_v45, %v1518_v37  ;;  %v982_v3 = vpop.f32.mrf.mxu0  ;;  %v1213_v57 = vpop.f32.mrf.mxu1 }
 0x150   :  { %1456 = vst.msk [vmem:[%s3431_s2 + $0x38] sm:$0xff] %vm774_vm0, %v1222_v49  ;;  %v1214_v62 = vadd.f32 %v1213_v57, %v2748_v7  ;;  %v1722_v51 = vsel %vm774_vm0, %v1655_v46, 0.0  ;;  %v1658_v55 = vmul.f32 %v1222_v49, %v1222_v49  ;;  %v1726_v37 = vsel %vm774_vm0, %v1657_v15, 0.0 }
 0x151   :  { %v1522_v5 = vadd.f32 %v1521_v61, %v1520_v54  ;;  %v1721_v59 = vadd.f32 %v1720_v58, %v1719_v50  ;;  %v2846_v6 = vpop.f32.mrf.mxu0  ;;  %v2063_v9 = vpop.f32.mrf.mxu1  ;;  %v1527_v38 = vsel %vm774_vm0, %v1222_v49, 0.0 }
 0x152   :  { %1454 = vst.msk [vmem:[%s3431_s2 + $0x28] sm:$0xff] %vm774_vm0, %v1214_v62  ;;  %v1523_v7 = vsel %vm774_vm0, %v1214_v62, 0.0  ;;  %v1656_v10 = vmul.f32 %v1214_v62, %v1214_v62  ;;  %v1235_v14 = vadd.f32 %v2063_v9, %v2768_v27  ;;  %v1728_v50 = vsel %vm774_vm0, %v1658_v55, 0.0 }
 0x153   :  { %v1723_v17 = vadd.f32 %v1722_v51, %v1721_v59  ;;  %v1524_v63 = vadd.f32 %v1523_v7, %v1522_v5  ;;  %v987_v18 = vpop.f32.mrf.mxu0  ;;  %v1226_v22 = vpop.f32.mrf.mxu1 }
 0x154   :  { %v1724_v26 = vsel %vm774_vm0, %v1656_v10, 0.0  ;;  %1459 = vst.msk [vmem:[%s3431_s2 + $0x50] sm:$0xff] %vm774_vm0, %v1235_v14  ;;  %v1227_v29 = vadd.f32 %v1226_v22, %v2760_v19  ;;  %v1661_v3 = vmul.f32 %v1235_v14, %v1235_v14  ;;  %v1533_v7 = vsel %vm774_vm0, %v1235_v14, 0.0 }
 0x155   :  { %v1526_v30 = vadd.f32 %v1525_v25, %v1524_v63  ;;  %v1725_v33 = vadd.f32 %v1724_v26, %v1723_v17  ;;  %v2862_v34 = vpop.f32.mrf.mxu0  ;;  %v2064_v27 = vpop.f32.mrf.mxu1 }
 0x156   :  { %1457 = vst.msk [vmem:[%s3431_s2 + $0x40] sm:$0xff] %vm774_vm0, %v1227_v29  ;;  %v1659_v21 = vmul.f32 %v1227_v29, %v1227_v29  ;;  %v1238_v41 = vadd.f32 %v2064_v27, %v2772_v31  ;;  %v1529_v54 = vsel %vm774_vm0, %v1227_v29, 0.0  ;;  %v1734_v55 = vsel %vm774_vm0, %v1661_v3, 0.0 }
 0x157   :  { %v1727_v42 = vadd.f32 %v1726_v37, %v1725_v33  ;;  %v1528_v45 = vadd.f32 %v1527_v38, %v1526_v30  ;;  %v990_v19 = vpop.f32.mrf.mxu0  ;;  %v1229_v46 = vpop.f32.mrf.mxu1 }
 0x158   :  { %1460 = vst.msk [vmem:[%s3431_s2 + $0x58] sm:$0xff] %vm774_vm0, %v1238_v41  ;;  %v1230_v49 = vadd.f32 %v1229_v46, %v2764_v23  ;;  %v1730_v62 = vsel %vm774_vm0, %v1659_v21, 0.0  ;;  %v1662_v10 = vmul.f32 %v1238_v41, %v1238_v41  ;;  %v1535_v26 = vsel %vm774_vm0, %v1238_v41, 0.0 }
 0x159   :  { %v1530_v57 = vadd.f32 %v1529_v54, %v1528_v45  ;;  %v1729_v58 = vadd.f32 %v1728_v50, %v1727_v42  ;;  %v2878_v61 = vpop.f32.mrf.mxu0  ;;  %v2067_v31 = vpop.f32.mrf.mxu1 }
 0x15a   :  { %1458 = vst.msk [vmem:[%s3431_s2 + $0x48] sm:$0xff] %vm774_vm0, %v1230_v49  ;;  %v1531_v2 = vsel %vm774_vm0, %v1230_v49, 0.0  ;;  %v1660_v15 = vmul.f32 %v1230_v49, %v1230_v49  ;;  %v1251_v5 = vadd.f32 %v2067_v31, %v2784_v43  ;;  %v1736_v37 = vsel %vm774_vm0, %v1662_v10, 0.0 }
 0x15b   :  { %v1731_v59 = vadd.f32 %v1730_v62, %v1729_v58  ;;  %v1532_v23 = vadd.f32 %v1531_v2, %v1530_v57  ;;  %v995_v9 = vpop.f32.mrf.mxu0  ;;  %v1242_v51 = vpop.f32.mrf.mxu1 }
 0x15c   :  { %v1732_v17 = vsel %vm774_vm0, %v1660_v15, 0.0  ;;  %1463 = vst.msk [vmem:[%s3431_s2 + $0x70] sm:$0xff] %vm774_vm0, %v1251_v5  ;;  %v1243_v63 = vadd.f32 %v1242_v51, %v2776_v35  ;;  %v1665_v41 = vmul.f32 %v1251_v5, %v1251_v5  ;;  %v1541_v31 = vsel %vm774_vm0, %v1251_v5, 0.0 }
 0x15d   :  { %v1534_v18 = vadd.f32 %v1533_v7, %v1532_v23  ;;  %v1733_v22 = vadd.f32 %v1732_v17, %v1731_v59  ;;  %v2894_v25 = vpop.f32.mrf.mxu0  ;;  %v2068_v43 = vpop.f32.mrf.mxu1 }
 0x15e   :  { %1461 = vst.msk [vmem:[%s3431_s2 + $0x60] sm:$0xff] %vm774_vm0, %v1243_v63  ;;  %v1663_v14 = vmul.f32 %v1243_v63, %v1243_v63  ;;  %v1254_v29 = vadd.f32 %v2068_v43, %v2788_v47  ;;  %v1537_v38 = vsel %vm774_vm0, %v1243_v63, 0.0  ;;  %v1742_v51 = vsel %vm774_vm0, %v1665_v41, 0.0 }
 0x15f   :  { %v1735_v30 = vadd.f32 %v1734_v55, %v1733_v22  ;;  %v1536_v33 = vadd.f32 %v1535_v26, %v1534_v18  ;;  %v998_v35 = vpop.f32.mrf.mxu0  ;;  %v1245_v27 = vpop.f32.mrf.mxu1 }
 0x160   :  { %1464 = vst.msk [vmem:[%s3431_s2 + $0x78] sm:$0xff] %vm774_vm0, %v1254_v29  ;;  %v1246_v21 = vadd.f32 %v1245_v27, %v2780_v39  ;;  %v1738_v46 = vsel %vm774_vm0, %v1663_v14, 0.0  ;;  %v1666_v62 = vmul.f32 %v1254_v29, %v1254_v29  ;;  %v1543_v7 = vsel %vm774_vm0, %v1254_v29, 0.0 }
 0x161   :  { %v1538_v42 = vadd.f32 %v1537_v38, %v1536_v33  ;;  %v1737_v45 = vadd.f32 %v1736_v37, %v1735_v30  ;;  %v2910_v19 = vpop.f32.mrf.mxu0  ;;  %v2071_v47 = vpop.f32.mrf.mxu1 }
 0x162   :  { %1462 = vst.msk [vmem:[%s3431_s2 + $0x68] sm:$0xff] %vm774_vm0, %v1246_v21  ;;  %v1539_v50 = vsel %vm774_vm0, %v1246_v21, 0.0  ;;  %v1664_v54 = vmul.f32 %v1246_v21, %v1246_v21  ;;  %v1267_v49 = vadd.f32 %v2071_v47, %v2811_v13  ;;  %v1744_v22 = vsel %vm774_vm0, %v1666_v62, 0.0 }
 0x163   :  { %v1739_v3 = vadd.f32 %v1738_v46, %v1737_v45  ;;  %v1540_v39 = vadd.f32 %v1539_v50, %v1538_v42  ;;  %v1003_v57 = vpop.f32.mrf.mxu0  ;;  %v1258_v58 = vpop.f32.mrf.mxu1 }
 0x164   :  { %v1740_v2 = vsel %vm774_vm0, %v1664_v54, 0.0  ;;  %1467 = vst.msk [vmem:[%s3431_s2 + $0x90] sm:$0xff] %vm774_vm0, %v1267_v49  ;;  %v1259_v15 = vadd.f32 %v1258_v58, %v2792_v53  ;;  %v1669_v26 = vmul.f32 %v1267_v49, %v1267_v49  ;;  %v1549_v42 = vsel %vm774_vm0, %v1267_v49, 0.0 }
 0x165   :  { %v1542_v59 = vadd.f32 %v1541_v31, %v1540_v39  ;;  %v1741_v23 = vadd.f32 %v1740_v2, %v1739_v3  ;;  %v2926_v9 = vpop.f32.mrf.mxu0  ;;  %v2072_v13 = vpop.f32.mrf.mxu1 }
 0x166   :  { %1465 = vst.msk [vmem:[%s3431_s2 + $0x80] sm:$0xff] %vm774_vm0, %v1259_v15  ;;  %v1667_v5 = vmul.f32 %v1259_v15, %v1259_v15  ;;  %v1270_v10 = vadd.f32 %v2072_v13, %v2828_v11  ;;  %v1545_v43 = vsel %vm774_vm0, %v1259_v15, 0.0  ;;  %v1750_v39 = vsel %vm774_vm0, %v1669_v26, 0.0 }
 0x167   :  { %v1743_v17 = vadd.f32 %v1742_v51, %v1741_v23  ;;  %v1544_v63 = vadd.f32 %v1543_v7, %v1542_v59  ;;  %v1006_v53 = vpop.f32.mrf.mxu0  ;;  %v1261_v18 = vpop.f32.mrf.mxu1 }
 0x168   :  { %1468 = vst.msk [vmem:[%s3431_s2 + $0x98] sm:$0xff] %vm774_vm0, %v1270_v10  ;;  %v1262_v55 = vadd.f32 %v1261_v18, %v2799_v1  ;;  %v1746_v33 = vsel %vm774_vm0, %v1667_v5, 0.0  ;;  %v1670_v45 = vmul.f32 %v1270_v10, %v1270_v10  ;;  %v1551_v57 = vsel %vm774_vm0, %v1270_v10, 0.0 }
 0x169   :  { %v1546_v14 = vadd.f32 %v1545_v43, %v1544_v63  ;;  %v1745_v29 = vadd.f32 %v1744_v22, %v1743_v17  ;;  %v1009_v30 = vpop.f32.mrf.mxu0  ;;  %v2075_v11 = vpop.f32.mrf.mxu1 }
 0x16a   :  { %1466 = vst.msk [vmem:[%s3431_s2 + $0x88] sm:$0xff] %vm774_vm0, %v1262_v55  ;;  %v1547_v35 = vsel %vm774_vm0, %v1262_v55, 0.0  ;;  %v1668_v27 = vmul.f32 %v1262_v55, %v1262_v55  ;;  %v1283_v37 = vadd.f32 %v2075_v11, %v2878_v61  ;;  %v1752_v15 = vsel %vm774_vm0, %v1670_v45, 0.0 }
 0x16b   :  { %v1747_v38 = vadd.f32 %v1746_v33, %v1745_v29  ;;  %v1548_v21 = vadd.f32 %v1547_v35, %v1546_v14  ;;  %v1011_v1 = vpop.f32.mrf.mxu0  ;;  %v1274_v41 = vpop.f32.mrf.mxu1 }
 0x16c   :  { %v1748_v47 = vsel %vm774_vm0, %v1668_v27, 0.0  ;;  %1471 = vst.msk [vmem:[%s3431_s2 + $0xb0] sm:$0xff] %vm774_vm0, %v1283_v37  ;;  %v1275_v46 = vadd.f32 %v1274_v41, %v2846_v6  ;;  %v1557_v33 = vsel %vm774_vm0, %v1283_v37, 0.0 }
 0x16d   :  { %v1550_v50 = vadd.f32 %v1549_v42, %v1548_v21  ;;  %v1749_v54 = vadd.f32 %v1748_v47, %v1747_v38  ;;  %v1012_v3 = vpop.f32.mrf.mxu0  ;;  %v2076_v61 = vpop.f32.mrf.mxu1 }
 0x16e   :  { %1469 = vst.msk [vmem:[%s3431_s2 + $0xa0] sm:$0xff] %vm774_vm0, %v1275_v46  ;;  %v1671_v49 = vmul.f32 %v1275_v46, %v1275_v46  ;;  %v1286_v58 = vadd.f32 %v2076_v61, %v2894_v25  ;;  %v1553_v59 = vsel %vm774_vm0, %v1275_v46, 0.0 }
 0x16f   :  { %v1751_v31 = vadd.f32 %v1750_v39, %v1749_v54  ;;  %v1552_v62 = vadd.f32 %v1551_v57, %v1550_v50  ;;  %v1014_v2 = vpop.f32.mrf.mxu0  ;;  %v1277_v6 = vpop.f32.mrf.mxu1 }
 0x170   :  { %1472 = vst.msk [vmem:[%s3431_s2 + $0xb8] sm:$0xff] %vm774_vm0, %v1286_v58  ;;  %v1278_v23 = vadd.f32 %v1277_v6, %v2862_v34  ;;  %v1754_v25 = vsel %vm774_vm0, %v1671_v49, 0.0  ;;  %v1673_v34 = vmul.f32 %v1283_v37, %v1283_v37  ;;  %v1674_v1 = vmul.f32 %v1286_v58, %v1286_v58 }
 0x171   :  { %v1554_v13 = vadd.f32 %v1553_v59, %v1552_v62  ;;  %v1753_v51 = vadd.f32 %v1752_v15, %v1751_v31  ;;  %v1017_v7 = vpop.f32.mrf.mxu0  ;;  %v2079_v5 = vpop.f32.mrf.mxu1  ;;  %v1559_v45 = vsel %vm774_vm0, %v1286_v58, 0.0 }
 0x172   :  { %1470 = vst.msk [vmem:[%s3431_s2 + $0xa8] sm:$0xff] %vm774_vm0, %v1278_v23  ;;  %v1555_v10 = vsel %vm774_vm0, %v1278_v23, 0.0  ;;  %v1672_v17 = vmul.f32 %v1278_v23, %v1278_v23  ;;  %v1299_v63 = vadd.f32 %v2079_v5, %v1009_v30  ;;  %v1758_v21 = vsel %vm774_vm0, %v1673_v34, 0.0 }
 0x173   :  { %v1755_v53 = vadd.f32 %v1754_v25, %v1753_v51  ;;  %v1556_v18 = vadd.f32 %v1555_v10, %v1554_v13  ;;  %v1019_v22 = vpop.f32.mrf.mxu0  ;;  %v1290_v43 = vpop.f32.mrf.mxu1 }
 0x174   :  { %v1756_v55 = vsel %vm774_vm0, %v1672_v17, 0.0  ;;  %1475 = vst.msk [vmem:[%s3431_s2 + $0xd0] sm:$0xff] %vm774_vm0, %v1299_v63  ;;  %v1291_v26 = vadd.f32 %v1290_v43, %v2910_v19 }
 0x175   :  { %v1757_v14 = vadd.f32 %v1756_v55, %v1755_v53  ;;  %v1020_v29 = vpop.f32.mrf.mxu0  ;;  %v2080_v11 = vpop.f32.mrf.mxu1  ;;  %v1558_v35 = vadd.f32 %v1557_v33, %v1556_v18  ;;  %v1677_v18 = vmul.f32 %v1299_v63, %v1299_v63 }
 0x176   :  { %1473 = vst.msk [vmem:[%s3431_s2 + $0xc0] sm:$0xff] %vm774_vm0, %v1291_v26  ;;  %v1302_v30 = vadd.f32 %v2080_v11, %v1012_v3  ;;  %v1760_v3 = vsel %vm774_vm0, %v1674_v1, 0.0  ;;  %v1675_v61 = vmul.f32 %v1291_v26, %v1291_v26  ;;  %v1561_v58 = vsel %vm774_vm0, %v1291_v26, 0.0 }
 0x177   :  { %v1022_v27 = vpop.f32.mrf.mxu0  ;;  %v1293_v38 = vpop.f32.mrf.mxu1  ;;  %v1759_v37 = vadd.f32 %v1758_v21, %v1757_v14  ;;  %v1560_v46 = vadd.f32 %v1559_v45, %v1558_v35  ;;  %v1565_v26 = vsel %vm774_vm0, %v1299_v63, 0.0  ;;  %v1766_v33 = vsel %vm774_vm0, %v1677_v18, 0.0 }
 0x178   :  { %1476 = vst.msk [vmem:[%s3431_s2 + $0xd8] sm:$0xff] %vm774_vm0, %v1302_v30  ;;  %v1294_v19 = vadd.f32 %v1293_v38, %v2926_v9  ;;  %v1762_v59 = vsel %vm774_vm0, %v1675_v61, 0.0  ;;  %v1678_v35 = vmul.f32 %v1302_v30, %v1302_v30 }
 0x179   :  { %v1025_v41 = vpop.f32.mrf.mxu0  ;;  %v2083_v42 = vpop.f32.mrf.mxu1  ;;  %v1761_v39 = vadd.f32 %v1760_v3, %v1759_v37  ;;  %v1562_v2 = vadd.f32 %v1561_v58, %v1560_v46 }
 0x17a   :  { %1474 = vst.msk [vmem:[%s3431_s2 + $0xc8] sm:$0xff] %vm774_vm0, %v1294_v19  ;;  %v2998_v47 = vadd.f32 %v2083_v42, %v1025_v41  ;;  %v1676_v31 = vmul.f32 %v1294_v19, %v1294_v19  ;;  %v1563_v23 = vsel %vm774_vm0, %v1294_v19, 0.0  ;;  %v1567_v19 = vsel %vm774_vm0, %v1302_v30, 0.0 }
 0x17b   :  { %v1027_v50 = vpop.f32.mrf.mxu0  ;;  %v1306_v54 = vpop.f32.mrf.mxu1  ;;  %v1763_v51 = vadd.f32 %v1762_v59, %v1761_v39  ;;  %v1564_v10 = vadd.f32 %v1563_v23, %v1562_v2  ;;  %v1768_v45 = vsel %vm774_vm0, %v1678_v35, 0.0 }
 0x17c   :  { %1479 = vst.msk [vmem:[%s3431_s2 + $0xf0] sm:$0xff] %vm774_vm0, %v2998_v47  ;;  %v1307_v9 = vadd.f32 %v1306_v54, %v1017_v7  ;;  %v1764_v25 = vsel %vm774_vm0, %v1676_v31, 0.0 }
 0x17d   :  { %v1028_v57 = vpop.f32.mrf.mxu0  ;;  %v2084_v49 = vpop.f32.mrf.mxu1  ;;  %v1765_v43 = vadd.f32 %v1764_v25, %v1763_v51  ;;  %v1566_v14 = vadd.f32 %v1565_v26, %v1564_v10 }
 0x17e   :  { %1477 = vst.msk [vmem:[%s3431_s2 + $0xe0] sm:$0xff] %vm774_vm0, %v1307_v9  ;;  %v3011_v62 = vadd.f32 %v2084_v49, %v1028_v57  ;;  %v1679_v46 = vmul.f32 %v1307_v9, %v1307_v9  ;;  %v1569_v3 = vsel %vm774_vm0, %v1307_v9, 0.0 }
 0x17f   :  { %v1030_v6 = vpop.f32.mrf.mxu0  ;;  %v1309_v15 = vpop.f32.mrf.mxu1  ;;  %v1767_v38 = vadd.f32 %v1766_v33, %v1765_v43  ;;  %v1568_v37 = vadd.f32 %v1567_v19, %v1566_v14 }
 0x180   :  { %1480 = vst.msk [vmem:[%s3431_s2 + $0xf8] sm:$0xff] %vm774_vm0, %v3011_v62  ;;  %v1310_v13 = vadd.f32 %v1309_v15, %v1020_v29  ;;  %v1770_v31 = vsel %vm774_vm0, %v1679_v46, 0.0  ;;  %v1682_v14 = vmul.f32 %v3011_v62, %v3011_v62 }
 0x181   :  { %v1033_v7 = vpop.f32.mrf.mxu0  ;;  %v2087_v5 = vpop.f32.mrf.mxu1  ;;  %v1769_v30 = vadd.f32 %v1768_v45, %v1767_v38  ;;  %v1570_v57 = vadd.f32 %v1569_v3, %v1568_v37 }
 0x182   :  { %1478 = vst.msk [vmem:[%s3431_s2 + $0xe8] sm:$0xff] %vm774_vm0, %v1310_v13  ;;  %v1680_v61 = vmul.f32 %v1310_v13, %v1310_v13  ;;  %v1571_v2 = vsel %vm774_vm0, %v1310_v13, 0.0  ;;  %v1681_v13 = vmul.f32 %v2998_v47, %v2998_v47  ;;  %v1776_v37 = vsel %vm774_vm0, %v1682_v14, 0.0 }
 0x183   :  { %v1035_v17 = vpop.f32.mrf.mxu0  ;;  %v1322_v53 = vpop.f32.mrf.mxu1  ;;  %v1771_v6 = vadd.f32 %v1770_v31, %v1769_v30  ;;  %v1572_v51 = vadd.f32 %v1571_v2, %v1570_v57 }
 0x184   :  { %v3025_v22 = vadd.f32 %v1322_v53, %v1033_v7  ;;  %v1772_v9 = vsel %vm774_vm0, %v1680_v61, 0.0  ;;  %v1573_v53 = vsel %vm774_vm0, %v2998_v47, 0.0  ;;  %v1774_v26 = vsel %vm774_vm0, %v1681_v13, 0.0 }
 0x185   :  { %v1036_v34 = vpop.f32.mrf.mxu0  ;;  %v2088_v55 = vpop.f32.mrf.mxu1  ;;  %v1773_v25 = vadd.f32 %v1772_v9, %v1771_v6  ;;  %v1574_v43 = vadd.f32 %v1573_v53, %v1572_v51  ;;  %v1575_v47 = vsel %vm774_vm0, %v3011_v62, 0.0 }
 0x186   :  { %1481 = vst.msk [vmem:[%s3431_s2 + $0x100] sm:$0xff] %vm774_vm0, %v3025_v22 }
 0x187   :  { %v1038_v29 = vpop.f32.mrf.mxu0  ;;  %v1325_v11 = vpop.f32.mrf.mxu1  ;;  %v1576_v38 = vadd.f32 %v1575_v47, %v1574_v43 }
 0x188   :  { %v3034_v27 = vadd.f32 %v1325_v11, %v1036_v34  ;;  %v1775_v29 = vadd.f32 %v1774_v26, %v1773_v25 }
 0x189   :  { %v1041_v21 = vpop.f32.mrf.mxu0  ;;  %v2091_v1 = vpop.f32.mrf.mxu1 }
 0x18a   :  { %1482 = vst.msk [vmem:[%s3431_s2 + $0x108] sm:$0xff] %vm774_vm0, %v3034_v27  ;;  %v3042_v63 = vadd.f32 %v2087_v5, %v1041_v21  ;;  %v1684_v46 = vmul.f32 %v3034_v27, %v3034_v27 }
 0x18b   :  { %v1043_v41 = vpop.f32.mrf.mxu0  ;;  %v1338_v42 = vpop.f32.mrf.mxu1 }
 0x18c   :  { %1483 = vst.msk [vmem:[%s3431_s2 + $0x110] sm:$0xff] %vm774_vm0, %v3042_v63  ;;  %v1683_v41 = vmul.f32 %v3025_v22, %v3025_v22  ;;  %v1780_v2 = vsel %vm774_vm0, %v1684_v46, 0.0 }
 0x18d   :  { %v1044_v50 = vpop.f32.mrf.mxu0  ;;  %v2092_v54 = vpop.f32.mrf.mxu1 }
 0x18e   :  { %v3051_v39 = vadd.f32 %v2088_v55, %v1044_v50  ;;  %v1778_v57 = vsel %vm774_vm0, %v1683_v41, 0.0 }
 0x18f   :  { %v1046_v49 = vpop.f32.mrf.mxu0  ;;  %v1341_v58 = vpop.f32.mrf.mxu1 }
 0x190   :  { %1484 = vst.msk [vmem:[%s3431_s2 + $0x118] sm:$0xff] %vm774_vm0, %v3051_v39  ;;  %v1579_v49 = vsel %vm774_vm0, %v3034_v27, 0.0  ;;  %v1686_v13 = vmul.f32 %v3051_v39, %v3051_v39  ;;  %v1583_v53 = vsel %vm774_vm0, %v3051_v39, 0.0 }
 0x191   :  { %v1049_v15 = vpop.f32.mrf.mxu0  ;;  %v3060_v59 = vpop.f32.mrf.mxu1 }
 0x192   :  { %v3063_v23 = vadd.f32 %v1338_v42, %v1049_v15  ;;  %v1777_v42 = vadd.f32 %v1776_v37, %v1775_v29 }
 0x193   :  { %v1051_v7 = vpop.f32.mrf.mxu0  ;;  %v1354_v5 = vpop.f32.mrf.mxu1 }
 0x194   :  { %1485 = vst.msk [vmem:[%s3431_s2 + $0x120] sm:$0xff] %vm774_vm0, %v3063_v23  ;;  %v1581_v7 = vsel %vm774_vm0, %v3042_v63, 0.0  ;;  %v1687_v43 = vmul.f32 %v3063_v23, %v3063_v23  ;;  %v1585_v39 = vsel %vm774_vm0, %v3063_v23, 0.0 }
 0x195   :  { %v1052_v10 = vpop.f32.mrf.mxu0  ;;  %v3072_v17 = vpop.f32.mrf.mxu1 }
 0x196   :  { %v3076_v18 = vadd.f32 %v1341_v58, %v1052_v10  ;;  %v1786_v41 = vsel %vm774_vm0, %v1687_v43, 0.0 }
 0x197   :  { %v1054_v34 = vpop.f32.mrf.mxu0  ;;  %v1357_v55 = vpop.f32.mrf.mxu1 }
 0x198   :  { %1486 = vst.msk [vmem:[%s3431_s2 + $0x128] sm:$0xff] %vm774_vm0, %v3076_v18 }
 0x199   :  { %v1057_v11 = vpop.f32.mrf.mxu0  ;;  %v3086_v33 = vpop.f32.mrf.mxu1 }
 0x19a   :  { %v3090_v35 = vadd.f32 %v2091_v1, %v1057_v11  ;;  %v1577_v1 = vsel %vm774_vm0, %v3025_v22, 0.0  ;;  %v1779_v22 = vadd.f32 %v1778_v57, %v1777_v42  ;;  %v1784_v11 = vsel %vm774_vm0, %v1686_v13, 0.0 }
 0x19b   :  { %v1059_v21 = vpop.f32.mrf.mxu0  ;;  %v3092_v19 = vpop.f32.mrf.mxu1  ;;  %v1578_v50 = vadd.f32 %v1577_v1, %v1576_v38  ;;  %v1587_v42 = vsel %vm774_vm0, %v3076_v18, 0.0 }
 0x19c   :  { %1487 = vst.msk [vmem:[%s3431_s2 + $0x130] sm:$0xff] %vm774_vm0, %v3090_v35  ;;  %v1689_v38 = vmul.f32 %v3090_v35, %v3090_v35 }
 0x19d   :  { %v1060_v45 = vpop.f32.mrf.mxu0  ;;  %v3102_v62 = vpop.f32.mrf.mxu1  ;;  %v1580_v27 = vadd.f32 %v1579_v49, %v1578_v50 }
 0x19e   :  { %v3108_v30 = vadd.f32 %v2092_v54, %v1060_v45  ;;  %v1685_v54 = vmul.f32 %v3042_v63, %v3042_v63 }
 0x19f   :  { %v1062_v3 = vpop.f32.mrf.mxu0  ;;  %v3110_v61 = vpop.f32.mrf.mxu1  ;;  %v1582_v14 = vadd.f32 %v1581_v7, %v1580_v27 }
 0x1a0   :  { %1488 = vst.msk [vmem:[%s3431_s2 + $0x138] sm:$0xff] %vm774_vm0, %v3108_v30 }
 0x1a1   :  { %v1065_v58 = vpop.f32.mrf.mxu0  ;;  %v2103_v31 = vpop.f32.mrf.mxu1  ;;  %v1584_v47 = vadd.f32 %v1583_v53, %v1582_v14 }
 0x1a2   :  { %v3123_v6 = vadd.f32 %v1354_v5, %v1065_v58  ;;  %v3126_v15 = vadd.f32 %v2103_v31, %v2738_v60  ;;  %v1781_v60 = vadd.f32 %v1780_v2, %v1779_v22  ;;  %v1782_v5 = vsel %vm774_vm0, %v1685_v54, 0.0 }
 0x1a3   :  { %v1067_v9 = vpop.f32.mrf.mxu0  ;;  %v1386_v51 = vpop.f32.mrf.mxu1  ;;  %v1586_v50 = vadd.f32 %v1585_v39, %v1584_v47  ;;  %v1790_v22 = vsel %vm774_vm0, %v1689_v38, 0.0  ;;  %v1591_v31 = vsel %vm774_vm0, %v3108_v30, 0.0 }
 0x1a4   :  { %1489 = vst.msk [vmem:[%s3431_s2 + $0x140] sm:$0xff] %vm774_vm0, %v3123_v6  ;;  %1499 = vst.msk [vmem:[%s3431_s2 + $0x190] sm:$0xff] %vm774_vm0, %v3126_v15  ;;  %v3144_v63 = vadd.f32 %v1386_v51, %v2732_v52  ;;  %v1691_v2 = vmul.f32 %v3123_v6, %v3123_v6 }
 0x1a5   :  { %v1068_v25 = vpop.f32.mrf.mxu0  ;;  %v2104_v10 = vpop.f32.mrf.mxu1  ;;  %v1588_v49 = vadd.f32 %v1587_v42, %v1586_v50 }
 0x1a6   :  { %v1358_v34 = vadd.f32 %v1357_v55, %v1068_v25  ;;  %v3151_v26 = vadd.f32 %v2104_v10, %v2742_v0  ;;  %1497 = vst.msk [vmem:[%s3431_s2 + $0x180] sm:$0xff] %vm774_vm0, %v3144_v63  ;;  %v1688_v55 = vmul.f32 %v3076_v18, %v3076_v18  ;;  %v1783_v0 = vadd.f32 %v1782_v5, %v1781_v60 }
 0x1a7   :  { %v1070_v52 = vpop.f32.mrf.mxu0  ;;  %v1389_v29 = vpop.f32.mrf.mxu1  ;;  %v1589_v18 = vsel %vm774_vm0, %v3090_v35, 0.0  ;;  %v1593_v60 = vsel %vm774_vm0, %v3123_v6, 0.0  ;;  %v1794_v43 = vsel %vm774_vm0, %v1691_v2, 0.0 }
 0x1a8   :  { %1490 = vst.msk [vmem:[%s3431_s2 + $0x148] sm:$0xff] %vm774_vm0, %v1358_v34  ;;  %1500 = vst.msk [vmem:[%s3431_s2 + $0x198] sm:$0xff] %vm774_vm0, %v3151_v26  ;;  %v3175_v23 = vadd.f32 %v1389_v29, %v2736_v56  ;;  %v1785_v46 = vadd.f32 %v1784_v11, %v1783_v0  ;;  %v1788_v57 = vsel %vm774_vm0, %v1688_v55, 0.0  ;;  %v1590_v7 = vadd.f32 %v1589_v18, %v1588_v49 }
 0x1a9   :  { %v1073_v21 = vpop.f32.mrf.mxu0  ;;  %v2107_v37 = vpop.f32.mrf.mxu1  ;;  %v1692_v5 = vmul.f32 %v1358_v34, %v1358_v34  ;;  %v1595_v14 = vsel %vm774_vm0, %v1358_v34, 0.0 }
 0x1aa   :  { %v1363_v45 = vadd.f32 %v3060_v59, %v1073_v21  ;;  %v3182_v1 = vadd.f32 %v2107_v37, %v2754_v12  ;;  %1498 = vst.msk [vmem:[%s3431_s2 + $0x188] sm:$0xff] %vm774_vm0, %v3175_v23  ;;  %v1690_v59 = vmul.f32 %v3108_v30, %v3108_v30  ;;  %v1787_v12 = vadd.f32 %v1786_v41, %v1785_v46 }
 0x1ab   :  { %v1075_v56 = vpop.f32.mrf.mxu0  ;;  %v1402_v3 = vpop.f32.mrf.mxu1  ;;  %v1796_v0 = vsel %vm774_vm0, %v1692_v5, 0.0 }
 0x1ac   :  { %1491 = vst.msk [vmem:[%s3431_s2 + $0x150] sm:$0xff] %vm774_vm0, %v1363_v45  ;;  %1503 = vst.msk [vmem:[%s3431_s2 + $0x1b0] sm:$0xff] %vm774_vm0, %v3182_v1  ;;  %v3205_v35 = vadd.f32 %v1402_v3, %v2746_v4  ;;  %v1789_v51 = vadd.f32 %v1788_v57, %v1787_v12  ;;  %v1792_v30 = vsel %vm774_vm0, %v1690_v59, 0.0  ;;  %v1693_v25 = vmul.f32 %v1363_v45, %v1363_v45 }
 0x1ad   :  { %v1076_v54 = vpop.f32.mrf.mxu0  ;;  %v2108_v58 = vpop.f32.mrf.mxu1  ;;  %v1597_v47 = vsel %vm774_vm0, %v1363_v45, 0.0 }
 0x1ae   :  { %v1366_v27 = vadd.f32 %v3072_v17, %v1076_v54  ;;  %v3213_v9 = vadd.f32 %v2108_v58, %v2758_v16  ;;  %1501 = vst.msk [vmem:[%s3431_s2 + $0x1a0] sm:$0xff] %vm774_vm0, %v3205_v35  ;;  %v1791_v16 = vadd.f32 %v1790_v22, %v1789_v51  ;;  %v1592_v17 = vadd.f32 %v1591_v31, %v1590_v7 }
 0x1af   :  { %v1078_v4 = vpop.f32.mrf.mxu0  ;;  %v1405_v13 = vpop.f32.mrf.mxu1  ;;  %v1798_v38 = vsel %vm774_vm0, %v1693_v25, 0.0 }
 0x1b0   :  { %1492 = vst.msk [vmem:[%s3431_s2 + $0x158] sm:$0xff] %vm774_vm0, %v1366_v27  ;;  %1504 = vst.msk [vmem:[%s3431_s2 + $0x1b8] sm:$0xff] %vm774_vm0, %v3213_v9  ;;  %v3233_v10 = vadd.f32 %v1405_v13, %v2750_v8  ;;  %v1793_v11 = vadd.f32 %v1792_v30, %v1791_v16  ;;  %v1594_v39 = vadd.f32 %v1593_v60, %v1592_v17  ;;  %v1599_v42 = vsel %vm774_vm0, %v1366_v27, 0.0 }
 0x1b1   :  { %v1081_v53 = vpop.f32.mrf.mxu0  ;;  %v2111_v6 = vpop.f32.mrf.mxu1  ;;  %v1694_v34 = vmul.f32 %v1366_v27, %v1366_v27 }
 0x1b2   :  { %v1371_v52 = vadd.f32 %v3092_v19, %v1081_v53  ;;  %v3239_v29 = vadd.f32 %v2111_v6, %v2770_v28  ;;  %1502 = vst.msk [vmem:[%s3431_s2 + $0x1a8] sm:$0xff] %vm774_vm0, %v3233_v10  ;;  %v1795_v28 = vadd.f32 %v1794_v43, %v1793_v11  ;;  %v1596_v19 = vadd.f32 %v1595_v14, %v1594_v39 }
 0x1b3   :  { %v1083_v8 = vpop.f32.mrf.mxu0  ;;  %v1418_v55 = vpop.f32.mrf.mxu1  ;;  %v1800_v18 = vsel %vm774_vm0, %v1694_v34, 0.0  ;;  %v1699_v11 = vmul.f32 %v3144_v63, %v3144_v63 }
 0x1b4   :  { %1493 = vst.msk [vmem:[%s3431_s2 + $0x160] sm:$0xff] %vm774_vm0, %v1371_v52  ;;  %1507 = vst.msk [vmem:[%s3431_s2 + $0x1d0] sm:$0xff] %vm774_vm0, %v3239_v29  ;;  %v3259_v21 = vadd.f32 %v1418_v55, %v2762_v20  ;;  %v1695_v45 = vmul.f32 %v1371_v52, %v1371_v52  ;;  %v1797_v56 = vadd.f32 %v1796_v0, %v1795_v28  ;;  %v1601_v59 = vsel %vm774_vm0, %v1371_v52, 0.0 }
 0x1b5   :  { %v1084_v37 = vpop.f32.mrf.mxu0  ;;  %v2112_v41 = vpop.f32.mrf.mxu1  ;;  %v1598_v3 = vadd.f32 %v1597_v47, %v1596_v19  ;;  %v1609_v0 = vsel %vm774_vm0, %v3144_v63, 0.0  ;;  %v1700_v47 = vmul.f32 %v3175_v23, %v3175_v23  ;;  %v1611_v63 = vsel %vm774_vm0, %v3175_v23, 0.0 }
 0x1b6   :  { %v1374_v46 = vadd.f32 %v3110_v61, %v1084_v37  ;;  %v3264_v50 = vadd.f32 %v2112_v41, %v2774_v32  ;;  %1505 = vst.msk [vmem:[%s3431_s2 + $0x1c0] sm:$0xff] %vm774_vm0, %v3259_v21  ;;  %v1799_v61 = vadd.f32 %v1798_v38, %v1797_v56  ;;  %v1802_v58 = vsel %vm774_vm0, %v1695_v45, 0.0 }
 0x1b7   :  { %v1086_v20 = vpop.f32.mrf.mxu0  ;;  %v1421_v57 = vpop.f32.mrf.mxu1  ;;  %v1600_v12 = vadd.f32 %v1599_v42, %v1598_v3  ;;  %v1810_v38 = vsel %vm774_vm0, %v1699_v11, 0.0  ;;  %v1613_v42 = vsel %vm774_vm0, %v3126_v15, 0.0  ;;  %v1702_v45 = vmul.f32 %v3151_v26, %v3151_v26 }
 0x1b8   :  { %1494 = vst.msk [vmem:[%s3431_s2 + $0x168] sm:$0xff] %vm774_vm0, %v1374_v46  ;;  %v1696_v32 = vmul.f32 %v1374_v46, %v1374_v46  ;;  %1508 = vst.msk [vmem:[%s3431_s2 + $0x1d8] sm:$0xff] %vm774_vm0, %v3264_v50  ;;  %v3283_v49 = vadd.f32 %v1421_v57, %v2766_v24  ;;  %v1603_v31 = vsel %vm774_vm0, %v1374_v46, 0.0  ;;  %v1801_v51 = vadd.f32 %v1800_v18, %v1799_v61 }
 0x1b9   :  { %v1089_v22 = vpop.f32.mrf.mxu0  ;;  %v2115_v54 = vpop.f32.mrf.mxu1  ;;  %v1602_v7 = vadd.f32 %v1601_v59, %v1600_v12  ;;  %v1812_v46 = vsel %vm774_vm0, %v1700_v47, 0.0  ;;  %v1615_v57 = vsel %vm774_vm0, %v3151_v26, 0.0  ;;  %v1703_v23 = vmul.f32 %v3205_v35, %v3205_v35 }
 0x1ba   :  { %v1379_v2 = vadd.f32 %v3086_v33, %v1089_v22  ;;  %v3289_v27 = vadd.f32 %v2115_v54, %v2786_v44  ;;  %1506 = vst.msk [vmem:[%s3431_s2 + $0x1c8] sm:$0xff] %vm774_vm0, %v3283_v49  ;;  %v1804_v13 = vsel %vm774_vm0, %v1696_v32, 0.0  ;;  %v1803_v30 = vadd.f32 %v1802_v58, %v1801_v51 }
 0x1bb   :  { %v1091_v24 = vpop.f32.mrf.mxu0  ;;  %v1434_v4 = vpop.f32.mrf.mxu1  ;;  %v1604_v60 = vadd.f32 %v1603_v31, %v1602_v7  ;;  %v1816_v32 = vsel %vm774_vm0, %v1702_v45, 0.0  ;;  %v1704_v61 = vmul.f32 %v3233_v10, %v3233_v10  ;;  %v1705_v54 = vmul.f32 %v3182_v1, %v3182_v1 }
 0x1bc   :  { %1495 = vst.msk [vmem:[%s3431_s2 + $0x170] sm:$0xff] %vm774_vm0, %v1379_v2  ;;  %v1605_v44 = vsel %vm774_vm0, %v1379_v2, 0.0  ;;  %v1697_v33 = vmul.f32 %v1379_v2, %v1379_v2  ;;  %1511 = vst.msk [vmem:[%s3431_s2 + $0x1f0] sm:$0xff] %vm774_vm0, %v3289_v27  ;;  %v3308_v5 = vadd.f32 %v1434_v4, %v2778_v36  ;;  %v1805_v43 = vadd.f32 %v1804_v13, %v1803_v30 }
 0x1bd   :  { %v1092_v16 = vpop.f32.mrf.mxu0  ;;  %v2116_v17 = vpop.f32.mrf.mxu1  ;;  %v1606_v14 = vadd.f32 %v1605_v44, %v1604_v60  ;;  %v1818_v26 = vsel %vm774_vm0, %v1703_v23, 0.0  ;;  %v1619_v58 = vsel %vm774_vm0, %v3233_v10, 0.0  ;;  %v1621_v51 = vsel %vm774_vm0, %v3182_v1, 0.0 }
 0x1be   :  { %v1806_v25 = vsel %vm774_vm0, %v1697_v33, 0.0  ;;  %v1382_v53 = vadd.f32 %v3102_v62, %v1092_v16  ;;  %v3313_v6 = vadd.f32 %v2116_v17, %v2790_v48  ;;  %1509 = vst.msk [vmem:[%s3431_s2 + $0x1e0] sm:$0xff] %vm774_vm0, %v3308_v5  ;;  %v1820_v7 = vsel %vm774_vm0, %v1704_v61, 0.0 }
 0x1bf   :  { %v1094_v52 = vpop.f32.mrf.mxu0  ;;  %v1437_v36 = vpop.f32.mrf.mxu1  ;;  %v1807_v39 = vadd.f32 %v1806_v25, %v1805_v43  ;;  %v1822_v13 = vsel %vm774_vm0, %v1705_v54, 0.0  ;;  %v1623_v44 = vsel %vm774_vm0, %v3213_v9, 0.0  ;;  %v1707_v10 = vmul.f32 %v3259_v21, %v3259_v21 }
 0x1c0   :  { %1496 = vst.msk [vmem:[%s3431_s2 + $0x178] sm:$0xff] %vm774_vm0, %v1382_v53  ;;  %v1607_v48 = vsel %vm774_vm0, %v1382_v53, 0.0  ;;  %v1698_v62 = vmul.f32 %v1382_v53, %v1382_v53  ;;  %1512 = vst.msk [vmem:[%s3431_s2 + $0x1f8] sm:$0xff] %vm774_vm0, %v3313_v6  ;;  %v3333_v55 = vadd.f32 %v1437_v36, %v2782_v40  ;;  %v1701_v40 = vmul.f32 %v3126_v15, %v3126_v15 }
 0x1c1   :  { %v1608_v8 = vadd.f32 %v1607_v48, %v1606_v14  ;;  %v1617_v15 = vsel %vm774_vm0, %v3205_v35, 0.0  ;;  %v1706_v35 = vmul.f32 %v3213_v9, %v3213_v9  ;;  %v1625_v1 = vsel %vm774_vm0, %v3259_v21, 0.0 }
 0x1c2   :  { %v1808_v34 = vsel %vm774_vm0, %v1698_v62, 0.0  ;;  %1510 = vst.msk [vmem:[%s3431_s2 + $0x1e8] sm:$0xff] %vm774_vm0, %v3333_v55  ;;  %v1814_v20 = vsel %vm774_vm0, %v1701_v40, 0.0  ;;  %v1708_v16 = vmul.f32 %v3283_v49, %v3283_v49  ;;  %v1709_v53 = vmul.f32 %v3239_v29, %v3239_v29 }
 0x1c3   :  { %v1610_v28 = vadd.f32 %v1609_v0, %v1608_v8  ;;  %v1809_v19 = vadd.f32 %v1808_v34, %v1807_v39  ;;  %v1824_v60 = vsel %vm774_vm0, %v1706_v35, 0.0  ;;  %v1826_v9 = vsel %vm774_vm0, %v1707_v10, 0.0 }
 0x1c4   :  { %v1627_v43 = vsel %vm774_vm0, %v3283_v49, 0.0  ;;  %v1629_v36 = vsel %vm774_vm0, %v3239_v29, 0.0  ;;  %v1710_v21 = vmul.f32 %v3264_v50, %v3264_v50  ;;  %v1828_v11 = vsel %vm774_vm0, %v1708_v16, 0.0 }
 0x1c5   :  { %v1612_v37 = vadd.f32 %v1611_v63, %v1610_v28  ;;  %v1811_v41 = vadd.f32 %v1810_v38, %v1809_v19  ;;  %v1830_v39 = vsel %vm774_vm0, %v1709_v53, 0.0  ;;  %v1631_v8 = vsel %vm774_vm0, %v3264_v50, 0.0 }
 0x1c6   :  { %v1711_v49 = vmul.f32 %v3308_v5, %v3308_v5  ;;  %v1832_v34 = vsel %vm774_vm0, %v1710_v21, 0.0  ;;  %v1633_v29 = vsel %vm774_vm0, %v3308_v5, 0.0  ;;  %v1712_v28 = vmul.f32 %v3333_v55, %v3333_v55 }
 0x1c7   :  { %v1614_v56 = vadd.f32 %v1613_v42, %v1612_v37  ;;  %v1813_v3 = vadd.f32 %v1812_v46, %v1811_v41  ;;  %v1713_v38 = vmul.f32 %v3289_v27, %v3289_v27  ;;  %v1635_v63 = vsel %vm774_vm0, %v3333_v55, 0.0 }
 0x1c8   :  { %v1834_v50 = vsel %vm774_vm0, %v1711_v49, 0.0  ;;  %v1637_v42 = vsel %vm774_vm0, %v3289_v27, 0.0  ;;  %v1714_v5 = vmul.f32 %v3313_v6, %v3313_v6  ;;  %v1836_v45 = vsel %vm774_vm0, %v1712_v28, 0.0 }
 0x1c9   :  { %v1616_v18 = vadd.f32 %v1615_v57, %v1614_v56  ;;  %v1815_v59 = vadd.f32 %v1814_v20, %v1813_v3  ;;  %v1838_v3 = vsel %vm774_vm0, %v1713_v38, 0.0  ;;  %v1639_v20 = vsel %vm774_vm0, %v3313_v6, 0.0 }
 0x1ca   :  { %v1840_v55 = vsel %vm774_vm0, %v1714_v5, 0.0 }
 0x1cb   :  { %v1618_v12 = vadd.f32 %v1617_v15, %v1616_v18  ;;  %v1817_v22 = vadd.f32 %v1816_v32, %v1815_v59 }
 0x1cd   :  { %v1620_v31 = vadd.f32 %v1619_v58, %v1618_v12  ;;  %v1819_v2 = vadd.f32 %v1818_v26, %v1817_v22  ;;  %v1513_v58 = vld [vmem:[#allocation2] sm:$0x1] }
 0x1cf   :  { %v1821_v24 = vadd.f32 %v1820_v7, %v1819_v2  ;;  %v1622_v4 = vadd.f32 %v1621_v51, %v1620_v31  ;;  %v1650_v51 = vld [vmem:[#allocation3] sm:$0x1] }
 0x1d1   :  { %v1624_v33 = vadd.f32 %v1623_v44, %v1622_v4  ;;  %v1823_v30 = vadd.f32 %v1822_v13, %v1821_v24 }
 0x1d3   :  { %v1626_v17 = vadd.f32 %v1625_v1, %v1624_v33  ;;  %v1825_v25 = vadd.f32 %v1824_v60, %v1823_v30 }
 0x1d5   :  { %v1628_v14 = vadd.f32 %v1627_v43, %v1626_v17  ;;  %v1827_v52 = vadd.f32 %v1826_v9, %v1825_v25 }
 0x1d7   :  { %v1630_v48 = vadd.f32 %v1629_v36, %v1628_v14  ;;  %v1829_v62 = vadd.f32 %v1828_v11, %v1827_v52 }
 0x1d9   :  { %v1632_v0 = vadd.f32 %v1631_v8, %v1630_v48  ;;  %v1831_v47 = vadd.f32 %v1830_v39, %v1829_v62 }
 0x1db   :  { %v1634_v19 = vadd.f32 %v1633_v29, %v1632_v0  ;;  %v1833_v40 = vadd.f32 %v1832_v34, %v1831_v47 }
 0x1dd   :  { %v1636_v37 = vadd.f32 %v1635_v63, %v1634_v19  ;;  %v1835_v41 = vadd.f32 %v1834_v50, %v1833_v40 }
 0x1df   :  { %v1638_v46 = vadd.f32 %v1637_v42, %v1636_v37  ;;  %v1837_v56 = vadd.f32 %v1836_v45, %v1835_v41 }
 0x1e1   :  { %v1640_v57 = vadd.f32 %v1639_v20, %v1638_v46  ;;  %v1839_v23 = vadd.f32 %v1838_v3, %v1837_v56 }
 0x1e3   :  { %v1641_v18 = vrot.slane %v1640_v57, 4  ;;  %v1841_v59 = vadd.f32 %v1840_v55, %v1839_v23 }
 0x1e5   :  { %v1642_v32 = vadd.f32 %v1641_v18, %v1640_v57  ;;  %v1842_v27 = vrot.slane %v1841_v59, 4 }
 0x1e7   :  { %v1643_v15 = vrot.slane %v1642_v32, 2  ;;  %v1843_v61 = vadd.f32 %v1842_v27, %v1841_v59 }
 0x1e9   :  { %v1644_v12 = vadd.f32 %v1643_v15, %v1642_v32  ;;  %v1844_v22 = vrot.slane %v1843_v61, 2 }
 0x1eb   :  { %v1645_v54 = vrot.slane %v1644_v12, 1  ;;  %v1845_v26 = vadd.f32 %v1844_v22, %v1843_v61 }
 0x1ed   :  { %v1646_v31 = vadd.f32 %v1645_v54, %v1644_v12  ;;  %v1846_v2 = vrot.slane %v1845_v26, 1 }
 0x1ef   :  { %v1647_v35 = vadd.f32 %v1646_v31, %v1513_v58  ;;  %v1847_v6 = vadd.f32 %v1846_v2, %v1845_v26 }
 0x1f1   :  { %1649 = vst.msk [vmem:[#allocation2] sm:$0x1] %vm19_vm1, %v1647_v35  ;;  %v1848_v7 = vadd.f32 %v1847_v6, %v1650_v51 }
 0x1f3   :  { %1849 = vst.msk [vmem:[#allocation3] sm:$0x1] %vm19_vm1, %v1848_v7 }
 0x1f8   :  { %v1853_v24 = vld [vmem:[#allocation2] sm:$0x1] }
 0x1f9   :  { %1854 = vst.msk [vmem:[%s3432_s3] sm:$0x1] %vm19_vm1, %v1853_v24 }
 0x1fa   :  { %v1855_v4 = vld [vmem:[#allocation3] sm:$0x1] }
 0x1fb   :  { %1856 = vst.msk [vmem:[%s3433_s4] sm:$0x1] %vm19_vm1, %v1855_v4 }

</bundles_post_ra>
